<compile_context>
chip_gen: v7x
topology: tpu7x:2x2x1
jax: 0.10.0
libtpu: 0.0.40
codegen_flags: <defaults>
</compile_context>

<pallas_src>
import math

import jax
import jax.numpy as jnp
from jax.experimental import pallas as pl
from jax.experimental.pallas import tpu as pltpu


def layer_norm(x, gamma, beta, eps=1e-12):
    mu = jnp.mean(x, axis=-1, keepdims=True)
    var = jnp.mean(jnp.square(x - mu), axis=-1, keepdims=True)
    return (x - mu) * jax.lax.rsqrt(var + eps) * gamma + beta


# --------------------------- fused kernel ------------------------------------
def _make_kernel(Bt, G, S, H, NH, DH, NL, SS, NSEQ):
    M = Bt * G * S          # rows fed to every matmul
    BG = Bt * G             # sequences handled per grid step
    scale = 1.0 / math.sqrt(DH)
    bf16 = jnp.bfloat16

    def kernel(emb_ref, bias_ref, eln_g_ref, eln_b_ref,
               wqkv_ref, bqkv_ref, wo_ref, bo_ref, ln1_g_ref, ln1_b_ref,
               fw1_ref, fb1_ref, fw2_ref, fb2_ref, ln2_g_ref, ln2_b_ref,
               out_ref, x_ref):
        l = pl.program_id(1)

        # Layer 0: embedding LayerNorm initializes the carried residual stream.
        @pl.when(l == 0)
        def _():
            x_ref[...] = layer_norm(emb_ref[...].reshape(M, H),
                                    eln_g_ref[...], eln_b_ref[...])

        x = x_ref[...]                                    # (M, H) f32 residual
        bias = bias_ref[...].reshape(BG, 1, S)            # additive attn mask

        # ---- fused QKV projection: one bf16 (M,H) x (H,3H) matmul ----
        qkv = jnp.dot(x.astype(bf16), wqkv_ref[0],
                      preferred_element_type=jnp.float32) + bqkv_ref[0]
        q3 = qkv[:, 0 * H:1 * H].astype(bf16).reshape(BG, S, H)
        k3 = qkv[:, 1 * H:2 * H].astype(bf16).reshape(BG, S, H)
        v3 = qkv[:, 2 * H:3 * H].astype(bf16).reshape(BG, S, H)

        # ---- attention; per-head output projection accumulated (no concat) --
        attn = None
        for h in range(NH):                 # static unroll; NH is small
            lo, hi = h * DH, (h + 1) * DH
            qh, kh, vh = q3[:, :, lo:hi], k3[:, :, lo:hi], v3[:, :, lo:hi]
            s = jnp.einsum("bqd,bkd->bqk", qh, kh,
                           preferred_element_type=jnp.float32) * scale + bias
            s = s - jnp.max(s, axis=-1, keepdims=True)
            p = jnp.exp(s)
            p = p * pl.reciprocal(jnp.sum(p, axis=-1, keepdims=True),
                                  approx=True)
            ctx = jnp.einsum("bqk,bkd->bqd", p.astype(bf16), vh,
                             preferred_element_type=jnp.float32)
            part = jnp.dot(ctx.reshape(M, DH).astype(bf16), wo_ref[0, h],
                           preferred_element_type=jnp.float32)
            attn = part if attn is None else attn + part
        attn = attn + bo_ref[0]
        x = layer_norm(x + attn, ln1_g_ref[0], ln1_b_ref[0])

        # ---- feed-forward ----
        hmid = jnp.dot(x.astype(bf16), fw1_ref[0],
                       preferred_element_type=jnp.float32) + fb1_ref[0]
        hmid = jax.nn.gelu(hmid, approximate=True)
        ffn = jnp.dot(hmid.astype(bf16), fw2_ref[0],
                      preferred_element_type=jnp.float32) + fb2_ref[0]
        x = layer_norm(x + ffn, ln2_g_ref[0], ln2_b_ref[0])
        x_ref[...] = x

        # Final layer: CLS pooling + n_seqs mean, lane-dense (H=128) store.
        @pl.when(l == NL - 1)
        def _():
            cls = x.reshape(BG, S, H)[:, 0, :]                        # (BG, H)
            pooled = jnp.mean(cls.reshape(Bt, SS, NSEQ, H), axis=2)   # (Bt,SS,H)
            out_ref[...] = pooled.astype(out_ref.dtype)

    return kernel


# ------------------------------ wrapper --------------------------------------
def bert_encoder_wrapper_forward(inputs, params, cfg):
    ss, n_seqs = inputs["set_size"], inputs["n_seqs"]
    bert_inputs = inputs["inputs"]
    input_ids = bert_inputs["input_ids"]
    token_type_ids = bert_inputs["token_type_ids"]
    attention_mask = bert_inputs["attention_mask"].astype(jnp.float32)

    T, S = input_ids.shape
    H, NH, DH, NL = cfg["hidden"], cfg["heads"], cfg["head_dim"], cfg["layers"]
    I = cfg["ffn"]
    G = ss * n_seqs
    B = T // G

    # Sets per grid step: raise matmul M-rows while keeping >= 2 steps on the
    # parallel axis (so both v7x TensorCores get work) and bounding VMEM.
    Bt = 1
    for cand in range(B, 0, -1):
        if B % cand == 0 and (B // cand >= 2 or B == 1) and cand * G * S <= 2048:
            Bt = cand
            break

    # Tiny preprocessing left to XLA (see TODO at top of file).
    emb = (params["word_emb"][input_ids]
           + params["pos_emb"][None, :S, :]
           + params["type_emb"][token_type_ids]).astype(jnp.float32)
    emb = emb.reshape(B, G, S, H)
    attn_bias = ((1.0 - attention_mask) * jnp.float32(-1e9)).reshape(B, G, 1, S)

    # Pack weights: fused QKV, per-head output projection, bf16 matmul weights
    # (biases / LayerNorm params stay f32).
    bf16 = jnp.bfloat16
    wqkv = jnp.concatenate([params["wq"], params["wk"], params["wv"]],
                           axis=-1).astype(bf16)                  # (NL, H, 3H)
    bqkv = jnp.concatenate([params["bq"], params["bk"], params["bv"]],
                           axis=-1)                               # (NL, 1, 3H)
    wo_h = params["wo"].reshape(NL, NH, DH, H).astype(bf16)       # (NL,NH,DH,H)
    fw1 = params["fw1"].astype(bf16)
    fw2 = params["fw2"].astype(bf16)

    kernel = _make_kernel(Bt, G, S, H, NH, DH, NL, ss, n_seqs)

    emb_map = lambda b, l: (b, 0, 0, 0)     # per-set activations (constant in l)
    lw3 = lambda b, l: (l, 0, 0)            # per-layer weights (constant in b)
    lw4 = lambda b, l: (l, 0, 0, 0)
    const2 = lambda b, l: (0, 0)

    in_specs = [
        pl.BlockSpec((Bt, G, S, H), emb_map),        # embeddings (f32)
        pl.BlockSpec((Bt, G, 1, S), emb_map),        # additive mask
        pl.BlockSpec((1, H), const2),                # emb LN gamma
        pl.BlockSpec((1, H), const2),                # emb LN beta
        pl.BlockSpec((1, H, 3 * H), lw3),            # wqkv (bf16)
        pl.BlockSpec((1, 1, 3 * H), lw3),            # bqkv
        pl.BlockSpec((1, NH, DH, H), lw4),           # wo per head (bf16)
        pl.BlockSpec((1, 1, H), lw3),                # bo
        pl.BlockSpec((1, 1, H), lw3),                # ln1 gamma
        pl.BlockSpec((1, 1, H), lw3),                # ln1 beta
        pl.BlockSpec((1, H, I), lw3),                # ffn w1 (bf16)
        pl.BlockSpec((1, 1, I), lw3),                # ffn b1
        pl.BlockSpec((1, I, H), lw3),                # ffn w2 (bf16)
        pl.BlockSpec((1, 1, H), lw3),                # ffn b2
        pl.BlockSpec((1, 1, H), lw3),                # ln2 gamma
        pl.BlockSpec((1, 1, H), lw3),                # ln2 beta
    ]

    # VMEM budget: double-buffered single-layer weights + I/O blocks + carried
    # residual scratch + in-flight f32 temporaries, with 2x headroom.
    M = Bt * G * S
    per_layer_w = (H * 3 * H + H * H + H * I + I * H) * 2 \
        + (3 * H + 6 * H + I) * 4
    est = (2 * per_layer_w
           + 2 * (Bt * G * S * H) * 4 + 2 * (Bt * G * S) * 4
           + 2 * (Bt * ss * H) * 4
           + M * H * 4
           + M * (3 * H + 6 * H + 2 * I) * 4)
    vmem_limit = int(min(64 * 2 ** 20, max(32 * 2 ** 20, 2 * est)))

    return pl.pallas_call(
        kernel,
        out_shape=jax.ShapeDtypeStruct((B, ss, H), jnp.float32),
        grid_spec=pltpu.PrefetchScalarGridSpec(
            num_scalar_prefetch=0,
            grid=(B // Bt, NL),
            in_specs=in_specs,
            out_specs=pl.BlockSpec((Bt, ss, H), lambda b, l: (b, 0, 0)),
            scratch_shapes=[pltpu.VMEM((M, H), jnp.float32)],
        ),
        compiler_params=pltpu.CompilerParams(
            dimension_semantics=("parallel", "arbitrary"),
            vmem_limit_bytes=vmem_limit),
    )(emb, attn_bias,
      params["emb_ln_g"], params["emb_ln_b"],
      wqkv, bqkv, wo_h, params["bo"],
      params["ln1_g"], params["ln1_b"],
      fw1, params["fb1"], fw2, params["fb2"],
      params["ln2_g"], params["ln2_b"])


# --------------------------- pure-JAX reference -------------------------------
def bert_encoder_wrapper_ref(inputs, params, cfg):
    ss, n_seqs = inputs["set_size"], inputs["n_seqs"]
    bi = inputs["inputs"]
    ids, tti = bi["input_ids"], bi["token_type_ids"]
    am = bi["attention_mask"].astype(jnp.float32)
    T, S = ids.shape
    H, NH, DH, NL = cfg["hidden"], cfg["heads"], cfg["head_dim"], cfg["layers"]

    x = (params["word_emb"][ids] + params["pos_emb"][None, :S, :]
         + params["type_emb"][tti]).astype(jnp.float32)
    x = layer_norm(x, params["emb_ln_g"], params["emb_ln_b"])
    bias = ((1.0 - am) * -1e9)[:, None, None, :]             # (T,1,1,S)

    for l in range(NL):
        q = x @ params["wq"][l] + params["bq"][l]
        k = x @ params["wk"][l] + params["bk"][l]
        v = x @ params["wv"][l] + params["bv"][l]
        q = q.reshape(T, S, NH, DH).transpose(0, 2, 1, 3)
        k = k.reshape(T, S, NH, DH).transpose(0, 2, 1, 3)
        v = v.reshape(T, S, NH, DH).transpose(0, 2, 1, 3)
        s = jnp.einsum("tnqd,tnkd->tnqk", q, k) / math.sqrt(DH) + bias
        s = s - s.max(axis=-1, keepdims=True)
        p = jnp.exp(s)
        p = p / p.sum(axis=-1, keepdims=True)
        ctx = jnp.einsum("tnqk,tnkd->tnqd", p, v).transpose(0, 2, 1, 3).reshape(T, S, H)
        x = layer_norm(x + ctx @ params["wo"][l] + params["bo"][l],
                       params["ln1_g"][l], params["ln1_b"][l])
        hmid = jax.nn.gelu(x @ params["fw1"][l] + params["fb1"][l], approximate=True)
        x = layer_norm(x + hmid @ params["fw2"][l] + params["fb2"][l],
                       params["ln2_g"][l], params["ln2_b"][l])

    cls = x[:, 0]
    if n_seqs == 1:
        return cls.reshape(-1, ss, H)
    return cls.reshape(-1, ss, n_seqs, H).mean(axis=2)


if __name__ == "__main__":
    # Small synthetic BERT config (hidden = 128 keeps everything lane-dense).
    cfg = dict(hidden=128, heads=2, head_dim=64, layers=2, ffn=256,
               vocab=128, type_vocab=2)
    B_sets, ss, n_seqs, S = 2, 2, 2, 16
    T = B_sets * ss * n_seqs
    H, NL, I, V = cfg["hidden"], cfg["layers"], cfg["ffn"], cfg["vocab"]

    key = jax.random.PRNGKey(0)
    keys = iter(jax.random.split(key, 32))

    def w(shape, scale=0.02):
        return (scale * jax.random.normal(next(keys), shape)).astype(jnp.float32)

    def ln_pair(shape):
        g = (1.0 + 0.1 * jax.random.normal(next(keys), shape)).astype(jnp.float32)
        b = (0.1 * jax.random.normal(next(keys), shape)).astype(jnp.float32)
        return g, b

    emb_ln_g, emb_ln_b = ln_pair((1, H))
    ln1_g, ln1_b = ln_pair((NL, 1, H))
    ln2_g, ln2_b = ln_pair((NL, 1, H))
    params = dict(
        word_emb=w((V, H)), pos_emb=w((S, H)), type_emb=w((cfg["type_vocab"], H)),
        emb_ln_g=emb_ln_g, emb_ln_b=emb_ln_b,
        wq=w((NL, H, H)), bq=w((NL, 1, H)),
        wk=w((NL, H, H)), bk=w((NL, 1, H)),
        wv=w((NL, H, H)), bv=w((NL, 1, H)),
        wo=w((NL, H, H)), bo=w((NL, 1, H)),
        ln1_g=ln1_g, ln1_b=ln1_b,
        fw1=w((NL, H, I)), fb1=w((NL, 1, I)),
        fw2=w((NL, I, H)), fb2=w((NL, 1, H)),
        ln2_g=ln2_g, ln2_b=ln2_b,
    )

    input_ids = jax.random.randint(next(keys), (T, S), 0, V, dtype=jnp.int32)
    token_type_ids = jax.random.randint(next(keys), (T, S), 0, cfg["type_vocab"],
                                        dtype=jnp.int32)
    attention_mask = jnp.ones((T, S), dtype=jnp.float32)

    inputs = {"set_size": ss, "n_seqs": n_seqs,
              "inputs": {"input_ids": input_ids,
                         "token_type_ids": token_type_ids,
                         "attention_mask": attention_mask}}

    out = bert_encoder_wrapper_forward(inputs, params, cfg)
    out = jax.block_until_ready(out)

    ref = bert_encoder_wrapper_ref(inputs, params, cfg)
    assert out.shape == (B_sets, ss, H), out.shape
    # bf16 matmul operands (f32 accumulation / LN / softmax) vs f32 reference.
    assert jnp.allclose(out, ref, atol=3e-2, rtol=3e-2), (
        "max abs diff vs reference: %f" % float(jnp.max(jnp.abs(out - ref))))

    print("KERNEL_OK")
</pallas_src>

<mosaic_0001>
module attributes {stable_mosaic.version = 11 : i64} {
  func.func @kernel(%arg0: i32, %arg1: i32, %arg2: memref<1x4x16x128xf32, #tpu.memory_space<vmem>>, %arg3: memref<1x4x1x16xf32, #tpu.memory_space<vmem>>, %arg4: memref<1x128xf32, #tpu.memory_space<vmem>>, %arg5: memref<1x128xf32, #tpu.memory_space<vmem>>, %arg6: memref<1x128x384xbf16, #tpu.memory_space<vmem>>, %arg7: memref<1x1x384xf32, #tpu.memory_space<vmem>>, %arg8: memref<1x2x64x128xbf16, #tpu.memory_space<vmem>>, %arg9: memref<1x1x128xf32, #tpu.memory_space<vmem>>, %arg10: memref<1x1x128xf32, #tpu.memory_space<vmem>>, %arg11: memref<1x1x128xf32, #tpu.memory_space<vmem>>, %arg12: memref<1x128x256xbf16, #tpu.memory_space<vmem>>, %arg13: memref<1x1x256xf32, #tpu.memory_space<vmem>>, %arg14: memref<1x256x128xbf16, #tpu.memory_space<vmem>>, %arg15: memref<1x1x128xf32, #tpu.memory_space<vmem>>, %arg16: memref<1x1x128xf32, #tpu.memory_space<vmem>>, %arg17: memref<1x1x128xf32, #tpu.memory_space<vmem>>, %arg18: memref<1x2x128xf32, #tpu.memory_space<vmem>>, %arg19: memref<64x128xf32, #tpu.memory_space<vmem>>) attributes {dimension_semantics = [#tpu.dimension_semantics<parallel>, #tpu.dimension_semantics<arbitrary>], iteration_bounds = array<i64: 2, 2>, scalar_prefetch = 0 : i64, scratch_operands = 1 : i64, tpu.core_type = #tpu.core_type<tc>, window_params = [{transform_indices = @transform_0, window_bounds = array<i64: 1, 4, 16, 128>}, {transform_indices = @transform_1, window_bounds = array<i64: 1, 4, 1, 16>}, {pipeline_mode = #tpu.pipeline_mode<synchronous>, transform_indices = @transform_2, window_bounds = array<i64: 1, 128>}, {pipeline_mode = #tpu.pipeline_mode<synchronous>, transform_indices = @transform_3, window_bounds = array<i64: 1, 128>}, {transform_indices = @transform_4, window_bounds = array<i64: 1, 128, 384>}, {transform_indices = @transform_5, window_bounds = array<i64: 1, 1, 384>}, {transform_indices = @transform_6, window_bounds = array<i64: 1, 2, 64, 128>}, {transform_indices = @transform_7, window_bounds = array<i64: 1, 1, 128>}, {transform_indices = @transform_8, window_bounds = array<i64: 1, 1, 128>}, {transform_indices = @transform_9, window_bounds = array<i64: 1, 1, 128>}, {transform_indices = @transform_10, window_bounds = array<i64: 1, 128, 256>}, {transform_indices = @transform_11, window_bounds = array<i64: 1, 1, 256>}, {transform_indices = @transform_12, window_bounds = array<i64: 1, 256, 128>}, {transform_indices = @transform_13, window_bounds = array<i64: 1, 1, 128>}, {transform_indices = @transform_14, window_bounds = array<i64: 1, 1, 128>}, {transform_indices = @transform_15, window_bounds = array<i64: 1, 1, 128>}, {transform_indices = @transform_16, window_bounds = array<i64: 1, 2, 128>}]} {
    %c0_i32 = arith.constant 0 : i32
    %0 = arith.cmpi eq, %arg1, %c0_i32 : i32
    %1 = arith.extui %0 : i1 to i32
    %c0_i32_0 = arith.constant 0 : i32
    %2 = arith.cmpi ne, %1, %c0_i32_0 : i32
    scf.if %2 {
      %c0_77 = arith.constant 0 : index
      %c0_78 = arith.constant 0 : index
      %c0_79 = arith.constant 0 : index
      %c0_80 = arith.constant 0 : index
      %165 = vector.load %arg2[%c0_77, %c0_78, %c0_79, %c0_80] : memref<1x4x16x128xf32, #tpu.memory_space<vmem>>, vector<1x4x16x128xf32>
      %166 = vector.shape_cast %165 : vector<1x4x16x128xf32> to vector<64x128xf32>
      %c0_81 = arith.constant 0 : index
      %c0_82 = arith.constant 0 : index
      %167 = vector.load %arg4[%c0_81, %c0_82] : memref<1x128xf32, #tpu.memory_space<vmem>>, vector<1x128xf32>
      %c0_83 = arith.constant 0 : index
      %c0_84 = arith.constant 0 : index
      %168 = vector.load %arg5[%c0_83, %c0_84] : memref<1x128xf32, #tpu.memory_space<vmem>>, vector<1x128xf32>
      %cst_85 = arith.constant dense<0.000000e+00> : vector<64xf32>
      %169 = vector.multi_reduction <add>, %166, %cst_85 [1] : vector<64x128xf32> to vector<64xf32>
      %170 = vector.shape_cast %169 : vector<64xf32> to vector<64x1xf32>
      %cst_86 = arith.constant 1.280000e+02 : f32
      %171 = vector.broadcast %cst_86 : f32 to vector<64x1xf32>
      %172 = arith.divf %170, %171 : vector<64x1xf32>
      %173 = vector.broadcast %172 : vector<64x1xf32> to vector<64x128xf32>
      %174 = arith.subf %166, %173 : vector<64x128xf32>
      %175 = arith.mulf %174, %174 : vector<64x128xf32>
      %cst_87 = arith.constant dense<0.000000e+00> : vector<64xf32>
      %176 = vector.multi_reduction <add>, %175, %cst_87 [1] : vector<64x128xf32> to vector<64xf32>
      %177 = vector.shape_cast %176 : vector<64xf32> to vector<64x1xf32>
      %cst_88 = arith.constant 1.280000e+02 : f32
      %178 = vector.broadcast %cst_88 : f32 to vector<64x1xf32>
      %179 = arith.divf %177, %178 : vector<64x1xf32>
      %180 = vector.broadcast %172 : vector<64x1xf32> to vector<64x128xf32>
      %181 = arith.subf %166, %180 : vector<64x128xf32>
      %cst_89 = arith.constant 9.99999996E-13 : f32
      %182 = vector.broadcast %cst_89 : f32 to vector<64x1xf32>
      %183 = arith.addf %179, %182 : vector<64x1xf32>
      %184 = math.rsqrt %183 : vector<64x1xf32>
      %185 = vector.broadcast %184 : vector<64x1xf32> to vector<64x128xf32>
      %186 = arith.mulf %181, %185 : vector<64x128xf32>
      %187 = vector.broadcast %167 : vector<1x128xf32> to vector<64x128xf32>
      %188 = arith.mulf %186, %187 : vector<64x128xf32>
      %189 = vector.broadcast %168 : vector<1x128xf32> to vector<64x128xf32>
      %190 = arith.addf %188, %189 : vector<64x128xf32>
      %c0_90 = arith.constant 0 : index
      %c0_91 = arith.constant 0 : index
      %191 = vector.load %arg19[%c0_90, %c0_91] : memref<64x128xf32, #tpu.memory_space<vmem>>, vector<64x128xf32>
      tpu.vector_store %arg19[%c0_90, %c0_91], %190 {strides = array<i32>} : memref<64x128xf32, #tpu.memory_space<vmem>>, vector<64x128xf32>,
    } else {
    }
    %c0 = arith.constant 0 : index
    %c0_1 = arith.constant 0 : index
    %3 = vector.load %arg19[%c0, %c0_1] : memref<64x128xf32, #tpu.memory_space<vmem>>, vector<64x128xf32>
    %c0_2 = arith.constant 0 : index
    %c0_3 = arith.constant 0 : index
    %c0_4 = arith.constant 0 : index
    %c0_5 = arith.constant 0 : index
    %4 = vector.load %arg3[%c0_2, %c0_3, %c0_4, %c0_5] : memref<1x4x1x16xf32, #tpu.memory_space<vmem>>, vector<1x4x1x16xf32>
    %5 = vector.shape_cast %4 : vector<1x4x1x16xf32> to vector<4x1x16xf32>
    %6 = arith.truncf %3 : vector<64x128xf32> to vector<64x128xbf16>
    %c0_6 = arith.constant 0 : index
    %c0_7 = arith.constant 0 : index
    %c0_8 = arith.constant 0 : index
    %7 = vector.load %arg6[%c0_6, %c0_7, %c0_8] : memref<1x128x384xbf16, #tpu.memory_space<vmem>>, vector<1x128x384xbf16>
    %8 = vector.shape_cast %7 : vector<1x128x384xbf16> to vector<128x384xbf16>
    %cst = arith.constant dense<0.000000e+00> : vector<64x384xf32>
    %9 = tpu.matmul %6, %8, %cst {dimension_numbers = #tpu.dot_dimension_numbers<[1], [0], [0], [1], [0, 0, 1, 1], [], []>} : vector<64x128xbf16>, vector<128x384xbf16>, vector<64x384xf32> -> vector<64x384xf32>
    %c0_9 = arith.constant 0 : index
    %c0_10 = arith.constant 0 : index
    %c0_11 = arith.constant 0 : index
    %10 = vector.load %arg7[%c0_9, %c0_10, %c0_11] : memref<1x1x384xf32, #tpu.memory_space<vmem>>, vector<1x1x384xf32>
    %11 = vector.shape_cast %10 : vector<1x1x384xf32> to vector<1x384xf32>
    %12 = vector.broadcast %11 : vector<1x384xf32> to vector<64x384xf32>
    %13 = arith.addf %9, %12 : vector<64x384xf32>
    %14 = vector.extract_strided_slice %13 {offsets = [0, 0], sizes = [64, 128], strides = [1, 1]} : vector<64x384xf32> to vector<64x128xf32>
    %15 = arith.truncf %14 : vector<64x128xf32> to vector<64x128xbf16>
    %16 = vector.shape_cast %15 : vector<64x128xbf16> to vector<4x16x128xbf16>
    %17 = vector.extract_strided_slice %13 {offsets = [0, 128], sizes = [64, 128], strides = [1, 1]} : vector<64x384xf32> to vector<64x128xf32>
    %18 = arith.truncf %17 : vector<64x128xf32> to vector<64x128xbf16>
    %19 = vector.shape_cast %18 : vector<64x128xbf16> to vector<4x16x128xbf16>
    %20 = vector.extract_strided_slice %13 {offsets = [0, 256], sizes = [64, 128], strides = [1, 1]} : vector<64x384xf32> to vector<64x128xf32>
    %21 = arith.truncf %20 : vector<64x128xf32> to vector<64x128xbf16>
    %22 = vector.shape_cast %21 : vector<64x128xbf16> to vector<4x16x128xbf16>
    %23 = vector.extract_strided_slice %16 {offsets = [0, 0, 0], sizes = [4, 16, 64], strides = [1, 1, 1]} : vector<4x16x128xbf16> to vector<4x16x64xbf16>
    %24 = vector.extract_strided_slice %19 {offsets = [0, 0, 0], sizes = [4, 16, 64], strides = [1, 1, 1]} : vector<4x16x128xbf16> to vector<4x16x64xbf16>
    %25 = vector.extract_strided_slice %22 {offsets = [0, 0, 0], sizes = [4, 16, 64], strides = [1, 1, 1]} : vector<4x16x128xbf16> to vector<4x16x64xbf16>
    "tpu.trace_start"() <{level = 10 : i32, message = "bqd,bkd->bqk"}> : () -> ()
    %cst_12 = arith.constant dense<0.000000e+00> : vector<4x16x16xf32>
    %26 = tpu.matmul %23, %24, %cst_12 {dimension_numbers = #tpu.dot_dimension_numbers<[2], [2], [1], [1], [0, 0, 0, 1, 1, 1], [0], [0]>} : vector<4x16x64xbf16>, vector<4x16x64xbf16>, vector<4x16x16xf32> -> vector<4x16x16xf32>
    "tpu.trace_stop"() : () -> ()
    %cst_13 = arith.constant 1.250000e-01 : f32
    %27 = vector.broadcast %cst_13 : f32 to vector<4x16x16xf32>
    %28 = arith.mulf %26, %27 : vector<4x16x16xf32>
    %29 = vector.broadcast %5 : vector<4x1x16xf32> to vector<4x16x16xf32>
    %30 = arith.addf %28, %29 : vector<4x16x16xf32>
    %cst_14 = arith.constant dense<0xFF800000> : vector<4x16xf32>
    %31 = vector.multi_reduction <maximumf>, %30, %cst_14 [2] : vector<4x16x16xf32> to vector<4x16xf32>
    %32 = vector.shape_cast %31 : vector<4x16xf32> to vector<4x16x1xf32>
    %33 = vector.broadcast %32 : vector<4x16x1xf32> to vector<4x16x16xf32>
    %34 = arith.subf %30, %33 : vector<4x16x16xf32>
    %35 = math.exp %34 : vector<4x16x16xf32>
    %cst_15 = arith.constant dense<0.000000e+00> : vector<4x16xf32>
    %36 = vector.multi_reduction <add>, %35, %cst_15 [2] : vector<4x16x16xf32> to vector<4x16xf32>
    %37 = vector.shape_cast %36 : vector<4x16xf32> to vector<4x16x1xf32>
    %38 = tpu.reciprocal %37 {approx = true} : vector<4x16x1xf32> -> vector<4x16x1xf32>
    %39 = vector.broadcast %38 : vector<4x16x1xf32> to vector<4x16x16xf32>
    %40 = arith.mulf %35, %39 : vector<4x16x16xf32>
    %41 = arith.truncf %40 : vector<4x16x16xf32> to vector<4x16x16xbf16>
    "tpu.trace_start"() <{level = 10 : i32, message = "bqk,bkd->bqd"}> : () -> ()
    %cst_16 = arith.constant dense<0.000000e+00> : vector<4x16x64xf32>
    %42 = tpu.matmul %41, %25, %cst_16 {dimension_numbers = #tpu.dot_dimension_numbers<[2], [1], [1], [2], [0, 0, 0, 1, 1, 2], [0], [0]>} : vector<4x16x16xbf16>, vector<4x16x64xbf16>, vector<4x16x64xf32> -> vector<4x16x64xf32>
    "tpu.trace_stop"() : () -> ()
    %43 = vector.shape_cast %42 : vector<4x16x64xf32> to vector<64x64xf32>
    %44 = arith.truncf %43 : vector<64x64xf32> to vector<64x64xbf16>
    %c0_17 = arith.constant 0 : index
    %c0_18 = arith.constant 0 : index
    %c0_19 = arith.constant 0 : index
    %c0_20 = arith.constant 0 : index
    %45 = vector.load %arg8[%c0_17, %c0_18, %c0_19, %c0_20] : memref<1x2x64x128xbf16, #tpu.memory_space<vmem>>, vector<1x1x64x128xbf16>
    %46 = vector.shape_cast %45 : vector<1x1x64x128xbf16> to vector<64x128xbf16>
    %cst_21 = arith.constant dense<0.000000e+00> : vector<64x128xf32>
    %47 = tpu.matmul %44, %46, %cst_21 {dimension_numbers = #tpu.dot_dimension_numbers<[1], [0], [0], [1], [0, 0, 1, 1], [], []>} : vector<64x64xbf16>, vector<64x128xbf16>, vector<64x128xf32> -> vector<64x128xf32>
    %48 = vector.extract_strided_slice %16 {offsets = [0, 0, 64], sizes = [4, 16, 64], strides = [1, 1, 1]} : vector<4x16x128xbf16> to vector<4x16x64xbf16>
    %49 = vector.extract_strided_slice %19 {offsets = [0, 0, 64], sizes = [4, 16, 64], strides = [1, 1, 1]} : vector<4x16x128xbf16> to vector<4x16x64xbf16>
    %50 = vector.extract_strided_slice %22 {offsets = [0, 0, 64], sizes = [4, 16, 64], strides = [1, 1, 1]} : vector<4x16x128xbf16> to vector<4x16x64xbf16>
    "tpu.trace_start"() <{level = 10 : i32, message = "bqd,bkd->bqk"}> : () -> ()
    %cst_22 = arith.constant dense<0.000000e+00> : vector<4x16x16xf32>
    %51 = tpu.matmul %48, %49, %cst_22 {dimension_numbers = #tpu.dot_dimension_numbers<[2], [2], [1], [1], [0, 0, 0, 1, 1, 1], [0], [0]>} : vector<4x16x64xbf16>, vector<4x16x64xbf16>, vector<4x16x16xf32> -> vector<4x16x16xf32>
    "tpu.trace_stop"() : () -> ()
    %cst_23 = arith.constant 1.250000e-01 : f32
    %52 = vector.broadcast %cst_23 : f32 to vector<4x16x16xf32>
    %53 = arith.mulf %51, %52 : vector<4x16x16xf32>
    %54 = vector.broadcast %5 : vector<4x1x16xf32> to vector<4x16x16xf32>
    %55 = arith.addf %53, %54 : vector<4x16x16xf32>
    %cst_24 = arith.constant dense<0xFF800000> : vector<4x16xf32>
    %56 = vector.multi_reduction <maximumf>, %55, %cst_24 [2] : vector<4x16x16xf32> to vector<4x16xf32>
    %57 = vector.shape_cast %56 : vector<4x16xf32> to vector<4x16x1xf32>
    %58 = vector.broadcast %57 : vector<4x16x1xf32> to vector<4x16x16xf32>
    %59 = arith.subf %55, %58 : vector<4x16x16xf32>
    %60 = math.exp %59 : vector<4x16x16xf32>
    %cst_25 = arith.constant dense<0.000000e+00> : vector<4x16xf32>
    %61 = vector.multi_reduction <add>, %60, %cst_25 [2] : vector<4x16x16xf32> to vector<4x16xf32>
    %62 = vector.shape_cast %61 : vector<4x16xf32> to vector<4x16x1xf32>
    %63 = tpu.reciprocal %62 {approx = true} : vector<4x16x1xf32> -> vector<4x16x1xf32>
    %64 = vector.broadcast %63 : vector<4x16x1xf32> to vector<4x16x16xf32>
    %65 = arith.mulf %60, %64 : vector<4x16x16xf32>
    %66 = arith.truncf %65 : vector<4x16x16xf32> to vector<4x16x16xbf16>
    "tpu.trace_start"() <{level = 10 : i32, message = "bqk,bkd->bqd"}> : () -> ()
    %cst_26 = arith.constant dense<0.000000e+00> : vector<4x16x64xf32>
    %67 = tpu.matmul %66, %50, %cst_26 {dimension_numbers = #tpu.dot_dimension_numbers<[2], [1], [1], [2], [0, 0, 0, 1, 1, 2], [0], [0]>} : vector<4x16x16xbf16>, vector<4x16x64xbf16>, vector<4x16x64xf32> -> vector<4x16x64xf32>
    "tpu.trace_stop"() : () -> ()
    %68 = vector.shape_cast %67 : vector<4x16x64xf32> to vector<64x64xf32>
    %69 = arith.truncf %68 : vector<64x64xf32> to vector<64x64xbf16>
    %c0_27 = arith.constant 0 : index
    %c1 = arith.constant 1 : index
    %c0_28 = arith.constant 0 : index
    %c0_29 = arith.constant 0 : index
    %70 = vector.load %arg8[%c0_27, %c1, %c0_28, %c0_29] : memref<1x2x64x128xbf16, #tpu.memory_space<vmem>>, vector<1x1x64x128xbf16>
    %71 = vector.shape_cast %70 : vector<1x1x64x128xbf16> to vector<64x128xbf16>
    %cst_30 = arith.constant dense<0.000000e+00> : vector<64x128xf32>
    %72 = tpu.matmul %69, %71, %cst_30 {dimension_numbers = #tpu.dot_dimension_numbers<[1], [0], [0], [1], [0, 0, 1, 1], [], []>} : vector<64x64xbf16>, vector<64x128xbf16>, vector<64x128xf32> -> vector<64x128xf32>
    %73 = arith.addf %47, %72 : vector<64x128xf32>
    %c0_31 = arith.constant 0 : index
    %c0_32 = arith.constant 0 : index
    %c0_33 = arith.constant 0 : index
    %74 = vector.load %arg9[%c0_31, %c0_32, %c0_33] : memref<1x1x128xf32, #tpu.memory_space<vmem>>, vector<1x1x128xf32>
    %75 = vector.shape_cast %74 : vector<1x1x128xf32> to vector<1x128xf32>
    %76 = vector.broadcast %75 : vector<1x128xf32> to vector<64x128xf32>
    %77 = arith.addf %73, %76 : vector<64x128xf32>
    %78 = arith.addf %3, %77 : vector<64x128xf32>
    %c0_34 = arith.constant 0 : index
    %c0_35 = arith.constant 0 : index
    %c0_36 = arith.constant 0 : index
    %79 = vector.load %arg10[%c0_34, %c0_35, %c0_36] : memref<1x1x128xf32, #tpu.memory_space<vmem>>, vector<1x1x128xf32>
    %80 = vector.shape_cast %79 : vector<1x1x128xf32> to vector<1x128xf32>
    %c0_37 = arith.constant 0 : index
    %c0_38 = arith.constant 0 : index
    %c0_39 = arith.constant 0 : index
    %81 = vector.load %arg11[%c0_37, %c0_38, %c0_39] : memref<1x1x128xf32, #tpu.memory_space<vmem>>, vector<1x1x128xf32>
    %82 = vector.shape_cast %81 : vector<1x1x128xf32> to vector<1x128xf32>
    %cst_40 = arith.constant dense<0.000000e+00> : vector<64xf32>
    %83 = vector.multi_reduction <add>, %78, %cst_40 [1] : vector<64x128xf32> to vector<64xf32>
    %84 = vector.shape_cast %83 : vector<64xf32> to vector<64x1xf32>
    %cst_41 = arith.constant 1.280000e+02 : f32
    %85 = vector.broadcast %cst_41 : f32 to vector<64x1xf32>
    %86 = arith.divf %84, %85 : vector<64x1xf32>
    %87 = vector.broadcast %86 : vector<64x1xf32> to vector<64x128xf32>
    %88 = arith.subf %78, %87 : vector<64x128xf32>
    %89 = arith.mulf %88, %88 : vector<64x128xf32>
    %cst_42 = arith.constant dense<0.000000e+00> : vector<64xf32>
    %90 = vector.multi_reduction <add>, %89, %cst_42 [1] : vector<64x128xf32> to vector<64xf32>
    %91 = vector.shape_cast %90 : vector<64xf32> to vector<64x1xf32>
    %cst_43 = arith.constant 1.280000e+02 : f32
    %92 = vector.broadcast %cst_43 : f32 to vector<64x1xf32>
    %93 = arith.divf %91, %92 : vector<64x1xf32>
    %94 = vector.broadcast %86 : vector<64x1xf32> to vector<64x128xf32>
    %95 = arith.subf %78, %94 : vector<64x128xf32>
    %cst_44 = arith.constant 9.99999996E-13 : f32
    %96 = vector.broadcast %cst_44 : f32 to vector<64x1xf32>
    %97 = arith.addf %93, %96 : vector<64x1xf32>
    %98 = math.rsqrt %97 : vector<64x1xf32>
    %99 = vector.broadcast %98 : vector<64x1xf32> to vector<64x128xf32>
    %100 = arith.mulf %95, %99 : vector<64x128xf32>
    %101 = vector.broadcast %80 : vector<1x128xf32> to vector<64x128xf32>
    %102 = arith.mulf %100, %101 : vector<64x128xf32>
    %103 = vector.broadcast %82 : vector<1x128xf32> to vector<64x128xf32>
    %104 = arith.addf %102, %103 : vector<64x128xf32>
    %105 = arith.truncf %104 : vector<64x128xf32> to vector<64x128xbf16>
    %c0_45 = arith.constant 0 : index
    %c0_46 = arith.constant 0 : index
    %c0_47 = arith.constant 0 : index
    %106 = vector.load %arg12[%c0_45, %c0_46, %c0_47] : memref<1x128x256xbf16, #tpu.memory_space<vmem>>, vector<1x128x256xbf16>
    %107 = vector.shape_cast %106 : vector<1x128x256xbf16> to vector<128x256xbf16>
    %cst_48 = arith.constant dense<0.000000e+00> : vector<64x256xf32>
    %108 = tpu.matmul %105, %107, %cst_48 {dimension_numbers = #tpu.dot_dimension_numbers<[1], [0], [0], [1], [0, 0, 1, 1], [], []>} : vector<64x128xbf16>, vector<128x256xbf16>, vector<64x256xf32> -> vector<64x256xf32>
    %c0_49 = arith.constant 0 : index
    %c0_50 = arith.constant 0 : index
    %c0_51 = arith.constant 0 : index
    %109 = vector.load %arg13[%c0_49, %c0_50, %c0_51] : memref<1x1x256xf32, #tpu.memory_space<vmem>>, vector<1x1x256xf32>
    %110 = vector.shape_cast %109 : vector<1x1x256xf32> to vector<1x256xf32>
    %111 = vector.broadcast %110 : vector<1x256xf32> to vector<64x256xf32>
    %112 = arith.addf %108, %111 : vector<64x256xf32>
    %113 = arith.mulf %112, %112 : vector<64x256xf32>
    %114 = arith.mulf %112, %113 : vector<64x256xf32>
    %cst_52 = arith.constant 4.471500e-02 : f32
    %115 = vector.broadcast %cst_52 : f32 to vector<64x256xf32>
    %116 = arith.mulf %115, %114 : vector<64x256xf32>
    %117 = arith.addf %112, %116 : vector<64x256xf32>
    %cst_53 = arith.constant 0.797884583 : f32
    %118 = vector.broadcast %cst_53 : f32 to vector<64x256xf32>
    %119 = arith.mulf %118, %117 : vector<64x256xf32>
    %120 = math.tanh %119 : vector<64x256xf32>
    %cst_54 = arith.constant 1.000000e+00 : f32
    %121 = vector.broadcast %cst_54 : f32 to vector<64x256xf32>
    %122 = arith.addf %121, %120 : vector<64x256xf32>
    %cst_55 = arith.constant 5.000000e-01 : f32
    %123 = vector.broadcast %cst_55 : f32 to vector<64x256xf32>
    %124 = arith.mulf %123, %122 : vector<64x256xf32>
    %125 = arith.mulf %112, %124 : vector<64x256xf32>
    %126 = arith.truncf %125 : vector<64x256xf32> to vector<64x256xbf16>
    %c0_56 = arith.constant 0 : index
    %c0_57 = arith.constant 0 : index
    %c0_58 = arith.constant 0 : index
    %127 = vector.load %arg14[%c0_56, %c0_57, %c0_58] : memref<1x256x128xbf16, #tpu.memory_space<vmem>>, vector<1x256x128xbf16>
    %128 = vector.shape_cast %127 : vector<1x256x128xbf16> to vector<256x128xbf16>
    %cst_59 = arith.constant dense<0.000000e+00> : vector<64x128xf32>
    %129 = tpu.matmul %126, %128, %cst_59 {dimension_numbers = #tpu.dot_dimension_numbers<[1], [0], [0], [1], [0, 0, 1, 1], [], []>} : vector<64x256xbf16>, vector<256x128xbf16>, vector<64x128xf32> -> vector<64x128xf32>
    %c0_60 = arith.constant 0 : index
    %c0_61 = arith.constant 0 : index
    %c0_62 = arith.constant 0 : index
    %130 = vector.load %arg15[%c0_60, %c0_61, %c0_62] : memref<1x1x128xf32, #tpu.memory_space<vmem>>, vector<1x1x128xf32>
    %131 = vector.shape_cast %130 : vector<1x1x128xf32> to vector<1x128xf32>
    %132 = vector.broadcast %131 : vector<1x128xf32> to vector<64x128xf32>
    %133 = arith.addf %129, %132 : vector<64x128xf32>
    %134 = arith.addf %104, %133 : vector<64x128xf32>
    %c0_63 = arith.constant 0 : index
    %c0_64 = arith.constant 0 : index
    %c0_65 = arith.constant 0 : index
    %135 = vector.load %arg16[%c0_63, %c0_64, %c0_65] : memref<1x1x128xf32, #tpu.memory_space<vmem>>, vector<1x1x128xf32>
    %136 = vector.shape_cast %135 : vector<1x1x128xf32> to vector<1x128xf32>
    %c0_66 = arith.constant 0 : index
    %c0_67 = arith.constant 0 : index
    %c0_68 = arith.constant 0 : index
    %137 = vector.load %arg17[%c0_66, %c0_67, %c0_68] : memref<1x1x128xf32, #tpu.memory_space<vmem>>, vector<1x1x128xf32>
    %138 = vector.shape_cast %137 : vector<1x1x128xf32> to vector<1x128xf32>
    %cst_69 = arith.constant dense<0.000000e+00> : vector<64xf32>
    %139 = vector.multi_reduction <add>, %134, %cst_69 [1] : vector<64x128xf32> to vector<64xf32>
    %140 = vector.shape_cast %139 : vector<64xf32> to vector<64x1xf32>
    %cst_70 = arith.constant 1.280000e+02 : f32
    %141 = vector.broadcast %cst_70 : f32 to vector<64x1xf32>
    %142 = arith.divf %140, %141 : vector<64x1xf32>
    %143 = vector.broadcast %142 : vector<64x1xf32> to vector<64x128xf32>
    %144 = arith.subf %134, %143 : vector<64x128xf32>
    %145 = arith.mulf %144, %144 : vector<64x128xf32>
    %cst_71 = arith.constant dense<0.000000e+00> : vector<64xf32>
    %146 = vector.multi_reduction <add>, %145, %cst_71 [1] : vector<64x128xf32> to vector<64xf32>
    %147 = vector.shape_cast %146 : vector<64xf32> to vector<64x1xf32>
    %cst_72 = arith.constant 1.280000e+02 : f32
    %148 = vector.broadcast %cst_72 : f32 to vector<64x1xf32>
    %149 = arith.divf %147, %148 : vector<64x1xf32>
    %150 = vector.broadcast %142 : vector<64x1xf32> to vector<64x128xf32>
    %151 = arith.subf %134, %150 : vector<64x128xf32>
    %cst_73 = arith.constant 9.99999996E-13 : f32
    %152 = vector.broadcast %cst_73 : f32 to vector<64x1xf32>
    %153 = arith.addf %149, %152 : vector<64x1xf32>
    %154 = math.rsqrt %153 : vector<64x1xf32>
    %155 = vector.broadcast %154 : vector<64x1xf32> to vector<64x128xf32>
    %156 = arith.mulf %151, %155 : vector<64x128xf32>
    %157 = vector.broadcast %136 : vector<1x128xf32> to vector<64x128xf32>
    %158 = arith.mulf %156, %157 : vector<64x128xf32>
    %159 = vector.broadcast %138 : vector<1x128xf32> to vector<64x128xf32>
    %160 = arith.addf %158, %159 : vector<64x128xf32>
    %c0_74 = arith.constant 0 : index
    %c0_75 = arith.constant 0 : index
    %161 = vector.load %arg19[%c0_74, %c0_75] : memref<64x128xf32, #tpu.memory_space<vmem>>, vector<64x128xf32>
    tpu.vector_store %arg19[%c0_74, %c0_75], %160 {strides = array<i32>} : memref<64x128xf32, #tpu.memory_space<vmem>>, vector<64x128xf32>,
    %c1_i32 = arith.constant 1 : i32
    %162 = arith.cmpi eq, %arg1, %c1_i32 : i32
    %163 = arith.extui %162 : i1 to i32
    %c0_i32_76 = arith.constant 0 : i32
    %164 = arith.cmpi ne, %163, %c0_i32_76 : i32
    scf.if %164 {
      %165 = vector.shape_cast %160 : vector<64x128xf32> to vector<4x16x128xf32>
      %166 = vector.extract_strided_slice %165 {offsets = [0, 0, 0], sizes = [4, 1, 128], strides = [1, 1, 1]} : vector<4x16x128xf32> to vector<4x1x128xf32>
      %167 = vector.shape_cast %166 : vector<4x1x128xf32> to vector<4x128xf32>
      %168 = vector.shape_cast %167 : vector<4x128xf32> to vector<1x2x2x128xf32>
      %cst_77 = arith.constant dense<0.000000e+00> : vector<1x2x128xf32>
      %169 = vector.multi_reduction <add>, %168, %cst_77 [2] : vector<1x2x2x128xf32> to vector<1x2x128xf32>
      %cst_78 = arith.constant 2.000000e+00 : f32
      %170 = vector.broadcast %cst_78 : f32 to vector<1x2x128xf32>
      %171 = arith.divf %169, %170 : vector<1x2x128xf32>
      %c0_79 = arith.constant 0 : index
      %c0_80 = arith.constant 0 : index
      %c0_81 = arith.constant 0 : index
      %172 = vector.load %arg18[%c0_79, %c0_80, %c0_81] : memref<1x2x128xf32, #tpu.memory_space<vmem>>, vector<1x2x128xf32>
      tpu.vector_store %arg18[%c0_79, %c0_80, %c0_81], %171 {strides = array<i32>} : memref<1x2x128xf32, #tpu.memory_space<vmem>>, vector<1x2x128xf32>,
    } else {
    }
    return
  }
  func.func @transform_0(%arg0: i32, %arg1: i32) -> (i32, i32, i32, i32) {
    %c0_i32 = arith.constant 0 : i32
    %c0_i32_0 = arith.constant 0 : i32
    %c0_i32_1 = arith.constant 0 : i32
    %c0_i32_2 = arith.constant 0 : i32
    return %arg0, %c0_i32, %c0_i32_0, %c0_i32_1 : i32, i32, i32, i32
  }
  func.func @transform_1(%arg0: i32, %arg1: i32) -> (i32, i32, i32, i32) {
    %c0_i32 = arith.constant 0 : i32
    %c0_i32_0 = arith.constant 0 : i32
    %c0_i32_1 = arith.constant 0 : i32
    %c0_i32_2 = arith.constant 0 : i32
    return %arg0, %c0_i32, %c0_i32_0, %c0_i32_1 : i32, i32, i32, i32
  }
  func.func @transform_2(%arg0: i32, %arg1: i32) -> (i32, i32) {
    %c0_i32 = arith.constant 0 : i32
    %c0_i32_0 = arith.constant 0 : i32
    %c0_i32_1 = arith.constant 0 : i32
    return %c0_i32, %c0_i32_0 : i32, i32
  }
  func.func @transform_3(%arg0: i32, %arg1: i32) -> (i32, i32) {
    %c0_i32 = arith.constant 0 : i32
    %c0_i32_0 = arith.constant 0 : i32
    %c0_i32_1 = arith.constant 0 : i32
    return %c0_i32, %c0_i32_0 : i32, i32
  }
  func.func @transform_4(%arg0: i32, %arg1: i32) -> (i32, i32, i32) {
    %c0_i32 = arith.constant 0 : i32
    %c0_i32_0 = arith.constant 0 : i32
    %c0_i32_1 = arith.constant 0 : i32
    return %arg1, %c0_i32, %c0_i32_0 : i32, i32, i32
  }
  func.func @transform_5(%arg0: i32, %arg1: i32) -> (i32, i32, i32) {
    %c0_i32 = arith.constant 0 : i32
    %c0_i32_0 = arith.constant 0 : i32
    %c0_i32_1 = arith.constant 0 : i32
    return %arg1, %c0_i32, %c0_i32_0 : i32, i32, i32
  }
  func.func @transform_6(%arg0: i32, %arg1: i32) -> (i32, i32, i32, i32) {
    %c0_i32 = arith.constant 0 : i32
    %c0_i32_0 = arith.constant 0 : i32
    %c0_i32_1 = arith.constant 0 : i32
    %c0_i32_2 = arith.constant 0 : i32
    return %arg1, %c0_i32, %c0_i32_0, %c0_i32_1 : i32, i32, i32, i32
  }
  func.func @transform_7(%arg0: i32, %arg1: i32) -> (i32, i32, i32) {
    %c0_i32 = arith.constant 0 : i32
    %c0_i32_0 = arith.constant 0 : i32
    %c0_i32_1 = arith.constant 0 : i32
    return %arg1, %c0_i32, %c0_i32_0 : i32, i32, i32
  }
  func.func @transform_8(%arg0: i32, %arg1: i32) -> (i32, i32, i32) {
    %c0_i32 = arith.constant 0 : i32
    %c0_i32_0 = arith.constant 0 : i32
    %c0_i32_1 = arith.constant 0 : i32
    return %arg1, %c0_i32, %c0_i32_0 : i32, i32, i32
  }
  func.func @transform_9(%arg0: i32, %arg1: i32) -> (i32, i32, i32) {
    %c0_i32 = arith.constant 0 : i32
    %c0_i32_0 = arith.constant 0 : i32
    %c0_i32_1 = arith.constant 0 : i32
    return %arg1, %c0_i32, %c0_i32_0 : i32, i32, i32
  }
  func.func @transform_10(%arg0: i32, %arg1: i32) -> (i32, i32, i32) {
    %c0_i32 = arith.constant 0 : i32
    %c0_i32_0 = arith.constant 0 : i32
    %c0_i32_1 = arith.constant 0 : i32
    return %arg1, %c0_i32, %c0_i32_0 : i32, i32, i32
  }
  func.func @transform_11(%arg0: i32, %arg1: i32) -> (i32, i32, i32) {
    %c0_i32 = arith.constant 0 : i32
    %c0_i32_0 = arith.constant 0 : i32
    %c0_i32_1 = arith.constant 0 : i32
    return %arg1, %c0_i32, %c0_i32_0 : i32, i32, i32
  }
  func.func @transform_12(%arg0: i32, %arg1: i32) -> (i32, i32, i32) {
    %c0_i32 = arith.constant 0 : i32
    %c0_i32_0 = arith.constant 0 : i32
    %c0_i32_1 = arith.constant 0 : i32
    return %arg1, %c0_i32, %c0_i32_0 : i32, i32, i32
  }
  func.func @transform_13(%arg0: i32, %arg1: i32) -> (i32, i32, i32) {
    %c0_i32 = arith.constant 0 : i32
    %c0_i32_0 = arith.constant 0 : i32
    %c0_i32_1 = arith.constant 0 : i32
    return %arg1, %c0_i32, %c0_i32_0 : i32, i32, i32
  }
  func.func @transform_14(%arg0: i32, %arg1: i32) -> (i32, i32, i32) {
    %c0_i32 = arith.constant 0 : i32
    %c0_i32_0 = arith.constant 0 : i32
    %c0_i32_1 = arith.constant 0 : i32
    return %arg1, %c0_i32, %c0_i32_0 : i32, i32, i32
  }
  func.func @transform_15(%arg0: i32, %arg1: i32) -> (i32, i32, i32) {
    %c0_i32 = arith.constant 0 : i32
    %c0_i32_0 = arith.constant 0 : i32
    %c0_i32_1 = arith.constant 0 : i32
    return %arg1, %c0_i32, %c0_i32_0 : i32, i32, i32
  }
  func.func @transform_16(%arg0: i32, %arg1: i32) -> (i32, i32, i32) {
    %c0_i32 = arith.constant 0 : i32
    %c0_i32_0 = arith.constant 0 : i32
    %c0_i32_1 = arith.constant 0 : i32
    return %arg0, %c0_i32, %c0_i32_0 : i32, i32, i32
  }
}

</mosaic_0001>

<bundles_post_ra>
// kernel: tpu_custom_call.1
= control target key start
LH: loop header
LB: loop body
LE: loop exit
PB: predicated region body
PF: predicated region fallthrough
CT: control target
= control target key end

     0   :  { %s6330_s0 = inlined_call_operand.hbm [shape: f32[2,4,16,128], index: 0, kind: input, shape index: {}]   ;;  %s6331_s1 = inlined_call_operand.hbm [shape: f32[2,4,1,16], index: 1, kind: input, shape index: {}]   ;;  %s6332_s2 = inlined_call_operand.hbm [shape: f32[1,128], index: 2, kind: input, shape index: {}]   ;;  %s6333_s3 = inlined_call_operand.hbm [shape: f32[1,128], index: 3, kind: input, shape index: {}]   ;;  %s6334_s4 = inlined_call_operand.hbm [shape: bf16[2,128,384], index: 4, kind: input, shape index: {}]   ;;  %s6335_s5 = inlined_call_operand.vmem [shape: f32[2,1,384], index: 5, kind: input, shape index: {}]   ;;  %s6336_s6 = inlined_call_operand.hbm [shape: bf16[2,2,64,128], index: 6, kind: input, shape index: {}]   ;;  %s6337_s7 = inlined_call_operand.vmem [shape: f32[2,1,128], index: 7, kind: input, shape index: {}]   ;;  %s6338_s8 = inlined_call_operand.vmem [shape: f32[2,1,128], index: 8, kind: input, shape index: {}]   ;;  %s6339_s9 = inlined_call_operand.vmem [shape: f32[2,1,128], index: 9, kind: input, shape index: {}]   ;;  %s6340_s10 = inlined_call_operand.hbm [shape: bf16[2,128,256], index: 10, kind: input, shape index: {}]   ;;  %s6341_s11 = inlined_call_operand.vmem [shape: f32[2,1,256], index: 11, kind: input, shape index: {}]   ;;  %s6342_s12 = inlined_call_operand.hbm [shape: bf16[2,256,128], index: 12, kind: input, shape index: {}]   ;;  %s6343_s13 = inlined_call_operand.vmem [shape: f32[2,1,128], index: 13, kind: input, shape index: {}]   ;;  %s6344_s14 = inlined_call_operand.vmem [shape: f32[2,1,128], index: 14, kind: input, shape index: {}]   ;;  %s6345_s15 = inlined_call_operand.vmem [shape: f32[2,1,128], index: 15, kind: input, shape index: {}]   ;;  %s6346_s16 = inlined_call_operand.hbm [shape: f32[2,2,128], index: 16, kind: output, shape index: {}]  }
   0x1   :  { %6388 = sst [smem:[#allocation44_spill]] %s6330_s0 }
   0x2   :  { %6389 = sst [smem:[#allocation45_spill]] %s6331_s1 }
   0x3   :  { %6390 = sst [smem:[#allocation46_spill]] %s6332_s2 }
   0x4   :  { %6391 = sst [smem:[#allocation47_spill]] %s6333_s3 }
   0x5   :  { %6392 = sst [smem:[#allocation48_spill]] %s6334_s4 }
   0x6   :  { %6393 = sst [smem:[#allocation49_spill]] %s6335_s5 }
   0x7   :  { %6394 = sst [smem:[#allocation50_spill]] %s6336_s6 }
   0x8   :  { %6395 = sst [smem:[#allocation51_spill]] %s6337_s7 }
   0x9   :  { %6396 = sst [smem:[#allocation52_spill]] %s6338_s8 }
   0xa   :  { %6397 = sst [smem:[#allocation53_spill]] %s6339_s9 }
   0xb   :  { %6398 = sst [smem:[#allocation54_spill]] %s6340_s10 }
   0xc   :  { %6399 = sst [smem:[#allocation55_spill]] %s6341_s11 }
   0xd   :  { %6400 = sst [smem:[#allocation56_spill]] %s6342_s12 }
   0xe   :  { %6401 = sst [smem:[#allocation57_spill]] %s6343_s13 }
   0xf   :  { %6402 = sst [smem:[#allocation58_spill]] %s6344_s14 }
  0x10   :  { %6403 = sst [smem:[#allocation59_spill]] %s6345_s15 }
  0x11   :  { %6404 = sst [smem:[#allocation60_spill]] %s6346_s16 }
  0x12   :  { %21 = vsyncpa [#allocation4], 0 }
  0x13   :  { %23 = vsyncpa [#allocation4 + $0x1], 0 }
  0x14   :  { %24 = vsyncpa [#allocation7], 0 }
  0x15   :  { %26 = vsyncpa [#allocation7 + $0x1], 0 }
  0x16   :  { %27 = vsyncpa [#allocation10], 0 }
  0x17   :  { %28 = vsyncpa [#allocation5], 0 }
  0x18   :  { %30 = vsyncpa [#allocation5 + $0x1], 0  ;;  %s5051_s21 = smov 0   ;;  %s5053_s22 = smov 0  }
  0x19   :  { %s5055_s23 = smov 0   ;;  %s5057_s24 = smov 0  }
  0x1a   :  { %s5059_s25 = smov 0   ;;  %s5061_s26 = smov 0  }
  0x1b   :  { %s5063_s27 = smov 0   ;;  %s5065_s28 = smov 0  }
  0x1c   :  { %s5067_s29 = smov 0   ;;  %s5069_s30 = smov 0  }
  0x1d   :  { %s5071_s0 = smov 0  }
  0x1e LB: > { %6405 = sst [smem:[#allocation25_spill]] %s4907_s22  ;;  %s5105_s17 = sadd.s32 4294967295, %s4943_s0   ;;  %s4943_s0 = sphi %s5071_s0, %s36_s0   ;;  %s4939_s30 = sphi %s5069_s30, %s6505_s30   ;;  %s4935_s29 = sphi %s5067_s29, %s6504_s29   ;;  %s4931_s28 = sphi %s5065_s28, %s6503_s28   ;;  %s4927_s27 = sphi %s5063_s27, %s6502_s27   ;;  %s4923_s26 = sphi %s5061_s26, %s6501_s26   ;;  %s4919_s25 = sphi %s5059_s25, %s6500_s25   ;;  %s4915_s24 = sphi %s5057_s24, %s6499_s24   ;;  %s4911_s23 = sphi %s5055_s23, %s6498_s23   ;;  %s4907_s22 = sphi %s5053_s22, %s6497_s22   ;;  %s4903_s21 = sphi %s5051_s21, %s6496_s21  }
  0x1f   : > { %6406 = sst [smem:[#allocation26_spill]] %s4911_s23  ;;  %s3751_s18 = sadd.s32 4294967294, %s4943_s0  }
  0x20   : > { %6407 = sst [smem:[#allocation27_spill]] %s4915_s24  ;;  %p6352_p0 = scmp.eq.s32.totalorder %s4943_s0, 0 }
  0x21   : > { %6408 = sst [smem:[#allocation28_spill]] %s4919_s25  ;;  %p68_p1 = scmp.ne.s32.totalorder %s4919_s25, %s4915_s24 }
  0x22   : > { %6409 = sst [smem:[#allocation29_spill]] %s4923_s26  ;;  %p6351_p2 = scmp.eq.s32.totalorder %s5105_s17, 0 }
  0x23   : > { %6410 = sst [smem:[#allocation30_spill]] %s4927_s27  ;;  %p156_p3 = scmp.ne.s32.totalorder %s4911_s23, %s4907_s22 }
  0x24   : > { %6411 = sst [smem:[#allocation31_spill]] %s4931_s28  ;;  %p162_p4 = scmp.ne.s32.totalorder %s4907_s22, %s4903_s21 }
  0x25   : > { %6412 = sst [smem:[#allocation32_spill]] %s4935_s29  ;;  %p5118_p5 = por %p6351_p2, %p68_p1 }
  0x26   : > { %6413 = sst [smem:[#allocation33_spill]] %s4939_s30  ;;  %p5125_p7 = por %p156_p3, %p6352_p0 }
  0x27   : > { %6414 = sst [smem:[#allocation34_spill]] %s4943_s0  ;;  %p5131_p8 = por %p162_p4, %p6351_p2 }
  0x28   : > { %s6415_s20 = scalar_select %p5118_p5, 1, 0 }
  0x29   : > { %s6417_s16 = scalar_select %p5125_p7, 1, 0 }
  0x2a   : > { %6416 = sst [smem:[#allocation35_spill]] %s6415_s20  ;;  %p478_p9 = scmp.eq.s32.totalorder %s3751_s18, 3 }
  0x2b   : > { %s6418_s24 = scalar_select %p5131_p8, 1, 0 }
  0x2c   : > { %p3752_p10 = scmp.ge.s32.totalorder %s4943_s0, 1  ;;  %p485_p11 = scmp.lt.s32.totalorder %s4943_s0, 5 }
  0x2d   : > { %6419 = sst [smem:[#allocation36_spill]] %s6418_s24  ;;  %p5137_p12 = por %p478_p9, %p68_p1 }
  0x2e   : > { %p5141_p13 = pnand %p3752_p10, %p485_p11  ;;  %s4945_s28 = smov [#allocation8]  }
  0x2f   : > { %s6420_s21 = scalar_select %p5137_p12, 1, 0 }
  0x30   : > { %s6422_s19 = scalar_select %p5141_p13, 1, 0 }
  0x31   : > { %6421 = sst [smem:[#allocation37_spill]] %s6420_s21  ;;  %s498_s15 = sshll.u32 %s4945_s28, 4  ;;  %s499_s15 = int_to_ptr.vmem [resolvable:$true] %s498_s15 }
  0x32   : > { %p4187_p3 = pneg %p5141_p13  ;;  %s45_s18 = sadd.s32 1, %s4935_s29 }
  0x33   : > { %s6424_s2 = sld [smem:[#allocation46_spill]] }
  0x34   : > { %p5149_p4 = pnand %p4187_p3, %p6351_p2 }
  0x36   : > { %s6423_s14 = scalar_select %p5149_p4, 1, 0 }
  0x37   : > { %p6367_p9 = pneg %p5149_p4 }
  0x39   : > { %s4557_s11 = scalar_lea.hbm %s6424_s2, 16 }
  0x3a   : > { %p4558_p1 = scmp.ne.s32.totalorder %s6424_s2, %s4557_s11  ;;  %p4564_p3 = scmp.lt.u32.totalorder %s4557_s11, %s6424_s2 }
  0x3c   : > { %p4560_p10 = pnand %p6367_p9, %p4558_p1 }
  0x3e   : > { %p4561_p11 = pneg %p4560_p10 }
  0x40   : > { %p4566_p2 = pnand %p4564_p3, %p4561_p11 }
  0x42   : > { %4569 = shalt.err (!%p4566_p2)
}
  0x43   : > { %s4570_s7 = scalar_lea.vmem %s499_s15, 16  ;;  %s4577_s5 = scalar_lea.vmem %s499_s15, 32 }
  0x44   : > { %p4571_p6 = scmp.ne.s32.totalorder %s499_s15, %s4570_s7  ;;  %p4578_p8 = scmp.lt.s32.totalorder %s499_s15, %s499_s15 }
  0x45   : > { %p4579_p5 = scmp.lt.s32.totalorder %s4577_s5, %s4570_s7 }
  0x46   : > { %p4573_p0 = pnand %p4571_p6, %p6367_p9 }
  0x47   : > { %p4580_p13 = por %p4579_p5, %p4578_p8 }
  0x48   : > { %p4574_p12 = pneg %p4573_p0 }
  0x4a   : > { %p4581_p7 = pnand %p4580_p13, %p4574_p12 }
  0x4c   : > { %4584 = shalt.err (!%p4581_p7)
}
  0x4d   : > { %4190 = dma.hbm_to_vmem [thread:$0]  (!%p5149_p4), %s6424_s2, 16, %s499_s15, [#allocation7]  }
  0x4e   : > { %p46_p0 = scmp.ge.s32.totalorder %s45_s18, 2  ;;  %s48_s7 = sadd.s32 1, %s4939_s30 }
  0x4f   : > { %s55_s11 = sadd.s32 1, %s4923_s26  ;;  %p62_p2 = scmp.ne.s32.totalorder %s4923_s26, %s4919_s25 }
  0x50   : > { %s6507_s18 = smov (%p46_p0, %s45_s18), 0  ;;  %s6509_s7 = smov (!%p46_p0, %s48_s7), %s4939_s30 }
  0x51   : > { %6425 = sst [smem:[#allocation38_spill]] %s6507_s18  ;;  %p6426_p5 = scmp.eq.s32.totalorder %s4943_s0, 0 }
  0x52   : > { %s146_s15 = ssub.s32 %s4935_s29, %s6507_s18  ;;  %p50_p7 = scmp.ge.s32.totalorder %s6509_s7, 2 }
  0x53   : > { %p5185_p6 = por %p6426_p5, %p62_p2  ;;  %p147_p8 = scmp.eq.s32.totalorder %s146_s15, 0 }
  0x54   : > { %p6428_p12 = scmp.eq.s32.totalorder %s5105_s17, 3  ;;  %p6368_p1 = scmp.lt.s32.totalorder %s4943_s0, 4 }
  0x55   : > { %s6511_s7 = smov (%p50_p7, %s6509_s7), 0  ;;  %s6432_s28 = sadd.s32 1, %s4911_s23 }
  0x56   : > { %p5193_p13 = por %p6428_p12, %p62_p2  ;;  %6431 = sst [smem:[#allocation40_spill]] %s6511_s7 }
  0x57   : > { %s5203_s5 = scalar_select %p147_p8, %s4911_s23, %s6432_s28  }
  0x58   : > { %s6429_s21 = scalar_select %p5193_p13, 1, 0 }
  0x59   : > { %6433 = sst [smem:[#allocation41_spill]] %s5203_s5  ;;  %s52_s9 = ssub.s32 %s4939_s30, %s6511_s7 }
  0x5a   : > { %6430 = sst [smem:[#allocation39_spill]] %s6429_s21  ;;  %s6370_s8 = sand.u32 1, %s4943_s0  }
  0x5b   : > { %p53_p10 = scmp.eq.s32.totalorder %s52_s9, 0  ;;  %s6366_s2 = sand.u32 1, %s4923_s26  }
  0x5c   : > { %s3896_s18 = sshll.u32 %s4939_s30, 10  ;;  %s3756_s15 = sshll.u32 %s6366_s2, 6 }
  0x5d   : > { %s5211_s27 = scalar_select %p53_p10, %s4923_s26, %s55_s11  }
  0x5e   : > { %s6435_s21 = sld [smem:[#allocation44_spill]]  ;;  %p5224_p11 = pnand %p6368_p1, %p5185_p6 }
  0x5f   : > { %6434 = sst [smem:[#allocation42_spill]] %s5211_s27  ;;  %s524_s11 = scalar_lea.vmem [#allocation3], %s3756_s15 }
  0x60   : > { %s531_s9 = sshll.u32 %s524_s11, 4  ;;  %s5232_s22 = scalar_lea.sflag [#allocation4], %s6370_s8  ;;  %s5228_s9 = int_to_ptr.vmem [resolvable:$true] %s531_s9 }
  0x61   : > { %p4587_p0 = pneg %p5224_p11 }
  0x64   : > { %s6436_s20 = smov %s6435_s21  ;;  %s5218_s25 = scalar_lea.hbm %s6435_s21, %s3896_s18 }
  0x65   : > { %s4585_s24 = scalar_lea.hbm %s5218_s25, 1024  ;;  %s4590_s21 = scalar_lea.hbm %s6436_s20, 2048 }
  0x66   : > { %p4586_p3 = scmp.ne.s32.totalorder %s5218_s25, %s4585_s24  ;;  %p4591_p6 = scmp.lt.u32.totalorder %s5218_s25, %s6436_s20 }
  0x67   : > { %p4592_p7 = scmp.lt.u32.totalorder %s4590_s21, %s4585_s24  ;;  %p4594_p12 = scmp.lt.u32.totalorder %s4585_s24, %s5218_s25 }
  0x68   : > { %p4588_p2 = pnand %p4587_p0, %p4586_p3 }
  0x69   : > { %p4593_p8 = por %p4592_p7, %p4591_p6 }
  0x6a   : > { %p4589_p5 = pneg %p4588_p2 }
  0x6b   : > { %p4595_p10 = por %p4594_p12, %p4593_p8 }
  0x6d   : > { %p4596_p9 = pnand %p4595_p10, %p4589_p5 }
  0x6f   : > { %4599 = shalt.err (!%p4596_p9)
}
  0x70   : > { %s4600_s11 = scalar_lea.vmem %s5228_s9, 1024  ;;  %s4946_s18 = smov [#allocation3]  }
  0x71   : > { %p4601_p3 = scmp.ne.s32.totalorder %s5228_s9, %s4600_s11  ;;  %s4605_s13 = sshll.u32 %s4946_s18, 4  ;;  %s4606_s13 = int_to_ptr.vmem [resolvable:$false] %s4605_s13 }
  0x72   : > { %s4607_s2 = scalar_lea.vmem %s4606_s13, 2048  ;;  %p4608_p13 = scmp.lt.s32.totalorder %s5228_s9, %s4606_s13 }
  0x73   : > { %p4603_p2 = pnand %p4601_p3, %p4587_p0  ;;  %p4609_p6 = scmp.lt.s32.totalorder %s4607_s2, %s4600_s11 }
  0x75   : > { %p4604_p1 = pneg %p4603_p2  ;;  %p4610_p7 = por %p4609_p6, %p4608_p13 }
  0x77   : > { %p4611_p8 = pnand %p4610_p7, %p4604_p1 }
  0x79   : > { %4614 = shalt.err (!%p4611_p8)
}
  0x7a   : > { %s6375_s24 = smov 128   ;;  %s6376_s21 = smov 8  }
  0x7b   : > { %4197 = dma.hbm_to_vmem [thread:$0]  (!%p5224_p11), %s5218_s25, 1024, %s5228_s9, %s5232_s22, %s6375_s24, %s6375_s24, %s6376_s21  }
  0x7c   : > { %s6438_s15 = sand.u32 1, %s4923_s26   ;;  %p6439_p9 = scmp.ne.s32.totalorder %s6417_s16, 0 }
  0x7d   : > { %s3759_s11 = sshll.u32 %s6438_s15, 2  ;;  %p6440_p13 = scmp.lt.s32.totalorder %s4943_s0, 4 }
  0x7e   : > { %s3897_s13 = sshll.u32 %s4939_s30, 6  ;;  %s545_s2 = scalar_lea.vmem [#allocation6], %s3759_s11 }
  0x7f   : > { %p5269_p1 = pnand %p6440_p13, %p6439_p9  ;;  %s552_s8 = sshll.u32 %s545_s2, 4  ;;  %s5279_s8 = int_to_ptr.vmem [resolvable:$true] %s552_s8 }
  0x80   : > { %s6442_s1 = sld [smem:[#allocation45_spill]]  ;;  %s6443_s16 = sand.u32 1, %s4943_s0  }
  0x81   : > { %s6441_s18 = scalar_select %p5269_p1, 1, 0 }
  0x82   : > { %s5283_s25 = scalar_lea.sflag [#allocation7], %s6443_s16 }
  0x86   : > { %s5277_s27 = scalar_lea.hbm %s6442_s1, %s3897_s13  ;;  %s4620_s20 = scalar_lea.hbm %s6442_s1, 128 }
  0x87   : > { %s4615_s9 = scalar_lea.hbm %s5277_s27, 64  ;;  %p4621_p3 = scmp.lt.u32.totalorder %s5277_s27, %s6442_s1 }
  0x88   : > { %p4616_p5 = scmp.ne.s32.totalorder %s5277_s27, %s4615_s9  ;;  %p4622_p2 = scmp.lt.u32.totalorder %s4620_s20, %s4615_s9 }
  0x89   : > { %p4624_p7 = scmp.lt.u32.totalorder %s4615_s9, %s5277_s27 }
  0x8a   : > { %p4618_p12 = pnand %p4616_p5, %p4587_p0  ;;  %p4623_p6 = por %p4622_p2, %p4621_p3 }
  0x8c   : > { %p4619_p10 = pneg %p4618_p12  ;;  %p4625_p8 = por %p4624_p7, %p4623_p6 }
  0x8e   : > { %p4626_p9 = pnand %p4625_p8, %p4619_p10 }
  0x90   : > { %4629 = shalt.err (!%p4626_p9)
}
  0x91   : > { %s4630_s2 = scalar_lea.vmem %s5279_s8, 64  ;;  %s4949_s16 = smov [#allocation6]  }
  0x92   : > { %p4631_p13 = scmp.ne.s32.totalorder %s5279_s8, %s4630_s2  ;;  %s4635_s15 = sshll.u32 %s4949_s16, 4  ;;  %s4636_s15 = int_to_ptr.vmem [resolvable:$false] %s4635_s15 }
  0x93   : > { %s4637_s11 = scalar_lea.vmem %s4636_s15, 128  ;;  %p4638_p4 = scmp.lt.s32.totalorder %s5279_s8, %s4636_s15 }
  0x94   : > { %p4633_p5 = pnand %p4631_p13, %p4587_p0  ;;  %p4639_p3 = scmp.lt.s32.totalorder %s4637_s11, %s4630_s2 }
  0x96   : > { %p4634_p12 = pneg %p4633_p5  ;;  %p4640_p2 = por %p4639_p3, %p4638_p4 }
  0x98   : > { %p4641_p6 = pnand %p4640_p2, %p4634_p12 }
  0x9a   : > { %4644 = shalt.err (!%p4641_p6)
}
  0x9b   : > { %s4950_s9 = smov 16   ;;  %s4951_s20 = smov 1  }
  0x9c   : > { %4200 = dma.hbm_to_vmem [thread:$0]  (!%p5224_p11), %s5277_s27, 64, %s5279_s8, %s5283_s25, %s4950_s9, %s4950_s9, %s4951_s20  }
  0x9d   : > { %s5310_s7 = sand.u32 1, %s4911_s23   ;;  %s4162_s13 = smul.u32 3072, %s4935_s29 }
  0x9e   : > { %s4161_s2 = smul.u32 192, %s5310_s7  ;;  %s6444_s4 = sld [smem:[#allocation48_spill]] }
  0x9f   : > { %s3763_s24 = sshll.u32 %s5310_s7, 6  ;;  %s3898_s27 = sshll.u32 %s4935_s29, 10 }
  0xa0   : > { %s566_s21 = scalar_lea.vmem [#allocation11], %s4161_s2  ;;  %p5327_p11 = pneg %p5269_p1 }
  0xa1   : > { %s573_s1 = sshll.u32 %s566_s21, 4  ;;  %s5320_s1 = int_to_ptr.vmem [resolvable:$true] %s573_s1 }
  0xa2   : > { %s6445_s28 = scalar_select %p5327_p11, 1, 0 }
  0xa4   : > { %s5317_s11 = scalar_lea.hbm %s6444_s4, %s4162_s13  ;;  %s4650_s13 = scalar_lea.hbm %s6444_s4, 6144 }
  0xa5   : > { %s4645_s8 = scalar_lea.hbm %s5317_s11, 3072  ;;  %p4651_p7 = scmp.lt.u32.totalorder %s5317_s11, %s6444_s4 }
  0xa6   : > { %p4646_p4 = scmp.ne.s32.totalorder %s5317_s11, %s4645_s8  ;;  %p4652_p8 = scmp.lt.u32.totalorder %s4650_s13, %s4645_s8 }
  0xa7   : > { %p4654_p13 = scmp.lt.u32.totalorder %s4645_s8, %s5317_s11 }
  0xa8   : > { %p4648_p0 = pnand %p5327_p11, %p4646_p4  ;;  %p4653_p9 = por %p4652_p8, %p4651_p7 }
  0xaa   : > { %p4649_p10 = pneg %p4648_p0  ;;  %p4655_p5 = por %p4654_p13, %p4653_p9 }
  0xac   : > { %p4656_p12 = pnand %p4655_p5, %p4649_p10 }
  0xae   : > { %4659 = shalt.err (!%p4656_p12)
}
  0xaf   : > { %s4660_s16 = scalar_lea.vmem %s5320_s1, 3072  ;;  %s4952_s15 = smov [#allocation11]  }
  0xb0   : > { %p4661_p3 = scmp.ne.s32.totalorder %s5320_s1, %s4660_s16  ;;  %s4665_s9 = sshll.u32 %s4952_s15, 4  ;;  %s4666_s9 = int_to_ptr.vmem [resolvable:$false] %s4665_s9 }
  0xb1   : > { %s4667_s20 = scalar_lea.vmem %s4666_s9, 6144  ;;  %p4668_p4 = scmp.lt.s32.totalorder %s5320_s1, %s4666_s9 }
  0xb2   : > { %p4663_p2 = pnand %p4661_p3, %p5327_p11  ;;  %p4669_p0 = scmp.lt.s32.totalorder %s4667_s20, %s4660_s16 }
  0xb4   : > { %p4664_p6 = pneg %p4663_p2  ;;  %p4670_p7 = por %p4669_p0, %p4668_p4 }
  0xb6   : > { %p4671_p8 = pnand %p4670_p7, %p4664_p6 }
  0xb8   : > { %4674 = shalt.err (!%p4671_p8)
}
  0xb9   : > { %s4953_s8 = smov 192   ;;  %s4954_s13 = smov 12  }
  0xba   : > { %4203 = dma.hbm_to_vmem [thread:$0]  (!%p5269_p1), %s5317_s11, 3072, %s5320_s1, %s5232_s22, %s4953_s8, %s4953_s8, %s4954_s13  }
  0xbb   : > { %s6446_s6 = sld [smem:[#allocation50_spill]]  ;;  %s594_s16 = scalar_lea.vmem [#allocation12], %s3763_s24 }
  0xbc   : > { %s601_s9 = sshll.u32 %s594_s16, 4  ;;  %s5360_s9 = int_to_ptr.vmem [resolvable:$true] %s601_s9 }
  0xc1   : > { %s5356_s15 = scalar_lea.hbm %s6446_s6, %s3898_s27  ;;  %s4680_s8 = scalar_lea.hbm %s6446_s6, 2048 }
  0xc2   : > { %s4675_s20 = scalar_lea.hbm %s5356_s15, 1024  ;;  %p4681_p5 = scmp.lt.u32.totalorder %s5356_s15, %s6446_s6 }
  0xc3   : > { %p4676_p10 = scmp.ne.s32.totalorder %s5356_s15, %s4675_s20  ;;  %p4682_p12 = scmp.lt.u32.totalorder %s4680_s8, %s4675_s20 }
  0xc4   : > { %p4684_p2 = scmp.lt.u32.totalorder %s4675_s20, %s5356_s15 }
  0xc5   : > { %p4678_p9 = pnand %p4676_p10, %p5327_p11  ;;  %p4683_p3 = por %p4682_p12, %p4681_p5 }
  0xc7   : > { %p4679_p13 = pneg %p4678_p9  ;;  %p4685_p6 = por %p4684_p2, %p4683_p3 }
  0xc9   : > { %p4686_p4 = pnand %p4685_p6, %p4679_p13 }
  0xcb   : > { %4689 = shalt.err (!%p4686_p4)
}
  0xcc   : > { %s4690_s24 = scalar_lea.vmem %s5360_s9, 1024  ;;  %s4955_s2 = smov [#allocation12]  }
  0xcd   : > { %p4691_p0 = scmp.ne.s32.totalorder %s5360_s9, %s4690_s24  ;;  %s4695_s21 = sshll.u32 %s4955_s2, 4  ;;  %s4696_s21 = int_to_ptr.vmem [resolvable:$false] %s4695_s21 }
  0xce   : > { %s4697_s16 = scalar_lea.vmem %s4696_s21, 2048  ;;  %p4698_p10 = scmp.lt.s32.totalorder %s5360_s9, %s4696_s21 }
  0xcf   : > { %p4693_p7 = pnand %p4691_p0, %p5327_p11  ;;  %p4699_p9 = scmp.lt.s32.totalorder %s4697_s16, %s4690_s24 }
  0xd1   : > { %p4694_p8 = pneg %p4693_p7  ;;  %p4700_p5 = por %p4699_p9, %p4698_p10 }
  0xd3   : > { %p4701_p12 = pnand %p4700_p5, %p4694_p8 }
  0xd5   : > { %4704 = shalt.err (!%p4701_p12)
}
  0xd6   : > { %s4956_s20 = smov 64   ;;  %s4957_s1 = smov 4  }
  0xd7   : > { %4206 = dma.hbm_to_vmem [thread:$0]  (!%p5269_p1), %s5356_s15, 1024, %s5360_s9, %s5283_s25, %s4956_s20, %s4956_s20, %s4957_s1  }
  0xd8   : > { %s4958_s11 = smov [#allocation9]   ;;  %s3766_s27 = sshll.u32 %s5310_s7, 7 }
  0xd9   : > { %s509_s8 = sshll.u32 %s4958_s11, 4  ;;  %s6447_s3 = sld [smem:[#allocation47_spill]]  ;;  %s510_s8 = int_to_ptr.vmem [resolvable:$true] %s509_s8 }
  0xda   : > { %p6448_p3 = scmp.ne.s32.totalorder %s6423_s14, 0 }
  0xdc   : > { %p6449_p2 = pneg %p6448_p3 }
  0xdf   : > { %s4705_s2 = scalar_lea.hbm %s6447_s3, 16 }
  0xe0   : > { %p4706_p13 = scmp.ne.s32.totalorder %s6447_s3, %s4705_s2  ;;  %p4712_p0 = scmp.lt.u32.totalorder %s4705_s2, %s6447_s3 }
  0xe2   : > { %p4708_p6 = pnand %p4706_p13, %p6449_p2 }
  0xe4   : > { %p4709_p4 = pneg %p4708_p6 }
  0xe6   : > { %p4714_p7 = pnand %p4712_p0, %p4709_p4 }
  0xe8   : > { %4717 = shalt.err (!%p4714_p7)
}
  0xe9   : > { %s4718_s15 = scalar_lea.vmem %s510_s8, 16  ;;  %p6450_p10 = pmov %p6449_p2 }
  0xea   : > { %p4719_p8 = scmp.ne.s32.totalorder %s510_s8, %s4718_s15  ;;  %s4725_s9 = scalar_lea.vmem %s510_s8, 32 }
  0xeb   : > { %p4726_p12 = scmp.lt.s32.totalorder %s510_s8, %s510_s8  ;;  %p4727_p1 = scmp.lt.s32.totalorder %s4725_s9, %s4718_s15 }
  0xec   : > { %p4721_p9 = pnand %p4719_p8, %p6450_p10 }
  0xed   : > { %p4728_p11 = por %p4727_p1, %p4726_p12 }
  0xee   : > { %p4722_p5 = pneg %p4721_p9 }
  0xf0   : > { %p4729_p2 = pnand %p4728_p11, %p4722_p5 }
  0xf2   : > { %4732 = shalt.err (!%p4729_p2)
}
  0xf3   : > { %4193 = dma.hbm_to_vmem [thread:$0]  (!%p6448_p3), %s6447_s3, 16, %s510_s8, [#allocation10]  }
  0xf4   : > { %s3899_s6 = sshll.u32 %s4935_s29, 11  ;;  %s633_s13 = scalar_lea.vmem [#allocation13], %s3766_s27 }
  0xf5   : > { %s640_s24 = sshll.u32 %s633_s13, 4  ;;  %s6451_s10 = sld [smem:[#allocation54_spill]]  ;;  %s5418_s24 = int_to_ptr.vmem [resolvable:$true] %s640_s24 }
  0xf6   : > { %p6452_p11 = scmp.ne.s32.totalorder %s6445_s28, 0 }
  0xfb   : > { %s5416_s16 = scalar_lea.hbm %s6451_s10, %s3899_s6  ;;  %s4738_s9 = scalar_lea.hbm %s6451_s10, 4096 }
  0xfc   : > { %s4733_s14 = scalar_lea.hbm %s5416_s16, 2048  ;;  %p4739_p6 = scmp.lt.u32.totalorder %s5416_s16, %s6451_s10 }
  0xfd   : > { %p4734_p1 = scmp.ne.s32.totalorder %s5416_s16, %s4733_s14  ;;  %p4740_p4 = scmp.lt.u32.totalorder %s4738_s9, %s4733_s14 }
  0xfe   : > { %p4742_p7 = scmp.lt.u32.totalorder %s4733_s14, %s5416_s16 }
  0xff   : > { %p4736_p13 = pnand %p4734_p1, %p6452_p11  ;;  %p4741_p0 = por %p4740_p4, %p4739_p6 }
 0x101   : > { %p4737_p3 = pneg %p4736_p13  ;;  %p4743_p8 = por %p4742_p7, %p4741_p0 }
 0x103   : > { %p4744_p10 = pnand %p4743_p8, %p4737_p3 }
 0x105   : > { %4747 = shalt.err (!%p4744_p10)
}
 0x106   : > { %s4748_s13 = scalar_lea.vmem %s5418_s24, 2048  ;;  %s4959_s2 = smov [#allocation13]  }
 0x107   : > { %p4749_p9 = scmp.ne.s32.totalorder %s5418_s24, %s4748_s13  ;;  %s4753_s21 = sshll.u32 %s4959_s2, 4  ;;  %s4754_s21 = int_to_ptr.vmem [resolvable:$false] %s4753_s21 }
 0x108   : > { %s4755_s8 = scalar_lea.vmem %s4754_s21, 4096  ;;  %p4756_p2 = scmp.lt.s32.totalorder %s5418_s24, %s4754_s21 }
 0x109   : > { %p4751_p5 = pnand %p4749_p9, %p6452_p11  ;;  %p4757_p1 = scmp.lt.s32.totalorder %s4755_s8, %s4748_s13 }
 0x10b   : > { %p4752_p12 = pneg %p4751_p5  ;;  %p4758_p13 = por %p4757_p1, %p4756_p2 }
 0x10d   : > { %p4759_p6 = pnand %p4758_p13, %p4752_p12 }
 0x10f   : > { %4762 = shalt.err (!%p4759_p6)
}
 0x110   : > { %p6453_p3 = scmp.ne.s32.totalorder %s6441_s18, 0  ;;  %s6454_s14 = smov 8  }
 0x111   : > { %s6455_s15 = smov 128   ;;  %s6456_s12 = sld [smem:[#allocation56_spill]] }
 0x112   : > { %4209 = dma.hbm_to_vmem [thread:$0]  (!%p6453_p3), %s5416_s16, 2048, %s5418_s24, %s5232_s22, %s6455_s15, %s6455_s15, %s6454_s14  }
 0x113   : > { %s661_s13 = scalar_lea.vmem [#allocation14], %s3766_s27 }
 0x114   : > { %s668_s2 = sshll.u32 %s661_s13, 4  ;;  %s5454_s2 = int_to_ptr.vmem [resolvable:$true] %s668_s2 }
 0x117   : > { %s5450_s4 = scalar_lea.hbm %s6456_s12, %s3899_s6  ;;  %s4768_s16 = scalar_lea.hbm %s6456_s12, 4096 }
 0x118   : > { %s4763_s21 = scalar_lea.hbm %s5450_s4, 2048  ;;  %p4769_p8 = scmp.lt.u32.totalorder %s5450_s4, %s6456_s12 }
 0x119   : > { %p4764_p4 = scmp.ne.s32.totalorder %s5450_s4, %s4763_s21  ;;  %p4770_p10 = scmp.lt.u32.totalorder %s4768_s16, %s4763_s21 }
 0x11a   : > { %p4772_p5 = scmp.lt.u32.totalorder %s4763_s21, %s5450_s4 }
 0x11b   : > { %p4766_p0 = pnand %p4764_p4, %p6452_p11  ;;  %p4771_p9 = por %p4770_p10, %p4769_p8 }
 0x11d   : > { %p4767_p7 = pneg %p4766_p0  ;;  %p4773_p12 = por %p4772_p5, %p4771_p9 }
 0x11f   : > { %p4774_p2 = pnand %p4773_p12, %p4767_p7 }
 0x121   : > { %4777 = shalt.err (!%p4774_p2)
}
 0x122   : > { %s4778_s7 = scalar_lea.vmem %s5454_s2, 2048  ;;  %s4960_s27 = smov [#allocation14]  }
 0x123   : > { %p4779_p1 = scmp.ne.s32.totalorder %s5454_s2, %s4778_s7  ;;  %s4783_s14 = sshll.u32 %s4960_s27, 4  ;;  %s4784_s14 = int_to_ptr.vmem [resolvable:$false] %s4783_s14 }
 0x124   : > { %s4785_s15 = scalar_lea.vmem %s4784_s14, 4096  ;;  %p4786_p4 = scmp.lt.s32.totalorder %s5454_s2, %s4784_s14 }
 0x125   : > { %p4781_p13 = pnand %p4779_p1, %p6452_p11  ;;  %p4787_p0 = scmp.lt.s32.totalorder %s4785_s15, %s4778_s7 }
 0x127   : > { %p4782_p6 = pneg %p4781_p13  ;;  %p4788_p8 = por %p4787_p0, %p4786_p4 }
 0x129   : > { %p4789_p10 = pnand %p4788_p8, %p4782_p6 }
 0x12b   : > { %4792 = shalt.err (!%p4789_p10)
}
 0x12c   : > { %4212 = dma.hbm_to_vmem [thread:$0]  (!%p6453_p3), %s5450_s4, 2048, %s5454_s2, %s5283_s25, %s4956_s20, %s4956_s20, %s4957_s1  }
 0x12d   : > { %p6457_p11 = scmp.ne.s32.totalorder %s6422_s19, 0 }
 0x12f   : > { %698 = sbr.rel (%p6457_p11) target bundleno = 3738 (0xe9a), region = 84 }
 0x136   : > { %s6458_s28 = sld [smem:[#allocation28_spill]]  ;;  %s6459_s9 = sld [smem:[#allocation35_spill]] }
 0x137   : > { %s700_s11 = sand.u32 1, %s5105_s17  }
 0x138   : > { %s701_s22 = scalar_lea.sflag [#allocation4], %s700_s11 }
 0x13c   : > { %s5485_s13 = sand.u32 1, %s6458_s28   ;;  %p6461_p7 = scmp.ne.s32.totalorder %s6459_s9, 0 }
 0x13d   : > { %6460 = sst [smem:[#allocation43_spill]] %s5485_s13  ;;  %s3773_s21 = sshll.u32 %s5485_s13, 6 }
 0x13e   : > { %s5488_s18 = scalar_lea.vmem [#allocation3], %s3773_s21 }
 0x13f   : > { %4866 = dma.done.wait (%p6461_p7), %s701_s22, 1024  }
 0x140   : > { %4868 = vsyncadd (%p6461_p7), %s701_s22, 4294966272  ;;  %s3774_s19 = sshll.u32 %s5485_s13, 2  ;;  %s710_s25 = scalar_lea.sflag [#allocation7], %s700_s11 }
 0x141   : > { %s5495_s20 = scalar_lea.vmem [#allocation6], %s3774_s19 }
 0x142   : > { %4870 = dma.done.wait (%p6461_p7), %s710_s25, 64  }
 0x143   : > { %4872 = vsyncadd (%p6461_p7), %s710_s25, 4294967232  ;;  %p6462_p3 = scmp.eq.s32.totalorder %s5105_s17, 0 }
 0x145   : > { %4874 = dma.done.wait (%p6462_p3), [#allocation7], 16   ;;  %p6463_p9 = pmov %p6462_p3 }
 0x146   : > { %p6464_p5 = pmov %p6462_p3 }
 0x147   : > { %4876 = vsyncadd (%p6463_p9), [#allocation7], 4294967280 }
 0x148   : > { %4878 = dma.done.wait (%p6464_p5), [#allocation10], 16   ;;  %p6465_p12 = pmov %p6462_p3 }
 0x149   : > { %s6466_s1 = sld [smem:[#allocation25_spill]]  ;;  %s6467_s4 = sld [smem:[#allocation36_spill]] }
 0x14a   : > { %4880 = vsyncadd (%p6465_p12), [#allocation10], 4294967280 }
 0x14f   : > { %s728_s2 = sand.u32 1, %s6466_s1   ;;  %p6468_p2 = scmp.ne.s32.totalorder %s6467_s4, 0 }
 0x150   : > { %s4163_s24 = smul.u32 192, %s728_s2 }
 0x152   : > { %s5510_s16 = scalar_lea.vmem [#allocation11], %s4163_s24 }
 0x153   : > { %4882 = dma.done.wait (%p6468_p2), %s701_s22, 3072  }
 0x154   : > { %4884 = vsyncadd (%p6468_p2), %s701_s22, 4294964224  ;;  %s3777_s6 = sshll.u32 %s728_s2, 6 }
 0x155   : > { %s5516_s8 = scalar_lea.vmem [#allocation12], %s3777_s6 }
 0x156   : > { %4886 = dma.done.wait (%p6468_p2), %s710_s25, 1024  }
 0x157   : > { %4888 = vsyncadd (%p6468_p2), %s710_s25, 4294966272  ;;  %s3778_s17 = sshll.u32 %s728_s2, 7 }
 0x158   : > { %s5522_s7 = scalar_lea.vmem [#allocation13], %s3778_s17 }
 0x159   : > { %4890 = dma.done.wait (%p6468_p2), %s701_s22, 2048  }
 0x15a   : > { %4892 = vsyncadd (%p6468_p2), %s701_s22, 4294965248  ;;  %s5528_s27 = scalar_lea.vmem [#allocation14], %s3778_s17 }
 0x15b   : > { %4894 = dma.done.wait (%p6468_p2), %s710_s25, 2048  }
 0x15c   : > { %4896 = vsyncadd (%p6468_p2), %s710_s25, 4294965248  ;;  %s6469_s14 = sld [smem:[#allocation30_spill]]  ;;  %s3780_s15 = sshll.u32 %s5485_s13, 1 }
 0x15d   : > { %s6470_s22 = sld [smem:[#allocation51_spill]]  ;;  %s6473_s30 = sld [smem:[#allocation49_spill]] }
 0x15e   : > { %s6474_s0 = sld [smem:[#allocation55_spill]]  ;;  %s6476_s2 = sld [smem:[#allocation58_spill]] }
 0x15f   : > { %s6477_s3 = sld [smem:[#allocation59_spill]]  ;;  %s5575_s12 = scalar_lea.vmem [#allocation15], %s3780_s15 }
 0x162   : > { %p857_p1 = scmp.lt.s32.totalorder %s6469_s14, 1  ;;  %p3782_p13 = scmp.ne.s32.totalorder %s6469_s14, 0 }
 0x163   : > { %v888_v0 = vld [vmem:[%s5488_s18] sm:$0xff] (!%p3782_p13)  ;;  %v890_v1 = vld [vmem:[%s5488_s18 + $0x10] sm:$0xff] (!%p3782_p13)  ;;  %v889_v2 = vld [vmem:[%s5488_s18 + $0x8] sm:$0xff] (!%p3782_p13) }
 0x164   : > { %s5537_s28 = scalar_select %p857_p1, %s6469_s14, 1 }
 0x165   : > { %898 = vadd.xlane.f32.xlu0 (!%p3782_p13), %v888_v0  ;;  %902 = vadd.xlane.f32.xlu1 (!%p3782_p13), %v890_v1  ;;  %v891_v3 = vld [vmem:[%s5488_s18 + $0x18] sm:$0xff] (!%p3782_p13)  ;;  %v892_v4 = vld [vmem:[%s5488_s18 + $0x20] sm:$0xff] (!%p3782_p13)  ;;  %v893_v5 = vld [vmem:[%s5488_s18 + $0x28] sm:$0xff] (!%p3782_p13) }
 0x166   : > { %s4164_s9 = smul.u32 3, %s5537_s28  ;;  %s863_s19 = scalar_lea.vmem %s6470_s22, %s5537_s28  ;;  %v894_v6 = vld [vmem:[%s5488_s18 + $0x30] sm:$0xff] (!%p3782_p13)  ;;  %v895_v7 = vld [vmem:[%s5488_s18 + $0x38] sm:$0xff] (!%p3782_p13)  ;;  %v3783_v60 = vld [vmem:[#allocation8] ss:$0 sm:$0xff] (!%p3782_p13) }
 0x167   : > { %s3781_s26 = sshll.u32 %s5537_s28, 1  ;;  %s6475_s22 = sld [smem:[#allocation57_spill]] }
 0x168   : > { %s5555_s29 = scalar_lea.vmem %s6473_s30, %s4164_s9  ;;  %s5561_s13 = scalar_lea.vmem %s6474_s0, %s3781_s26 }
 0x169   : > { %s879_s24 = scalar_lea.vmem %s6476_s2, %s5537_s28  ;;  %s882_s10 = scalar_lea.vmem %s6477_s3, %s5537_s28  ;;  %900 = vadd.xlane.f32.xlu0 (!%p3782_p13), %v889_v2  ;;  %904 = vadd.xlane.f32.xlu1 (!%p3782_p13), %v891_v3 }
 0x16a   : > { %887 = sbr.rel (%p3782_p13) target bundleno = 685 (0x2ad), region = 120 }
 0x16d   : > { %s876_s25 = scalar_lea.vmem %s6475_s22, %s5537_s28  ;;  %906 = vadd.xlane.f32.xlu0 (!%p3782_p13), %v892_v4  ;;  %908 = vadd.xlane.f32.xlu1 (!%p3782_p13), %v893_v5 }
 0x171   : > { %910 = vadd.xlane.f32.xlu0 %v894_v6  ;;  %912 = vadd.xlane.f32.xlu1 %v895_v7 }
 0x1f2   : > { %v899_v8 = vpop.xlane.xlu0 %898  ;;  %v903_v9 = vpop.xlane.xlu1 %902 }
 0x1f3   : > { %v915_v10 = vmul.f32 0.0078125, %v899_v8  ;;  %v917_v11 = vmul.f32 0.0078125, %v903_v9 }
 0x1f5   : > { %v5586_v12 = vsub.f32 %v888_v0, %v915_v10  ;;  %v5588_v13 = vsub.f32 %v890_v1, %v917_v11  ;;  %v3784_v1 = vld [vmem:[#allocation9] ss:$0 sm:$0xff] }
 0x1f6   : > { %v901_v14 = vpop.xlane.xlu0 %900  ;;  %v905_v15 = vpop.xlane.xlu1 %904 }
 0x1f7   : > { %v916_v16 = vmul.f32 0.0078125, %v901_v14  ;;  %v931_v17 = vmul.f32 %v5586_v12, %v5586_v12  ;;  %v918_v18 = vmul.f32 0.0078125, %v905_v15  ;;  %v933_v21 = vmul.f32 %v5588_v13, %v5588_v13 }
 0x1f9   : > { %v5592_v19 = vsub.f32 %v889_v2, %v916_v16  ;;  %939 = vadd.xlane.f32.xlu0 %v931_v17  ;;  %v5594_v20 = vsub.f32 %v891_v3, %v918_v18 }
 0x1fa   : > { %v907_v22 = vpop.xlane.xlu0 %906  ;;  %v909_v23 = vpop.xlane.xlu1 %908 }
 0x1fb   : > { %v919_v24 = vmul.f32 0.0078125, %v907_v22  ;;  %v932_v25 = vmul.f32 %v5592_v19, %v5592_v19  ;;  %v920_v26 = vmul.f32 0.0078125, %v909_v23  ;;  %v934_v29 = vmul.f32 %v5594_v20, %v5594_v20 }
 0x1fd   : > { %v5600_v27 = vsub.f32 %v892_v4, %v919_v24  ;;  %943 = vadd.xlane.f32.xlu0 %v933_v21  ;;  %941 = vadd.xlane.f32.xlu1 %v932_v25  ;;  %v5602_v28 = vsub.f32 %v893_v5, %v920_v26 }
 0x1fe   : > { %v911_v30 = vpop.xlane.xlu0 %910  ;;  %v913_v31 = vpop.xlane.xlu1 %912 }
 0x1ff   : > { %v921_v32 = vmul.f32 0.0078125, %v911_v30  ;;  %v935_v33 = vmul.f32 %v5600_v27, %v5600_v27  ;;  %v922_v34 = vmul.f32 0.0078125, %v913_v31  ;;  %v936_v37 = vmul.f32 %v5602_v28, %v5602_v28 }
 0x201   : > { %v5608_v35 = vsub.f32 %v894_v6, %v921_v32  ;;  %945 = vadd.xlane.f32.xlu1 %v934_v29  ;;  %947 = vadd.xlane.f32.xlu0 %v935_v33  ;;  %v5610_v36 = vsub.f32 %v895_v7, %v922_v34 }
 0x203   : > { %v937_v38 = vmul.f32 %v5608_v35, %v5608_v35  ;;  %v938_v39 = vmul.f32 %v5610_v36, %v5610_v36 }
 0x205   : > { %949 = vadd.xlane.f32.xlu1 %v936_v37  ;;  %951 = vadd.xlane.f32.xlu0 %v937_v38 }
 0x209   : > { %953 = vadd.xlane.f32.xlu1 %v938_v39 }
 0x286   : > { %v940_v40 = vpop.xlane.xlu0 %939 }
 0x287   : > { %v955_v41 = vmul.f32 0.0078125, %v940_v40 }
 0x289   : > { %v963_v42 = vadd.f32 1e-12, %v955_v41 }
 0x28a   : > { %v942_v43 = vpop.xlane.xlu1 %941  ;;  %v944_v44 = vpop.xlane.xlu0 %943 }
 0x28b   : > { %4325 = vrsqrt.f32 %v963_v42  ;;  %v956_v45 = vmul.f32 0.0078125, %v942_v43  ;;  %v957_v46 = vmul.f32 0.0078125, %v944_v44 }
 0x28d   : > { %v964_v47 = vadd.f32 1e-12, %v956_v45  ;;  %v965_v48 = vadd.f32 1e-12, %v957_v46 }
 0x28e   : > { %v946_v49 = vpop.xlane.xlu1 %945  ;;  %v948_v50 = vpop.xlane.xlu0 %947 }
 0x28f   : > { %4327 = vrsqrt.f32 %v964_v47  ;;  %v958_v51 = vmul.f32 0.0078125, %v946_v49  ;;  %v959_v52 = vmul.f32 0.0078125, %v948_v50 }
 0x290   : > { %4329 = vrsqrt.f32 %v965_v48 }
 0x291   : > { %v966_v53 = vadd.f32 1e-12, %v958_v51  ;;  %v967_v54 = vadd.f32 1e-12, %v959_v52 }
 0x292   : > { %v950_v55 = vpop.xlane.xlu1 %949  ;;  %v952_v56 = vpop.xlane.xlu0 %951 }
 0x293   : > { %4331 = vrsqrt.f32 %v966_v53  ;;  %v960_v57 = vmul.f32 0.0078125, %v950_v55  ;;  %v961_v58 = vmul.f32 0.0078125, %v952_v56 }
 0x294   : > { %4333 = vrsqrt.f32 %v967_v54 }
 0x295   : > { %v4326_v59 = vpop.eup %4325  ;;  %v968_v61 = vadd.f32 1e-12, %v960_v57  ;;  %v969_v62 = vadd.f32 1e-12, %v961_v58 }
 0x296   : > { %v979_v63 = vmul.f32 %v4326_v59, %v5586_v12  ;;  %v954_v0 = vpop.xlane.xlu1 %953 }
 0x297   : > { %4335 = vrsqrt.f32 %v968_v61  ;;  %v962_v2 = vmul.f32 0.0078125, %v954_v0 }
 0x298   : > { %v993_v3 = vmul.f32 %v3783_v60, %v979_v63  ;;  %4337 = vrsqrt.f32 %v969_v62 }
 0x299   : > { %v4328_v4 = vpop.eup %4327  ;;  %v970_v5 = vadd.f32 1e-12, %v962_v2 }
 0x29a   : > { %v4330_v6 = vpop.eup %4329  ;;  %v1007_v7 = vadd.f32 %v3784_v1, %v993_v3  ;;  %v980_v8 = vmul.f32 %v4328_v4, %v5592_v19 }
 0x29b   : > { %v981_v9 = vmul.f32 %v4330_v6, %v5588_v13  ;;  %4339 = vrsqrt.f32 %v970_v5 }
 0x29c   : > { %1015 = vst [vmem:[#allocation2] sm:$0xff] %v1007_v7  ;;  %v994_v10 = vmul.f32 %v3783_v60, %v980_v8 }
 0x29d   : > { %v4332_v11 = vpop.eup %4331  ;;  %v995_v14 = vmul.f32 %v3783_v60, %v981_v9 }
 0x29e   : > { %v4334_v12 = vpop.eup %4333  ;;  %v1008_v15 = vadd.f32 %v3784_v1, %v994_v10  ;;  %v982_v16 = vmul.f32 %v4332_v11, %v5594_v20 }
 0x29f   : > { %v1009_v17 = vadd.f32 %v3784_v1, %v995_v14  ;;  %v983_v18 = vmul.f32 %v4334_v12, %v5600_v27 }
 0x2a0   : > { %1016 = vst [vmem:[#allocation2 + $0x8] sm:$0xff] %v1008_v15  ;;  %v996_v21 = vmul.f32 %v3783_v60, %v982_v16 }
 0x2a1   : > { %v4336_v22 = vpop.eup %4335  ;;  %1017 = vst [vmem:[#allocation2 + $0x10] sm:$0xff] %v1009_v17  ;;  %v997_v23 = vmul.f32 %v3783_v60, %v983_v18 }
 0x2a2   : > { %v4338_v19 = vpop.eup %4337  ;;  %v1010_v24 = vadd.f32 %v3784_v1, %v996_v21  ;;  %v984_v13 = vmul.f32 %v4336_v22, %v5602_v28 }
 0x2a3   : > { %v1011_v25 = vadd.f32 %v3784_v1, %v997_v23  ;;  %v985_v26 = vmul.f32 %v4338_v19, %v5608_v35 }
 0x2a4   : > { %1018 = vst [vmem:[#allocation2 + $0x18] sm:$0xff] %v1010_v24  ;;  %v998_v29 = vmul.f32 %v3783_v60, %v984_v13 }
 0x2a5   : > { %v4340_v30 = vpop.eup %4339  ;;  %1019 = vst [vmem:[#allocation2 + $0x20] sm:$0xff] %v1011_v25  ;;  %v999_v20 = vmul.f32 %v3783_v60, %v985_v26 }
 0x2a6   : > { %v1012_v31 = vadd.f32 %v3784_v1, %v998_v29  ;;  %v986_v27 = vmul.f32 %v4340_v30, %v5610_v36 }
 0x2a7   : > { %v1013_v32 = vadd.f32 %v3784_v1, %v999_v20 }
 0x2a8   : > { %1020 = vst [vmem:[#allocation2 + $0x28] sm:$0xff] %v1012_v31  ;;  %v1000_v33 = vmul.f32 %v3783_v60, %v986_v27 }
 0x2a9   : > { %1021 = vst [vmem:[#allocation2 + $0x30] sm:$0xff] %v1013_v32 }
 0x2aa   : > { %v1014_v34 = vadd.f32 %v3784_v1, %v1000_v33 }
 0x2ac   : > { %1022 = vst [vmem:[#allocation2 + $0x38] sm:$0xff] %v1014_v34 }
 0x2ad PF: > { %v4341_v28 = vld [vmem:[%s5510_s16 + $0x4] ss:$12 sps:$4 sm:$0xff]   ;;  %v4343_v35 = vld [vmem:[%s5510_s16] ss:$12 sps:$4 sm:$0xff]   ;;  %v4961_v37 = vmov 0   ;;  %v1023_v42 = vld [vmem:[#allocation2] sm:$0xff]  ;;  %v1073_v8 = vlaneseq }
 0x2ae   : > { %1248 = vmatprep.mubr.bf16.mxu0 %v4961_v37  ;;  %1216 = vmatprep.subr.bf16.mxu0 %v4341_v28  ;;  %v4344_v36 = vld [vmem:[%s5510_s16 + $0x1c] ss:$12 sps:$4 sm:$0xff]   ;;  %v4346_v38 = vld [vmem:[%s5510_s16 + $0x18] ss:$12 sps:$4 sm:$0xff]   ;;  %v4347_v39 = vld [vmem:[%s5510_s16 + $0x34] ss:$12 sps:$4 sm:$0xff]  }
 0x2af   : > { %1217 = vmatpush1.bf16.msra.mxu0 %v4343_v35  ;;  %v4349_v40 = vld [vmem:[%s5510_s16 + $0x30] ss:$12 sps:$4 sm:$0xff]   ;;  %v4350_v41 = vld [vmem:[%s5510_s16 + $0x4c] ss:$12 sps:$4 sm:$0xff]   ;;  %v4352_v43 = vld [vmem:[%s5510_s16 + $0x48] ss:$12 sps:$4 sm:$0xff]  }
 0x2b0   : > { %1218 = vmatprep.subr.bf16.mxu0 %v4344_v36  ;;  %v1024_v44 = vld [vmem:[#allocation2 + $0x8] sm:$0xff]  ;;  %v4353_v45 = vld [vmem:[%s5510_s16 + $0x64] ss:$12 sps:$4 sm:$0xff]   ;;  %v4365_v48 = vld [vmem:[%s5510_s16 + $0x8] ss:$12 sps:$4 sm:$0xff]   ;;  %v4962_v7 = vmov 0.0  }
 0x2b1   : > { %v1035_v46 = vpack.c.bf16 %v1024_v44, %v1023_v42  ;;  %v4355_v47 = vld [vmem:[%s5510_s16 + $0x60] ss:$12 sps:$4 sm:$0xff]   ;;  %v4356_v50 = vld [vmem:[%s5510_s16 + $0x7c] ss:$12 sps:$4 sm:$0xff]   ;;  %4001 = vmatprep.subr.bf16.mxu1 %v4365_v48  ;;  %v4367_v51 = vld [vmem:[%s5510_s16 + $0x38] ss:$12 sps:$4 sm:$0xff]  }
 0x2b2   : > { %v4366_v49 = vld [vmem:[%s5510_s16 + $0x20] ss:$12 sps:$4 sm:$0xff]   ;;  %4002 = vmatpush3.bf16.msra.mxu1 %v4365_v48  ;;  %v4358_v52 = vld [vmem:[%s5510_s16 + $0x78] ss:$12 sps:$4 sm:$0xff]   ;;  %v4361_v54 = vld [vmem:[%s5510_s16 + $0x90] ss:$12 sps:$4 sm:$0xff]  }
 0x2b3   : > { %1219 = vmatpush1.bf16.msra.mxu0 %v4346_v38  ;;  %4017 = vmatprep.mubr.bf16.mxu1 %v1035_v46  ;;  %v4359_v53 = vld [vmem:[%s5510_s16 + $0x94] ss:$12 sps:$4 sm:$0xff]   ;;  %v4368_v55 = vld [vmem:[%s5510_s16 + $0x50] ss:$12 sps:$4 sm:$0xff]   ;;  %v4362_v56 = vld [vmem:[%s5510_s16 + $0xac] ss:$12 sps:$4 sm:$0xff]  }
 0x2b4   : > { %1220 = vmatprep.subr.bf16.mxu0 %v4347_v39  ;;  %4003 = vmatprep.subr.bf16.mxu1 %v4366_v49  ;;  %v4369_v57 = vld [vmem:[%s5510_s16 + $0x68] ss:$12 sps:$4 sm:$0xff]   ;;  %v4370_v59 = vld [vmem:[%s5510_s16 + $0x80] ss:$12 sps:$4 sm:$0xff]   ;;  %v4371_v60 = vld [vmem:[%s5510_s16 + $0x98] ss:$12 sps:$4 sm:$0xff]  }
 0x2b5   : > { %v4364_v58 = vld [vmem:[%s5510_s16 + $0xa8] ss:$12 sps:$4 sm:$0xff]   ;;  %v1026_v62 = vld [vmem:[#allocation2 + $0x18] sm:$0xff]  ;;  %v1028_v2 = vld [vmem:[#allocation2 + $0x28] sm:$0xff]  ;;  %vm4963_vm0 = vmmov 0   ;;  %v5660_v9 = vshrl.u32 %v1073_v8, 7 }
 0x2b6   : > { %4004 = vmatpush3.bf16.msra.mxu1 %v4366_v49  ;;  %v1025_v61 = vld [vmem:[#allocation2 + $0x10] sm:$0xff]  ;;  %v4372_v63 = vld [vmem:[%s5510_s16 + $0xb0] ss:$12 sps:$4 sm:$0xff]   ;;  %v1027_v1 = vld [vmem:[#allocation2 + $0x20] sm:$0xff]  ;;  %vm1366_vm1 = vcmask 523264   ;;  %vm1595_vm2 = vcmask 130048  }
 0x2b7   : > { %1221 = vmatpush1.bf16.msra.mxu0 %v4349_v40  ;;  %4005 = vmatprep.subr.bf16.mxu1 %v4367_v51  ;;  %v1036_v0 = vpack.c.bf16 %v1026_v62, %v1025_v61  ;;  %v1037_v3 = vpack.c.bf16 %v1028_v2, %v1027_v1  ;;  %v1029_v4 = vld [vmem:[#allocation2 + $0x30] sm:$0xff]  ;;  %v1030_v5 = vld [vmem:[#allocation2 + $0x38] sm:$0xff]  ;;  %v1075_v10 = vsub.s32 0, %v5660_v9  ;;  %v1071_v11 = vld [vmem:[%s5555_s29] sm:$0x7]  ;;  %v1079_v14 = vsub.s32 1, %v5660_v9 }
 0x2b8   : > { %1222 = vmatprep.subr.bf16.mxu0 %v4350_v41  ;;  %v1038_v6 = vpack.c.bf16 %v1030_v5, %v1029_v4  ;;  %v1083_v26 = vsub.s32 2, %v5660_v9  ;;  %s4964_s3 = smov 64   ;;  %s6479_s5 = sld [smem:[#allocation52_spill]] }
 0x2b9   : > { %v5667_v12 = vrot.slane %v1071_v11, %v1075_v10  ;;  %v5671_v16 = vrot.slane %v1071_v11, %v1079_v14 }
 0x2ba   : > { %4006 = vmatpush3.bf16.msra.mxu1 %v4367_v51  ;;  %v1084_v34 = vrot.slane %v1071_v11, %v1083_v26 }
 0x2bb   : > { %1223 = vmatpush1.bf16.msra.mxu0 %v4352_v43  ;;  %4007 = vmatprep.subr.bf16.mxu1 %v4368_v55 }
 0x2bc   : > { %1224 = vmatprep.subr.bf16.mxu0 %v4353_v45 }
 0x2be   : > { %4008 = vmatpush3.bf16.msra.mxu1 %v4368_v55  ;;  %s6480_s18 = scalar_lea.vmem %s6479_s5, %s5537_s28 }
 0x2bf   : > { %1225 = vmatpush1.bf16.msra.mxu0 %v4355_v47  ;;  %4009 = vmatprep.subr.bf16.mxu1 %v4369_v57 }
 0x2c0   : > { %1226 = vmatprep.subr.bf16.mxu0 %v4356_v50 }
 0x2c2   : > { %4010 = vmatpush3.bf16.msra.mxu1 %v4369_v57 }
 0x2c3   : > { %1227 = vmatpush1.bf16.msra.mxu0 %v4358_v52  ;;  %4011 = vmatprep.subr.bf16.mxu1 %v4370_v59 }
 0x2c4   : > { %1228 = vmatprep.subr.bf16.mxu0 %v4359_v53 }
 0x2c6   : > { %4012 = vmatpush3.bf16.msra.mxu1 %v4370_v59 }
 0x2c7   : > { %1229 = vmatpush1.bf16.msra.mxu0 %v4361_v54  ;;  %4013 = vmatprep.subr.bf16.mxu1 %v4371_v60 }
 0x2c8   : > { %1230 = vmatprep.subr.bf16.mxu0 %v4362_v56 }
 0x2ca   : > { %4014 = vmatpush3.bf16.msra.mxu1 %v4371_v60 }
 0x2cb   : > { %1231 = vmatpush1.bf16.msra.mxu0 %v4364_v58  ;;  %4015 = vmatprep.subr.bf16.mxu1 %v4372_v63 }
 0x2cc   : > { %4037 = vmatprep.subr.bf16.mxu0 %v4962_v7 }
 0x2ce   : > { %1249 = vmatmul.mubr.bf16.vlgmr.msra.gmra.mrb[0].mxu0 %v1035_v46  ;;  %4016 = vmatpush3.bf16.msra.mxu1 %v4372_v63 }
 0x2cf   : > { %1258 = vmatprep.mubr.bf16.mxu0 %v4961_v37  ;;  %4025 = vmatprep.subr.bf16.mxu1 %v4962_v7 }
 0x2d1   : > { %4018 = vmatmul.mubr.bf16.vlgmr.msra.gmra.mrb[0].mxu1 %v1036_v0 }
 0x2d2   : > { %4021 = vmatprep.mubr.bf16.mxu1 %v1037_v3 }
 0x2d6   : > { %1259 = vmatmul.mubr.bf16.gmra.mrb[4].mxu0 %v1036_v0 }
 0x2d7   : > { %1268 = vmatprep.mubr.bf16.mxu0 %v4961_v37 }
 0x2d9   : > { %4022 = vmatmul.mubr.bf16.gmra.mrb[4].mxu1 %v1038_v6 }
 0x2da   : > { %4027 = vmatprep.mubr.msk.bf16.mxu1 %vm4963_vm0, %v4962_v7 }
 0x2de   : > { %1269 = vmatmul.mubr.bf16.gmra.mrb[8].mxu0 %v1037_v3 }
 0x2df   : > { %1278 = vmatprep.mubr.bf16.mxu0 %v4961_v37 }
 0x2e6   : > { %1279 = vmatmul.mubr.bf16.gmra.mrb[12].mxu0 %v1038_v6 }
 0x2e7   : > { %4039 = vmatprep.mubr.msk.bf16.mxu0 %vm4963_vm0, %v4962_v7 }
 0x3a1   : > { %v1250_v15 = vpop.f32.mrb[0].mxu0 }
 0x3a2   : > { %v1252_v17 = vpop.f32.mrb[1].mxu0  ;;  %v1251_v21 = vadd.f32 %v1250_v15, %v5667_v12 }
 0x3a3   : > { %v1254_v18 = vpop.f32.mrb[2].mxu0  ;;  %v1253_v19 = vadd.f32 %v1252_v17, %v5671_v16 }
 0x3a4   : > { %v1255_v22 = vadd.f32 %v1254_v18, %v5667_v12  ;;  %v1256_v23 = vpop.f32.mrb[3].mxu0  ;;  %v4019_v39 = vpop.f32.mrb[0].mxu1 }
 0x3a5   : > { %v1257_v24 = vadd.f32 %v1256_v23, %v5671_v16  ;;  %v1332_v40 = vadd.f32 %v4019_v39, %v1084_v34  ;;  %v1323_v41 = vpop.f32.mrb[1].mxu1 }
 0x3a6   : > { %v5677_v13 = vpack.c.bf16 %v1255_v22, %v1251_v21  ;;  %v1324_v44 = vadd.f32 %v1323_v41, %v1084_v34  ;;  %v4020_v45 = vpop.f32.mrb[2].mxu1 }
 0x3a7   : > { %v5679_v25 = vpack.c.bf16 %v1257_v24, %v1253_v19  ;;  %v1335_v47 = vadd.f32 %v4020_v45, %v1084_v34  ;;  %v1326_v48 = vpop.f32.mrb[3].mxu1 }
 0x3a8   : > { %v1327_v50 = vadd.f32 %v1326_v48, %v1084_v34 }
 0x3a9   : > { %v1260_v29 = vpop.f32.mrb[4].mxu0  ;;  %v1371_v30 = vsel %vm1366_vm1, %v5679_v25, 0  ;;  %v5702_v54 = vpack.c.bf16 %v1335_v47, %v1332_v40 }
 0x3aa   : > { %v1262_v20 = vpop.f32.mrb[5].mxu0  ;;  %4026 = vmatpush3.bf16.xpose.msra.mxu1 %v1371_v30  ;;  %v1261_v27 = vadd.f32 %v1260_v29, %v5667_v12  ;;  %v5706_v57 = vpack.c.bf16 %v1327_v50, %v1324_v44 }
 0x3ab   : > { %v1264_v31 = vpop.f32.mrb[6].mxu0  ;;  %4031 = vmatprep.subr.bf16.mxu1 %v4962_v7  ;;  %v1263_v28 = vadd.f32 %v1262_v20, %v5671_v16 }
 0x3ac   : > { %v1265_v32 = vadd.f32 %v1264_v31, %v5667_v12  ;;  %v1266_v33 = vpop.f32.mrb[7].mxu0  ;;  %v4023_v60 = vpop.f32.mrb[4].mxu1 }
 0x3ad   : > { %v1267_v35 = vadd.f32 %v1266_v33, %v5671_v16  ;;  %v1348_v61 = vadd.f32 %v4023_v60, %v1084_v34  ;;  %v1339_v62 = vpop.f32.mrb[5].mxu1 }
 0x3ae   : > { %v5689_v36 = vpack.c.bf16 %v1265_v32, %v1261_v27  ;;  %v1340_v1 = vadd.f32 %v1339_v62, %v1084_v34  ;;  %v4024_v2 = vpop.f32.mrb[6].mxu1 }
 0x3af   : > { %v5691_v38 = vpack.c.bf16 %v1267_v35, %v1263_v28  ;;  %v1351_v5 = vadd.f32 %v4024_v2, %v1084_v34  ;;  %v1342_v6 = vpop.f32.mrb[7].mxu1  ;;  %v5753_v35 = vld [vmem:[%s5495_s20 + $0x1] ss:$0 sm:$0xff] }
 0x3b0   : > { %v1343_v15 = vadd.f32 %v1342_v6, %v1084_v34 }
 0x3b1   : > { %v1270_v42 = vpop.f32.mrb[8].mxu0  ;;  %4028 = vmatmul.mubr.msk.bf16.vlgmr.msra.gmra.mrb[8].mxu1 %vm1366_vm1, %v5677_v13  ;;  %v1418_v43 = vsel %vm1366_vm1, %v5691_v38, 0  ;;  %v5722_v21 = vpack.c.bf16 %v1351_v5, %v1348_v61 }
 0x3b2   : > { %v1272_v46 = vpop.f32.mrb[9].mxu0  ;;  %4032 = vmatpush3.bf16.xpose.msra.mxu1 %v1418_v43  ;;  %4033 = vmatprep.mubr.msk.bf16.mxu1 %vm4963_vm0, %v4962_v7  ;;  %v1271_v51 = vadd.f32 %v1270_v42, %v5667_v12  ;;  %v5725_v23 = vpack.c.bf16 %v1343_v15, %v1340_v1  ;;  %v5768_v1 = vld [vmem:[%s5495_s20 + $0x3] ss:$0 sm:$0xff] }
 0x3b3   : > { %v1274_v49 = vpop.f32.mrb[10].mxu0  ;;  %4043 = vmatprep.subr.bf16.mxu1 %v4962_v7  ;;  %v1273_v55 = vadd.f32 %v1272_v46, %v5671_v16 }
 0x3b4   : > { %v1275_v52 = vadd.f32 %v1274_v49, %v5667_v12  ;;  %v1276_v53 = vpop.f32.mrb[11].mxu0  ;;  %v5760_v49 = vld [vmem:[%s5495_s20 + $0x2] ss:$0 sm:$0xff] }
 0x3b5   : > { %v1277_v56 = vadd.f32 %v1276_v53, %v5671_v16 }
 0x3b6   : > { %v5708_v58 = vpack.c.bf16 %v1275_v52, %v1271_v51 }
 0x3b7   : > { %v5710_v59 = vpack.c.bf16 %v1277_v56, %v1273_v55 }
 0x3b9   : > { %v1280_v63 = vpop.f32.mrb[12].mxu0  ;;  %4034 = vmatmul.mubr.msk.bf16.vlgmr.msra.gmra.mrb[12].mxu1 %vm1366_vm1, %v5689_v36  ;;  %v1465_v0 = vsel %vm1366_vm1, %v5710_v59, 0 }
 0x3ba   : > { %v1281_v3 = vadd.f32 %v1280_v63, %v5667_v12  ;;  %v1282_v4 = vpop.f32.mrb[13].mxu0  ;;  %4038 = vmatpush3.bf16.xpose.msra.mxu0 %v1465_v0  ;;  %4045 = vmatprep.mubr.msk.bf16.mxu1 %vm4963_vm0, %v4962_v7 }
 0x3bb   : > { %v1283_v8 = vadd.f32 %v1282_v4, %v5671_v16  ;;  %v1284_v11 = vpop.f32.mrb[14].mxu0  ;;  %4049 = vmatprep.subr.bf16.mxu0 %v4962_v7 }
 0x3bc   : > { %v1285_v17 = vadd.f32 %v1284_v11, %v5667_v12  ;;  %v1286_v18 = vpop.f32.mrb[15].mxu0 }
 0x3bd   : > { %v1287_v22 = vadd.f32 %v1286_v18, %v5671_v16  ;;  %v5747_v16 = vld [vmem:[%s5495_s20] ss:$0 sm:$0xff] }
 0x3be   : > { %v5727_v19 = vpack.c.bf16 %v1285_v17, %v1281_v3 }
 0x3bf   : > { %v5729_v24 = vpack.c.bf16 %v1287_v22, %v1283_v8 }
 0x3c1   : > { %4040 = vmatmul.mubr.msk.bf16.vlgmr.msra.gmra.mrb[16].mxu0 %vm1366_vm1, %v5708_v58  ;;  %v1512_v26 = vsel %vm1366_vm1, %v5729_v24, 0 }
 0x3c2   : > { %4044 = vmatpush3.bf16.xpose.msra.mxu1 %v1512_v26  ;;  %4050 = vmatpush3.bf16.msra.mxu0 %v5706_v57 }
 0x3c3   : > { %4055 = vmatprep.subr.bf16.mxu1 %v4962_v7  ;;  %4051 = vmatprep.mubr.msk.bf16.mxu0 %vm4963_vm0, %v4962_v7 }
 0x3c4   : > { %4061 = vmatprep.subr.bf16.mxu0 %v4962_v7 }
 0x3c9   : > { %4046 = vmatmul.mubr.msk.bf16.vlgmr.msra.gmra.mrb[16].mxu1 %vm1366_vm1, %v5727_v19 }
 0x3ca   : > { %4056 = vmatpush3.bf16.msra.mxu1 %v5702_v54  ;;  %4057 = vmatprep.mubr.msk.bf16.mxu1 %vm4963_vm0, %v4962_v7 }
 0x3cb   : > { %4067 = vmatprep.subr.bf16.mxu1 %v4962_v7 }
 0x484   : > { %v1407_v12 = vpop.f32.mrb[8].mxu1 }
 0x485   : > { %v1555_v29 = vmul.f32 0.125, %v1407_v12  ;;  %v4029_v30 = vpop.f32.mrb[9].mxu1 }
 0x486   : > { %v1410_v20 = vpop.f32.mrb[10].mxu1 }
 0x487   : > { %v1556_v31 = vmul.f32 0.125, %v1410_v20  ;;  %v4030_v27 = vpop.f32.mrb[11].mxu1  ;;  %v1587_v32 = vadd.f32 %v5747_v16, %v1555_v29 }
 0x489   : > { %v1596_v33 = vsel %vm1595_vm2, %v1587_v32, -inf  ;;  %v1588_v34 = vadd.f32 %v5747_v16, %v1556_v31 }
 0x48a   : > { %1597 = vmax.xlane.f32.xlu0 %v1596_v33 }
 0x48b   : > { %v1599_v41 = vsel %vm1595_vm2, %v1588_v34, -inf }
 0x48c   : > { %v1454_v28 = vpop.f32.mrb[12].mxu1 }
 0x48d   : > { %v1557_v39 = vmul.f32 0.125, %v1454_v28  ;;  %v4035_v40 = vpop.f32.mrb[13].mxu1 }
 0x48e   : > { %1600 = vmax.xlane.f32.xlu0 %v1599_v41  ;;  %v1457_v42 = vpop.f32.mrb[14].mxu1 }
 0x48f   : > { %v1558_v43 = vmul.f32 0.125, %v1457_v42  ;;  %v4036_v44 = vpop.f32.mrb[15].mxu1  ;;  %v1589_v45 = vadd.f32 %v5753_v35, %v1557_v39 }
 0x491   : > { %v1602_v46 = vsel %vm1595_vm2, %v1589_v45, -inf  ;;  %v1590_v47 = vadd.f32 %v5753_v35, %v1558_v43 }
 0x492   : > { %1603 = vmax.xlane.f32.xlu1 %v1602_v46 }
 0x493   : > { %v1605_v52 = vsel %vm1595_vm2, %v1590_v47, -inf }
 0x494   : > { %v1501_v48 = vpop.f32.mrb[16].mxu0 }
 0x495   : > { %v1559_v50 = vmul.f32 0.125, %v1501_v48  ;;  %v4041_v51 = vpop.f32.mrb[17].mxu0 }
 0x496   : > { %v1504_v53 = vpop.f32.mrb[18].mxu0  ;;  %1606 = vmax.xlane.f32.xlu1 %v1605_v52 }
 0x497   : > { %v1560_v55 = vmul.f32 0.125, %v1504_v53  ;;  %v4042_v56 = vpop.f32.mrb[19].mxu0  ;;  %v1591_v60 = vadd.f32 %v5760_v49, %v1559_v50 }
 0x499   : > { %v1608_v61 = vsel %vm1595_vm2, %v1591_v60, -inf  ;;  %v1592_v62 = vadd.f32 %v5760_v49, %v1560_v55 }
 0x49a   : > { %1609 = vmax.xlane.f32.xlu0 %v1608_v61 }
 0x49b   : > { %v1611_v63 = vsel %vm1595_vm2, %v1592_v62, -inf }
 0x49c   : > { %1612 = vmax.xlane.f32.xlu1 %v1611_v63  ;;  %v1548_v0 = vpop.f32.mrb[16].mxu1 }
 0x49d   : > { %v1561_v2 = vmul.f32 0.125, %v1548_v0  ;;  %v4047_v3 = vpop.f32.mrb[17].mxu1 }
 0x49e   : > { %v1551_v4 = vpop.f32.mrb[18].mxu1 }
 0x49f   : > { %v1562_v5 = vmul.f32 0.125, %v1551_v4  ;;  %v1593_v6 = vadd.f32 %v5768_v1, %v1561_v2  ;;  %v4048_v8 = vpop.f32.mrb[19].mxu1 }
 0x4a1   : > { %v1614_v11 = vsel %vm1595_vm2, %v1593_v6, -inf  ;;  %v1594_v15 = vadd.f32 %v5768_v1, %v1562_v5 }
 0x4a2   : > { %1615 = vmax.xlane.f32.xlu0 %v1614_v11 }
 0x4a3   : > { %v1617_v17 = vsel %vm1595_vm2, %v1594_v15, -inf }
 0x4a4   : > { %1618 = vmax.xlane.f32.xlu1 %v1617_v17 }
 0x517   : > { %v1598_v18 = vpop.xlane.xlu0 %1597 }
 0x518   : > { %v1620_v22 = vsub.f32 %v1587_v32, %v1598_v18 }
 0x51a   : > { %v1628_v26 = vmul.f32 1.442695, %v1620_v22 }
 0x51b   : > { %v1601_v12 = vpop.xlane.xlu0 %1600 }
 0x51c   : > { %4421 = vpow2.f32 %v1628_v26  ;;  %v1621_v29 = vsub.f32 %v1588_v34, %v1601_v12 }
 0x51e   : > { %v1630_v30 = vmul.f32 1.442695, %v1621_v29 }
 0x51f   : > { %v1604_v20 = vpop.xlane.xlu1 %1603 }
 0x520   : > { %4423 = vpow2.f32 %v1630_v30  ;;  %v1622_v31 = vsub.f32 %v1589_v45, %v1604_v20 }
 0x522   : > { %v1632_v27 = vmul.f32 1.442695, %v1622_v31 }
 0x523   : > { %v1607_v33 = vpop.xlane.xlu1 %1606 }
 0x524   : > { %4425 = vpow2.f32 %v1632_v27  ;;  %v1623_v28 = vsub.f32 %v1590_v47, %v1607_v33 }
 0x526   : > { %v4422_v39 = vpop.eup %4421  ;;  %v1634_v40 = vmul.f32 1.442695, %v1623_v28 }
 0x527   : > { %v1610_v41 = vpop.xlane.xlu0 %1609  ;;  %v1644_v42 = vsel %vm1595_vm2, %v4422_v39, 0.0 }
 0x528   : > { %4427 = vpow2.f32 %v1634_v40  ;;  %v1624_v43 = vsub.f32 %v1591_v60, %v1610_v41  ;;  %1645 = vadd.xlane.f32.xlu0 %v1644_v42 }
 0x529   : > { %v1613_v32 = vpop.xlane.xlu1 %1612 }
 0x52a   : > { %v4424_v44 = vpop.eup %4423  ;;  %v1636_v46 = vmul.f32 1.442695, %v1624_v43  ;;  %v1625_v34 = vsub.f32 %v1592_v62, %v1613_v32 }
 0x52b   : > { %v1647_v48 = vsel %vm1595_vm2, %v4424_v44, 0.0 }
 0x52c   : > { %4429 = vpow2.f32 %v1636_v46  ;;  %v1638_v45 = vmul.f32 1.442695, %v1625_v34  ;;  %1648 = vadd.xlane.f32.xlu1 %v1647_v48 }
 0x52e   : > { %v4426_v50 = vpop.eup %4425  ;;  %4431 = vpow2.f32 %v1638_v45 }
 0x52f   : > { %v1616_v47 = vpop.xlane.xlu0 %1615  ;;  %v1650_v51 = vsel %vm1595_vm2, %v4426_v50, 0.0 }
 0x530   : > { %v1626_v52 = vsub.f32 %v1593_v6, %v1616_v47  ;;  %1651 = vadd.xlane.f32.xlu0 %v1650_v51 }
 0x531   : > { %v1619_v3 = vpop.xlane.xlu1 %1618 }
 0x532   : > { %v4428_v53 = vpop.eup %4427  ;;  %v1640_v55 = vmul.f32 1.442695, %v1626_v52  ;;  %v1627_v4 = vsub.f32 %v1594_v15, %v1619_v3 }
 0x533   : > { %v1653_v56 = vsel %vm1595_vm2, %v4428_v53, 0.0 }
 0x534   : > { %4433 = vpow2.f32 %v1640_v55  ;;  %1654 = vadd.xlane.f32.xlu1 %v1653_v56  ;;  %v1642_v5 = vmul.f32 1.442695, %v1627_v4 }
 0x536   : > { %v4430_v60 = vpop.eup %4429  ;;  %4435 = vpow2.f32 %v1642_v5 }
 0x537   : > { %v1656_v61 = vsel %vm1595_vm2, %v4430_v60, 0.0 }
 0x538   : > { %v4432_v62 = vpop.eup %4431  ;;  %1657 = vadd.xlane.f32.xlu0 %v1656_v61 }
 0x539   : > { %v1659_v63 = vsel %vm1595_vm2, %v4432_v62, 0.0 }
 0x53a   : > { %1660 = vadd.xlane.f32.xlu1 %v1659_v63 }
 0x53e   : > { %v5780_v0 = vpop.eup %4433 }
 0x53f   : > { %v1662_v2 = vsel %vm1595_vm2, %v5780_v0, 0.0 }
 0x540   : > { %1663 = vadd.xlane.f32.xlu0 %v1662_v2  ;;  %v5792_v6 = vpop.eup %4435 }
 0x541   : > { %v1665_v8 = vsel %vm1595_vm2, %v5792_v6, 0.0 }
 0x54b   : > { %1933 = vrot.lane.b32.xlu1 %v5691_v38, %s4964_s3 }
 0x556   : > { %1880 = vrot.lane.b32.xlu0 %v5679_v25, %s4964_s3 }
 0x55a   : > { %1986 = vrot.lane.b32.xlu0 %v5710_v59, %s4964_s3 }
 0x55e   : > { %1983 = vrot.lane.b32.xlu0 %v5708_v58, %s4964_s3 }
 0x56f   : > { %1666 = vadd.xlane.f32.xlu1 %v1665_v8 }
 0x580   : > { %1877 = vrot.lane.b32.xlu1 %v5677_v13, %s4964_s3 }
 0x584   : > { %1930 = vrot.lane.b32.xlu1 %v5689_v36, %s4964_s3 }
 0x588   : > { %2039 = vrot.lane.b32.xlu1 %v5729_v24, %s4964_s3 }
 0x58c   : > { %2036 = vrot.lane.b32.xlu1 %v5727_v19, %s4964_s3 }
 0x5b5   : > { %v1646_v25 = vpop.xlane.xlu0 %1645 }
 0x5b6   : > { %4437 = vrcp.f32 %v1646_v25 }
 0x5b9   : > { %v1649_v38 = vpop.xlane.xlu1 %1648 }
 0x5ba   : > { %4439 = vrcp.f32 %v1649_v38 }
 0x5bd   : > { %v1652_v58 = vpop.xlane.xlu0 %1651 }
 0x5be   : > { %4441 = vrcp.f32 %v1652_v58 }
 0x5c0   : > { %v4438_v11 = vpop.eup %4437 }
 0x5c1   : > { %v1655_v59 = vpop.xlane.xlu1 %1654  ;;  %v1676_v13 = vmul.f32 %v4438_v11, %v4422_v39 }
 0x5c2   : > { %4443 = vrcp.f32 %v1655_v59 }
 0x5c4   : > { %v4440_v15 = vpop.eup %4439 }
 0x5c5   : > { %v1677_v17 = vmul.f32 %v4440_v15, %v4424_v44  ;;  %v1658_v18 = vpop.xlane.xlu0 %1657 }
 0x5c6   : > { %4445 = vrcp.f32 %v1658_v18 }
 0x5c7   : > { %v1661_v36 = vpop.xlane.xlu1 %1660  ;;  %v1684_v22 = vpack.c.bf16 %v1677_v17, %v1676_v13 }
 0x5c8   : > { %4447 = vrcp.f32 %v1661_v36  ;;  %v4442_v19 = vpop.eup %4441 }
 0x5c9   : > { %4052 = vmatmul.mubr.msk.bf16.vlgmr.msra.gmra.mrb[20].mxu0 %vm1595_vm2, %v1684_v22  ;;  %v1678_v26 = vmul.f32 %v4442_v19, %v4426_v50 }
 0x5ca   : > { %4062 = vmatpush3.bf16.msra.mxu0 %v5725_v23  ;;  %4063 = vmatprep.mubr.msk.bf16.mxu0 %vm4963_vm0, %v4962_v7 }
 0x5cb   : > { %4073 = vmatprep.subr.bf16.mxu0 %v4962_v7  ;;  %v1934_v41 = vpop.permute.xlu1 %1933 }
 0x5cc   : > { %v4444_v24 = vpop.eup %4443  ;;  %v1939_v52 = vsel %vm1366_vm1, %v1934_v41, 0 }
 0x5cd   : > { %v1679_v12 = vmul.f32 %v4444_v24, %v4428_v53  ;;  %v1664_v29 = vpop.xlane.xlu0 %1663 }
 0x5ce   : > { %4449 = vrcp.f32 %v1664_v29 }
 0x5cf   : > { %v1685_v30 = vpack.c.bf16 %v1679_v12, %v1678_v26 }
 0x5d0   : > { %v4446_v20 = vpop.eup %4445 }
 0x5d1   : > { %4058 = vmatmul.mubr.msk.bf16.vlgmr.msra.gmra.mrb[20].mxu1 %vm1595_vm2, %v1685_v30  ;;  %v1680_v27 = vmul.f32 %v4446_v20, %v4430_v60  ;;  %v1881_v28 = vpop.permute.xlu0 %1880 }
 0x5d2   : > { %v4448_v31 = vpop.eup %4447  ;;  %4068 = vmatpush3.bf16.msra.mxu1 %v5722_v21  ;;  %4069 = vmatprep.mubr.msk.bf16.mxu1 %vm4963_vm0, %v4962_v7  ;;  %v1886_v40 = vsel %vm1366_vm1, %v1881_v28, 0 }
 0x5d3   : > { %v1681_v33 = vmul.f32 %v4448_v31, %v4432_v62  ;;  %4079 = vmatprep.subr.bf16.mxu1 %v4962_v7 }
 0x5d5   : > { %v1686_v39 = vpack.c.bf16 %v1681_v33, %v1680_v27  ;;  %v1987_v43 = vpop.permute.xlu0 %1986 }
 0x5d6   : > { %v1992_v44 = vsel %vm1366_vm1, %v1987_v43, 0 }
 0x5d7   : > { %4064 = vmatmul.mubr.msk.bf16.vlgmr.msra.gmra.mrb[24].mxu0 %vm1595_vm2, %v1686_v39 }
 0x5d8   : > { %4074 = vmatpush3.bf16.xpose.msra.mxu0 %v1886_v40  ;;  %4075 = vmatprep.mubr.msk.bf16.mxu0 %vm4963_vm0, %v4962_v7  ;;  %v4450_v46 = vpop.eup %4449 }
 0x5d9   : > { %4085 = vmatprep.subr.bf16.mxu0 %v4962_v7  ;;  %v1682_v48 = vmul.f32 %v4450_v46, %v5780_v0  ;;  %v1984_v45 = vpop.permute.xlu0 %1983 }
 0x5fc   : > { %v1667_v42 = vpop.xlane.xlu1 %1666 }
 0x5fd   : > { %4451 = vrcp.f32 %v1667_v42 }
 0x600   : > { %v1878_v32 = vpop.permute.xlu1 %1877 }
 0x601   : > { %4076 = vmatmul.mubr.msk.bf16.vlgmr.msra.gmra.mrb[28].mxu0 %vm1366_vm1, %v1878_v32 }
 0x602   : > { %4086 = vmatpush3.bf16.xpose.msra.mxu0 %v1992_v44  ;;  %4087 = vmatprep.mubr.msk.bf16.mxu0 %vm4963_vm0, %v4962_v7 }
 0x603   : > { %4097 = vmatprep.subr.bf16.mxu0 %v4962_v7 }
 0x604   : > { %v1931_v51 = vpop.permute.xlu1 %1930 }
 0x607   : > { %v4452_v34 = vpop.eup %4451 }
 0x608   : > { %v1683_v50 = vmul.f32 %v4452_v34, %v5792_v6  ;;  %v2040_v53 = vpop.permute.xlu1 %2039 }
 0x609   : > { %4088 = vmatmul.mubr.msk.bf16.vlgmr.msra.gmra.mrb[32].mxu0 %vm1366_vm1, %v1984_v45  ;;  %v2045_v55 = vsel %vm1366_vm1, %v2040_v53, 0 }
 0x60a   : > { %v1687_v47 = vpack.c.bf16 %v1683_v50, %v1682_v48  ;;  %4099 = vmatprep.mubr.msk.bf16.mxu0 %vm4963_vm0, %v4962_v7 }
 0x60c   : > { %4070 = vmatmul.mubr.msk.bf16.vlgmr.msra.gmra.mrb[24].mxu1 %vm1595_vm2, %v1687_v47  ;;  %v2037_v56 = vpop.permute.xlu1 %2036 }
 0x60d   : > { %4080 = vmatpush3.bf16.xpose.msra.mxu1 %v1939_v52  ;;  %4081 = vmatprep.mubr.msk.bf16.mxu1 %vm4963_vm0, %v4962_v7 }
 0x60e   : > { %4091 = vmatprep.subr.bf16.mxu1 %v4962_v7 }
 0x614   : > { %4082 = vmatmul.mubr.msk.bf16.vlgmr.msra.gmra.mrb[28].mxu1 %vm1366_vm1, %v1931_v51 }
 0x615   : > { %4092 = vmatpush3.bf16.xpose.msra.mxu1 %v2045_v55  ;;  %4093 = vmatprep.mubr.msk.bf16.mxu1 %vm4963_vm0, %v4962_v7 }
 0x616   : > { %4103 = vmatprep.subr.bf16.mxu1 %v4962_v7 }
 0x61c   : > { %4094 = vmatmul.mubr.msk.bf16.vlgmr.msra.gmra.mrb[32].mxu1 %vm1366_vm1, %v2037_v56 }
 0x61d   : > { %4105 = vmatprep.mubr.msk.bf16.mxu1 %vm4963_vm0, %v4962_v7 }
 0x69c   : > { %v5842_v60 = vpop.f32.mrb[20].mxu0 }
 0x69d   : > { %v4053_v61 = vpop.f32.mrb[21].mxu0 }
 0x69e   : > { %v5844_v62 = vpop.f32.mrb[22].mxu0 }
 0x69f   : > { %v1864_v63 = vpack.c.bf16 %v5844_v62, %v5842_v60  ;;  %v4054_v0 = vpop.f32.mrb[23].mxu0  ;;  %v4377_v60 = vld [vmem:[%s5516_s8 + $0x20] sm:$0xff]  }
 0x6a4   : > { %v5848_v2 = vpop.f32.mrb[20].mxu1 }
 0x6a5   : > { %v4059_v3 = vpop.f32.mrb[21].mxu1 }
 0x6a6   : > { %v5850_v4 = vpop.f32.mrb[22].mxu1 }
 0x6a7   : > { %v1865_v5 = vpack.c.bf16 %v5850_v4, %v5848_v2  ;;  %v4060_v6 = vpop.f32.mrb[23].mxu1 }
 0x6aa   : > { %v5854_v8 = vpop.f32.mrb[24].mxu0 }
 0x6ab   : > { %v4065_v25 = vpop.f32.mrb[25].mxu0 }
 0x6ac   : > { %v5856_v38 = vpop.f32.mrb[26].mxu0 }
 0x6ad   : > { %v1866_v58 = vpack.c.bf16 %v5856_v38, %v5854_v8  ;;  %v4066_v59 = vpop.f32.mrb[27].mxu0  ;;  %v4378_v38 = vld [vmem:[%s5516_s8 + $0x28] sm:$0xff]  }
 0x6d4   : > { %v1922_v11 = vpop.f32.mrb[28].mxu0 }
 0x6d5   : > { %v2088_v15 = vmul.f32 0.125, %v1922_v11  ;;  %v4077_v13 = vpop.f32.mrb[29].mxu0 }
 0x6d6   : > { %v1925_v17 = vpop.f32.mrb[30].mxu0 }
 0x6d7   : > { %v2089_v18 = vmul.f32 0.125, %v1925_v17  ;;  %v4078_v36 = vpop.f32.mrb[31].mxu0  ;;  %v2096_v22 = vadd.f32 %v5747_v16, %v2088_v15 }
 0x6d9   : > { %v2104_v19 = vsel %vm1595_vm2, %v2096_v22, -inf  ;;  %v2097_v24 = vadd.f32 %v5747_v16, %v2089_v18 }
 0x6da   : > { %2105 = vmax.xlane.f32.xlu0 %v2104_v19 }
 0x6db   : > { %v2107_v26 = vsel %vm1595_vm2, %v2097_v24, -inf }
 0x6dc   : > { %2108 = vmax.xlane.f32.xlu1 %v2107_v26  ;;  %v2028_v12 = vpop.f32.mrb[32].mxu0 }
 0x6dd   : > { %v4089_v29 = vpop.f32.mrb[33].mxu0  ;;  %v2092_v45 = vmul.f32 0.125, %v2028_v12 }
 0x6de   : > { %v2031_v30 = vpop.f32.mrb[34].mxu0 }
 0x6df   : > { %v2093_v20 = vmul.f32 0.125, %v2031_v30  ;;  %v5864_v31 = vpop.f32.mrb[24].mxu1  ;;  %v4090_v27 = vpop.f32.mrb[35].mxu0  ;;  %v2100_v56 = vadd.f32 %v5760_v49, %v2092_v45 }
 0x6e0   : > { %v4071_v33 = vpop.f32.mrb[25].mxu1 }
 0x6e1   : > { %v5866_v28 = vpop.f32.mrb[26].mxu1  ;;  %v2101_v39 = vadd.f32 %v5760_v49, %v2093_v20  ;;  %v2116_v6 = vsel %vm1595_vm2, %v2100_v56, -inf }
 0x6e2   : > { %v1867_v40 = vpack.c.bf16 %v5866_v28, %v5864_v31  ;;  %v4072_v16 = vpop.f32.mrb[27].mxu1  ;;  %v4380_v31 = vld [vmem:[%s5516_s8 + $0x38] sm:$0xff]  }
 0x6e3   : > { %v2119_v41 = vsel %vm1595_vm2, %v2101_v39, -inf }
 0x6e4   : > { %2120 = vmax.xlane.f32.xlu1 %v2119_v41 }
 0x6e7   : > { %v1975_v42 = vpop.f32.mrb[28].mxu1 }
 0x6e8   : > { %v2090_v43 = vmul.f32 0.125, %v1975_v42  ;;  %v4083_v32 = vpop.f32.mrb[29].mxu1 }
 0x6e9   : > { %v1978_v44 = vpop.f32.mrb[30].mxu1 }
 0x6ea   : > { %v2091_v46 = vmul.f32 0.125, %v1978_v44  ;;  %v4084_v34 = vpop.f32.mrb[31].mxu1  ;;  %v2098_v48 = vadd.f32 %v5753_v35, %v2090_v43 }
 0x6ec   : > { %v2110_v50 = vsel %vm1595_vm2, %v2098_v48, -inf  ;;  %v2099_v47 = vadd.f32 %v5753_v35, %v2091_v46 }
 0x6ed   : > { %2111 = vmax.xlane.f32.xlu0 %v2110_v50 }
 0x6ee   : > { %v2113_v55 = vsel %vm1595_vm2, %v2099_v47, -inf }
 0x6ef   : > { %v2081_v51 = vpop.f32.mrb[32].mxu1 }
 0x6f0   : > { %v2094_v52 = vmul.f32 0.125, %v2081_v51  ;;  %v4095_v53 = vpop.f32.mrb[33].mxu1 }
 0x6f1   : > { %2114 = vmax.xlane.f32.xlu0 %v2113_v55  ;;  %v2084_v61 = vpop.f32.mrb[34].mxu1 }
 0x6f2   : > { %v2095_v0 = vmul.f32 0.125, %v2084_v61  ;;  %v4096_v3 = vpop.f32.mrb[35].mxu1  ;;  %v2102_v59 = vadd.f32 %v5768_v1, %v2094_v52 }
 0x6f4   : > { %v2103_v25 = vadd.f32 %v5768_v1, %v2095_v0  ;;  %v2122_v11 = vsel %vm1595_vm2, %v2102_v59, -inf }
 0x6f5   : > { %2117 = vmax.xlane.f32.xlu0 %v2116_v6 }
 0x6f6   : > { %v2125_v35 = vsel %vm1595_vm2, %v2103_v25, -inf }
 0x6f7   : > { %2126 = vmax.xlane.f32.xlu1 %v2125_v35 }
 0x6f9   : > { %2123 = vmax.xlane.f32.xlu0 %v2122_v11 }
 0x767   : > { %v2106_v15 = vpop.xlane.xlu0 %2105 }
 0x768   : > { %v2128_v13 = vsub.f32 %v2096_v22, %v2106_v15 }
 0x769   : > { %v2109_v49 = vpop.xlane.xlu1 %2108 }
 0x76a   : > { %v2136_v17 = vmul.f32 1.442695, %v2128_v13  ;;  %v2129_v18 = vsub.f32 %v2097_v24, %v2109_v49 }
 0x76c   : > { %4453 = vpow2.f32 %v2136_v17  ;;  %v2138_v36 = vmul.f32 1.442695, %v2129_v18 }
 0x76e   : > { %4455 = vpow2.f32 %v2138_v36 }
 0x771   : > { %v2121_v29 = vpop.xlane.xlu1 %2120 }
 0x772   : > { %v2133_v20 = vsub.f32 %v2101_v39, %v2121_v29 }
 0x774   : > { %v2146_v16 = vmul.f32 1.442695, %v2133_v20 }
 0x776   : > { %v5882_v19 = vpop.eup %4453 }
 0x777   : > { %v2152_v1 = vsel %vm1595_vm2, %v5882_v19, 0.0 }
 0x778   : > { %v5886_v26 = vpop.eup %4455  ;;  %2153 = vadd.xlane.f32.xlu0 %v2152_v1 }
 0x779   : > { %v2155_v12 = vsel %vm1595_vm2, %v5886_v26, 0.0 }
 0x77a   : > { %v2112_v30 = vpop.xlane.xlu0 %2111  ;;  %2156 = vadd.xlane.f32.xlu1 %v2155_v12 }
 0x77b   : > { %v2130_v22 = vsub.f32 %v2098_v48, %v2112_v30 }
 0x77d   : > { %v2140_v24 = vmul.f32 1.442695, %v2130_v22 }
 0x77e   : > { %v2115_v27 = vpop.xlane.xlu0 %2114 }
 0x77f   : > { %4457 = vpow2.f32 %v2140_v24  ;;  %v2131_v33 = vsub.f32 %v2099_v47, %v2115_v27  ;;  %v4373_v24 = vld [vmem:[%s5516_s8] sm:$0xff]  }
 0x781   : > { %v2142_v41 = vmul.f32 1.442695, %v2131_v33 }
 0x782   : > { %v2118_v42 = vpop.xlane.xlu0 %2117 }
 0x783   : > { %4459 = vpow2.f32 %v2142_v41  ;;  %v2132_v43 = vsub.f32 %v2100_v56, %v2118_v42  ;;  %v4374_v42 = vld [vmem:[%s5516_s8 + $0x8] sm:$0xff]  }
 0x784   : > { %4461 = vpow2.f32 %v2146_v16  ;;  %v2127_v61 = vpop.xlane.xlu1 %2126 }
 0x785   : > { %v2144_v32 = vmul.f32 1.442695, %v2132_v43  ;;  %v2135_v0 = vsub.f32 %v2103_v25, %v2127_v61  ;;  %v4375_v43 = vld [vmem:[%s5516_s8 + $0x10] sm:$0xff]  }
 0x786   : > { %v2124_v44 = vpop.xlane.xlu0 %2123 }
 0x787   : > { %4463 = vpow2.f32 %v2144_v32  ;;  %v2134_v46 = vsub.f32 %v2102_v59, %v2124_v44  ;;  %v2150_v3 = vmul.f32 1.442695, %v2135_v0  ;;  %v4376_v32 = vld [vmem:[%s5516_s8 + $0x18] sm:$0xff]  }
 0x789   : > { %v4458_v34 = vpop.eup %4457  ;;  %v2148_v45 = vmul.f32 1.442695, %v2134_v46 }
 0x78a   : > { %v2158_v50 = vsel %vm1595_vm2, %v4458_v34, 0.0 }
 0x78b   : > { %4465 = vpow2.f32 %v2148_v45  ;;  %2159 = vadd.xlane.f32.xlu0 %v2158_v50 }
 0x78c   : > { %4467 = vpow2.f32 %v2150_v3 }
 0x78d   : > { %v4460_v39 = vpop.eup %4459 }
 0x78e   : > { %v2161_v48 = vsel %vm1595_vm2, %v4460_v39, 0.0  ;;  %v4462_v47 = vpop.eup %4461 }
 0x78f   : > { %2162 = vadd.xlane.f32.xlu1 %v2161_v48  ;;  %v2167_v53 = vsel %vm1595_vm2, %v4462_v47, 0.0 }
 0x791   : > { %v4464_v51 = vpop.eup %4463 }
 0x792   : > { %v2164_v52 = vsel %vm1595_vm2, %v4464_v51, 0.0 }
 0x793   : > { %2165 = vadd.xlane.f32.xlu0 %v2164_v52  ;;  %2168 = vadd.xlane.f32.xlu1 %v2167_v53 }
 0x795   : > { %v5894_v55 = vpop.eup %4465 }
 0x796   : > { %v2170_v56 = vsel %vm1595_vm2, %v5894_v55, 0.0  ;;  %v5904_v6 = vpop.eup %4467 }
 0x797   : > { %2171 = vadd.xlane.f32.xlu0 %v2170_v56  ;;  %v2173_v59 = vsel %vm1595_vm2, %v5904_v6, 0.0 }
 0x7a4   : > { %2245 = vrot.lane.b32.xlu1 %v5702_v54, %s4964_s3 }
 0x7a8   : > { %2293 = vrot.lane.b32.xlu1 %v5725_v23, %s4964_s3 }
 0x7ad   : > { %2197 = vrot.lane.b32.xlu0 %v5706_v57, %s4964_s3 }
 0x7cc   : > { %2174 = vadd.xlane.f32.xlu1 %v2173_v59 }
 0x7dd   : > { %2341 = vrot.lane.b32.xlu1 %v5722_v21, %s4964_s3 }
 0x805   : > { %v2154_v54 = vpop.xlane.xlu0 %2153 }
 0x807   : > { %v2157_v35 = vpop.xlane.xlu1 %2156 }
 0x808   : > { %4469 = vrcp.f32 %v2157_v35 }
 0x809   : > { %4471 = vrcp.f32 %v2154_v54 }
 0x812   : > { %v4470_v15 = vpop.eup %4469 }
 0x813   : > { %v4472_v13 = vpop.eup %4471  ;;  %v2185_v21 = vmul.f32 %v4470_v15, %v5886_v26 }
 0x814   : > { %v2184_v1 = vmul.f32 %v4472_v13, %v5882_v19 }
 0x816   : > { %v2192_v22 = vpack.c.bf16 %v2185_v21, %v2184_v1 }
 0x818   : > { %v2160_v11 = vpop.xlane.xlu0 %2159 }
 0x819   : > { %4473 = vrcp.f32 %v2160_v11 }
 0x81c   : > { %v2163_v57 = vpop.xlane.xlu1 %2162 }
 0x81d   : > { %4475 = vrcp.f32 %v2163_v57 }
 0x820   : > { %v2166_v23 = vpop.xlane.xlu0 %2165  ;;  %v2169_v25 = vpop.xlane.xlu1 %2168 }
 0x821   : > { %4477 = vrcp.f32 %v2166_v23 }
 0x822   : > { %4479 = vrcp.f32 %v2169_v25 }
 0x823   : > { %v4474_v18 = vpop.eup %4473 }
 0x824   : > { %v2172_v49 = vpop.xlane.xlu0 %2171  ;;  %v2246_v17 = vpop.permute.xlu1 %2245  ;;  %v2186_v12 = vmul.f32 %v4474_v18, %v4458_v34  ;;  %v3853_v18 = vld [vmem:[%s863_s19] ss:$0 sm:$0xff] }
 0x825   : > { %4104 = vmatpush3.bf16.msra.mxu1 %v2246_v17  ;;  %4481 = vrcp.f32 %v2172_v49 }
 0x826   : > { %4115 = vmatprep.subr.bf16.mxu1 %v4962_v7 }
 0x827   : > { %v4476_v36 = vpop.eup %4475 }
 0x828   : > { %v2187_v29 = vmul.f32 %v4476_v36, %v4460_v39  ;;  %v2198_v30 = vpop.permute.xlu0 %2197  ;;  %v2294_v16 = vpop.permute.xlu1 %2293 }
 0x829   : > { %4098 = vmatpush3.bf16.msra.mxu0 %v2198_v30 }
 0x82a   : > { %v2193_v20 = vpack.c.bf16 %v2187_v29, %v2186_v12  ;;  %4109 = vmatprep.subr.bf16.mxu0 %v4962_v7 }
 0x82b   : > { %v4478_v27 = vpop.eup %4477 }
 0x82c   : > { %v4480_v33 = vpop.eup %4479  ;;  %4100 = vmatmul.mubr.msk.bf16.vlgmr.msra.gmra.mrb[36].mxu0 %vm1595_vm2, %v2192_v22  ;;  %4106 = vmatmul.mubr.msk.bf16.vlgmr.msra.gmra.mrb[36].mxu1 %vm1595_vm2, %v2193_v20  ;;  %v2188_v19 = vmul.f32 %v4478_v27, %v4464_v51  ;;  %v4549_v27 = vld [vmem:[#allocation2] sm:$0xff] }
 0x82d   : > { %4110 = vmatpush3.bf16.msra.mxu0 %v2294_v16  ;;  %4111 = vmatprep.mubr.msk.bf16.mxu0 %vm4963_vm0, %v4962_v7  ;;  %v2189_v26 = vmul.f32 %v4480_v33, %v4462_v47  ;;  %v4550_v16 = vld [vmem:[#allocation2 + $0x8] sm:$0xff] }
 0x82e   : > { %4137 = vmatprep.subr.bf16.mxu0 %v4373_v24  ;;  %4117 = vmatprep.mubr.msk.bf16.mxu1 %vm4963_vm0, %v4962_v7 }
 0x82f   : > { %v2194_v41 = vpack.c.bf16 %v2189_v26, %v2188_v19 }
 0x834   : > { %4112 = vmatmul.mubr.msk.bf16.vlgmr.msra.gmra.mrb[40].mxu0 %vm1595_vm2, %v2194_v41  ;;  %v4551_v41 = vld [vmem:[#allocation2 + $0x10] sm:$0xff] }
 0x835   : > { %4138 = vmatpush3.bf16.msra.mxu0 %v4373_v24  ;;  %4145 = vmatprep.mubr.msk.bf16.mxu0 %vm1366_vm1, %v1864_v63  ;;  %v4482_v63 = vpop.eup %4481 }
 0x836   : > { %4139 = vmatprep.subr.bf16.mxu0 %v4374_v42  ;;  %v2190_v4 = vmul.f32 %v4482_v63, %v5894_v55 }
 0x839   : > { %4140 = vmatpush3.bf16.msra.mxu0 %v4374_v42 }
 0x83a   : > { %4141 = vmatprep.subr.bf16.mxu0 %v4375_v43 }
 0x83d   : > { %4142 = vmatpush3.bf16.msra.mxu0 %v4375_v43  ;;  %v4552_v43 = vld [vmem:[#allocation2 + $0x18] sm:$0xff] }
 0x83e   : > { %4143 = vmatprep.subr.bf16.mxu0 %v4376_v32 }
 0x841   : > { %4144 = vmatpush3.bf16.msra.mxu0 %v4376_v32 }
 0x844   : > { %4146 = vmatmul.mubr.msk.bf16.vlgmr.msra.gmra.mrb[44].mxu0 %vm1366_vm1, %v1865_v5 }
 0x845   : > { %4149 = vmatprep.mubr.msk.bf16.mxu0 %vm1366_vm1, %v1866_v58  ;;  %v4379_v58 = vld [vmem:[%s5516_s8 + $0x30] sm:$0xff]   ;;  %s6481_s8 = sld [smem:[#allocation53_spill]] }
 0x84c   : > { %4150 = vmatmul.mubr.msk.bf16.gmra.mrb[48].mxu0 %vm1366_vm1, %v1867_v40 }
 0x859   : > { %v2175_v7 = vpop.xlane.xlu1 %2174 }
 0x85a   : > { %4483 = vrcp.f32 %v2175_v7 }
 0x85d   : > { %v2342_v62 = vpop.permute.xlu1 %2341 }
 0x85e   : > { %4116 = vmatpush3.bf16.msra.mxu1 %v2342_v62 }
 0x85f   : > { %4121 = vmatprep.subr.bf16.mxu1 %v4377_v60 }
 0x864   : > { %v4484_v2 = vpop.eup %4483 }
 0x865   : > { %v2191_v5 = vmul.f32 %v4484_v2, %v5904_v6 }
 0x867   : > { %v2195_v8 = vpack.c.bf16 %v2191_v5, %v2190_v4 }
 0x869   : > { %4118 = vmatmul.mubr.msk.bf16.vlgmr.msra.gmra.mrb[40].mxu1 %vm1595_vm2, %v2195_v8 }
 0x86a   : > { %4122 = vmatpush3.bf16.msra.mxu1 %v4377_v60 }
 0x86b   : > { %4123 = vmatprep.subr.bf16.mxu1 %v4378_v38 }
 0x86e   : > { %4124 = vmatpush3.bf16.msra.mxu1 %v4378_v38 }
 0x86f   : > { %4125 = vmatprep.subr.bf16.mxu1 %v4379_v58 }
 0x872   : > { %4126 = vmatpush3.bf16.msra.mxu1 %v4379_v58 }
 0x873   : > { %4127 = vmatprep.subr.bf16.mxu1 %v4380_v31 }
 0x876   : > { %4128 = vmatpush3.bf16.msra.mxu1 %v4380_v31 }
 0x8ff   : > { %v2237_v28 = vpop.f32.mrb[36].mxu0  ;;  %v2285_v40 = vpop.f32.mrb[36].mxu1 }
 0x900   : > { %v4101_v44 = vpop.f32.mrb[37].mxu0  ;;  %v4107_v46 = vpop.f32.mrb[37].mxu1 }
 0x901   : > { %v2240_v34 = vpop.f32.mrb[38].mxu0  ;;  %v2288_v45 = vpop.f32.mrb[38].mxu1  ;;  %v4554_v46 = vld [vmem:[#allocation2 + $0x28] sm:$0xff] }
 0x902   : > { %v2388_v50 = vpack.c.bf16 %v2240_v34, %v2237_v28  ;;  %v2389_v39 = vpack.c.bf16 %v2288_v45, %v2285_v40  ;;  %v4102_v48 = vpop.f32.mrb[39].mxu0  ;;  %v4108_v47 = vpop.f32.mrb[39].mxu1  ;;  %v4553_v40 = vld [vmem:[#allocation2 + $0x20] sm:$0xff]  ;;  %v4555_v45 = vld [vmem:[#allocation2 + $0x30] sm:$0xff] }
 0x903   : > { %v4381_v47 = vld [vmem:[%s5522_s7] ss:$8 sps:$4 sm:$0xff]  }
 0x904   : > { %4129 = vmatprep.mubr.msk.bf16.mxu1 %vm1366_vm1, %v2388_v50 }
 0x905   : > { %4130 = vmatmul.mubr.msk.bf16.vlgmr.msra.gmra.mrb[44].mxu1 %vm1366_vm1, %v2389_v39  ;;  %v4556_v39 = vld [vmem:[#allocation2 + $0x38] sm:$0xff] }
 0x907   : > { %v2333_v51 = vpop.f32.mrb[40].mxu0 }
 0x908   : > { %v4113_v52 = vpop.f32.mrb[41].mxu0 }
 0x909   : > { %v2336_v53 = vpop.f32.mrb[42].mxu0  ;;  %v4386_v52 = vld [vmem:[%s5522_s7 + $0x14] ss:$8 sps:$4 sm:$0xff]  }
 0x90a   : > { %v2390_v55 = vpack.c.bf16 %v2336_v53, %v2333_v51  ;;  %v4114_v56 = vpop.f32.mrb[43].mxu0  ;;  %v4383_v51 = vld [vmem:[%s5522_s7 + $0x4] ss:$8 sps:$4 sm:$0xff]   ;;  %v4384_v53 = vld [vmem:[%s5522_s7 + $0x10] ss:$8 sps:$4 sm:$0xff]  }
 0x90b   : > { %2857 = vmatprep.subr.bf16.mxu1 %v4383_v51  ;;  %v3854_v51 = vld [vmem:[%s6480_s18] ss:$0 sm:$0xff] }
 0x90c   : > { %4133 = vmatprep.mubr.msk.bf16.mxu1 %vm1366_vm1, %v2390_v55  ;;  %2858 = vmatpush1.bf16.msra.mxu1 %v4381_v47 }
 0x90d   : > { %2859 = vmatprep.subr.bf16.mxu1 %v4386_v52 }
 0x910   : > { %2860 = vmatpush1.bf16.msra.mxu1 %v4384_v53 }
 0x917   : > { %v4147_v61 = vpop.f32.mrb[44].mxu0 }
 0x918   : > { %v2572_v0 = vpop.f32.mrb[45].mxu0 }
 0x919   : > { %v4148_v3 = vpop.f32.mrb[46].mxu0 }
 0x91a   : > { %v2575_v6 = vpop.f32.mrb[47].mxu0 }
 0x91f   : > { %v4151_v59 = vpop.f32.mrb[48].mxu0 }
 0x920   : > { %v2588_v54 = vpop.f32.mrb[49].mxu0 }
 0x921   : > { %v4152_v35 = vpop.f32.mrb[50].mxu0 }
 0x922   : > { %v2591_v11 = vpop.f32.mrb[51].mxu0 }
 0x93c   : > { %v2381_v57 = vpop.f32.mrb[40].mxu1 }
 0x93d   : > { %v4119_v23 = vpop.f32.mrb[41].mxu1 }
 0x93e   : > { %v2384_v25 = vpop.f32.mrb[42].mxu1 }
 0x93f   : > { %v2391_v15 = vpack.c.bf16 %v2384_v25, %v2381_v57  ;;  %v4120_v13 = vpop.f32.mrb[43].mxu1 }
 0x941   : > { %4134 = vmatmul.mubr.msk.bf16.gmra.mrb[48].mxu1 %vm1366_vm1, %v2391_v15 }
 0x942   : > { %2889 = vmatprep.mubr.bf16.mxu1 %v4961_v37 }
 0x9d8   : > { %v4131_v49 = vpop.f32.mrb[44].mxu1 }
 0x9d9   : > { %v2581_v17 = vadd.f32 %v4147_v61, %v4131_v49  ;;  %v2471_v21 = vpop.f32.mrb[45].mxu1 }
 0x9da   : > { %v2573_v36 = vadd.f32 %v2572_v0, %v2471_v21  ;;  %v4132_v1 = vpop.f32.mrb[46].mxu1  ;;  %v4392_v21 = vld [vmem:[%s5522_s7 + $0x34] ss:$8 sps:$4 sm:$0xff]  }
 0x9db   : > { %v2584_v12 = vadd.f32 %v4148_v3, %v4132_v1  ;;  %v2474_v29 = vpop.f32.mrb[47].mxu1  ;;  %v2612_v20 = vadd.f32 %v3853_v18, %v2581_v17  ;;  %v4389_v17 = vld [vmem:[%s5522_s7 + $0x24] ss:$8 sps:$4 sm:$0xff]  }
 0x9dc   : > { %v2610_v30 = vadd.f32 %v3853_v18, %v2573_v36  ;;  %v2576_v22 = vadd.f32 %v2575_v6, %v2474_v29  ;;  %2861 = vmatprep.subr.bf16.mxu1 %v4389_v17  ;;  %v4390_v36 = vld [vmem:[%s5522_s7 + $0x30] ss:$8 sps:$4 sm:$0xff]   ;;  %v4395_v1 = vld [vmem:[%s5522_s7 + $0x44] ss:$8 sps:$4 sm:$0xff]   ;;  %v4398_v29 = vld [vmem:[%s5522_s7 + $0x54] ss:$8 sps:$4 sm:$0xff]  }
 0x9dd   : > { %v2613_v26 = vadd.f32 %v3853_v18, %v2584_v12  ;;  %v2620_v42 = vadd.f32 %v4551_v41, %v2612_v20  ;;  %v4393_v12 = vld [vmem:[%s5522_s7 + $0x40] ss:$8 sps:$4 sm:$0xff]  }
 0x9de   : > { %v2611_v24 = vadd.f32 %v3853_v18, %v2576_v22  ;;  %v2618_v33 = vadd.f32 %v4549_v27, %v2610_v30  ;;  %v4396_v30 = vld [vmem:[%s5522_s7 + $0x50] ss:$8 sps:$4 sm:$0xff]   ;;  %v4401_v22 = vld [vmem:[%s5522_s7 + $0x64] ss:$8 sps:$4 sm:$0xff]   ;;  %v4399_v20 = vld [vmem:[%s5522_s7 + $0x60] ss:$8 sps:$4 sm:$0xff]  }
 0x9df   : > { %v2621_v32 = vadd.f32 %v4552_v43, %v2613_v26  ;;  %v4404_v27 = vld [vmem:[%s5522_s7 + $0x74] ss:$8 sps:$4 sm:$0xff]  }
 0x9e0   : > { %2628 = vadd.xlane.f32.xlu0 %v2618_v33  ;;  %v2619_v19 = vadd.f32 %v4550_v16, %v2611_v24  ;;  %v4402_v24 = vld [vmem:[%s5522_s7 + $0x70] ss:$8 sps:$4 sm:$0xff]  }
 0x9e2   : > { %2630 = vadd.xlane.f32.xlu1 %v2619_v19 }
 0x9e4   : > { %2632 = vadd.xlane.f32.xlu0 %v2620_v42 }
 0x9e8   : > { %2634 = vadd.xlane.f32.xlu0 %v2621_v32 }
 0xa14   : > { %v4135_v7 = vpop.f32.mrb[48].mxu1 }
 0xa15   : > { %v2597_v60 = vadd.f32 %v4151_v59, %v4135_v7  ;;  %v2487_v62 = vpop.f32.mrb[49].mxu1 }
 0xa16   : > { %v2589_v63 = vadd.f32 %v2588_v54, %v2487_v62  ;;  %v4136_v2 = vpop.f32.mrb[50].mxu1 }
 0xa17   : > { %v2616_v4 = vadd.f32 %v3853_v18, %v2597_v60  ;;  %v2600_v5 = vadd.f32 %v4152_v35, %v4136_v2  ;;  %v2490_v8 = vpop.f32.mrb[51].mxu1 }
 0xa18   : > { %v2614_v38 = vadd.f32 %v3853_v18, %v2589_v63  ;;  %v2592_v58 = vadd.f32 %v2591_v11, %v2490_v8 }
 0xa19   : > { %v2617_v31 = vadd.f32 %v3853_v18, %v2600_v5  ;;  %v5964_v50 = vadd.f32 %v4555_v45, %v2616_v4 }
 0xa1a   : > { %v2615_v28 = vadd.f32 %v3853_v18, %v2592_v58  ;;  %v5958_v44 = vadd.f32 %v4553_v40, %v2614_v38  ;;  %v4387_v18 = vld [vmem:[%s5522_s7 + $0x20] ss:$8 sps:$4 sm:$0xff]   ;;  %s6482_s7 = scalar_lea.vmem %s6481_s8, %s5537_s28  ;;  %s6486_s28 = sld [smem:[#allocation30_spill]] }
 0xa1b   : > { %v5967_v48 = vadd.f32 %v4556_v39, %v2617_v31  ;;  %2862 = vmatpush1.bf16.msra.mxu1 %v4387_v18 }
 0xa1c   : > { %2636 = vadd.xlane.f32.xlu0 %v5958_v44  ;;  %v5961_v34 = vadd.f32 %v4554_v46, %v2615_v28  ;;  %2863 = vmatprep.subr.bf16.mxu1 %v4392_v21 }
 0xa1e   : > { %2638 = vadd.xlane.f32.xlu1 %v5961_v34 }
 0xa1f   : > { %2864 = vmatpush1.bf16.msra.mxu1 %v4390_v36 }
 0xa20   : > { %2640 = vadd.xlane.f32.xlu0 %v5964_v50  ;;  %2865 = vmatprep.subr.bf16.mxu1 %v4395_v1  ;;  %p3891_p6 = scmp.ne.s32.totalorder %s6486_s28, 1 }
 0xa21   : > { %vm3425_vm3 = vcmask (!%p3891_p6), 1041409   ;;  %vm3431_vm4 = vcmask (!%p3891_p6), 1041408  }
 0xa22   : > { %2642 = vadd.xlane.f32.xlu1 %v5967_v48 }
 0xa23   : > { %2866 = vmatpush1.bf16.msra.mxu1 %v4393_v12 }
 0xa24   : > { %2867 = vmatprep.subr.bf16.mxu1 %v4398_v29 }
 0xa27   : > { %2868 = vmatpush1.bf16.msra.mxu1 %v4396_v30 }
 0xa28   : > { %2869 = vmatprep.subr.bf16.mxu1 %v4401_v22 }
 0xa2b   : > { %2870 = vmatpush1.bf16.msra.mxu1 %v4399_v20 }
 0xa2c   : > { %2871 = vmatprep.subr.bf16.mxu1 %v4404_v27 }
 0xa2f   : > { %2872 = vmatpush1.bf16.msra.mxu1 %v4402_v24 }
 0xa6d   : > { %v2629_v55 = vpop.xlane.xlu0 %2628 }
 0xa6e   : > { %v2645_v56 = vmul.f32 0.0078125, %v2629_v55 }
 0xa6f   : > { %v2631_v61 = vpop.xlane.xlu1 %2630 }
 0xa70   : > { %v5974_v0 = vsub.f32 %v2618_v33, %v2645_v56  ;;  %v2646_v3 = vmul.f32 0.0078125, %v2631_v61 }
 0xa71   : > { %v2633_v6 = vpop.xlane.xlu0 %2632 }
 0xa72   : > { %v5976_v59 = vsub.f32 %v2619_v19, %v2646_v3  ;;  %v2647_v54 = vmul.f32 0.0078125, %v2633_v6  ;;  %v2661_v35 = vmul.f32 %v5974_v0, %v5974_v0  ;;  %v3855_v3 = vld [vmem:[%s6482_s7] ss:$0 sm:$0xff] }
 0xa74   : > { %v5980_v11 = vsub.f32 %v2620_v42, %v2647_v54  ;;  %2669 = vadd.xlane.f32.xlu0 %v2661_v35  ;;  %v2662_v57 = vmul.f32 %v5976_v59, %v5976_v59 }
 0xa75   : > { %v2635_v23 = vpop.xlane.xlu0 %2634 }
 0xa76   : > { %v2648_v25 = vmul.f32 0.0078125, %v2635_v23  ;;  %2671 = vadd.xlane.f32.xlu1 %v2662_v57  ;;  %v2663_v15 = vmul.f32 %v5980_v11, %v5980_v11 }
 0xa78   : > { %v5986_v13 = vsub.f32 %v2621_v32, %v2648_v25  ;;  %2673 = vadd.xlane.f32.xlu0 %v2663_v15 }
 0xa7a   : > { %v2664_v49 = vmul.f32 %v5986_v13, %v5986_v13 }
 0xa7c   : > { %2675 = vadd.xlane.f32.xlu1 %v2664_v49 }
 0xaa9   : > { %v2637_v33 = vpop.xlane.xlu0 %2636 }
 0xaaa   : > { %v2649_v16 = vmul.f32 0.0078125, %v2637_v33 }
 0xaab   : > { %v2639_v19 = vpop.xlane.xlu1 %2638 }
 0xaac   : > { %v6003_v26 = vsub.f32 %v5958_v44, %v2649_v16  ;;  %v2650_v41 = vmul.f32 0.0078125, %v2639_v19 }
 0xaad   : > { %v2641_v42 = vpop.xlane.xlu0 %2640 }
 0xaae   : > { %v6006_v43 = vsub.f32 %v5961_v34, %v2650_v41  ;;  %v2651_v32 = vmul.f32 0.0078125, %v2641_v42  ;;  %v2665_v7 = vmul.f32 %v6003_v26, %v6003_v26 }
 0xaaf   : > { %v2643_v60 = vpop.xlane.xlu1 %2642 }
 0xab0   : > { %v6011_v62 = vsub.f32 %v5964_v50, %v2651_v32  ;;  %v2652_v63 = vmul.f32 0.0078125, %v2643_v60  ;;  %2677 = vadd.xlane.f32.xlu0 %v2665_v7  ;;  %v2666_v2 = vmul.f32 %v6006_v43, %v6006_v43 }
 0xab2   : > { %v6016_v4 = vsub.f32 %v5967_v48, %v2652_v63  ;;  %2679 = vadd.xlane.f32.xlu1 %v2666_v2  ;;  %v2667_v5 = vmul.f32 %v6011_v62, %v6011_v62 }
 0xab4   : > { %2681 = vadd.xlane.f32.xlu0 %v2667_v5  ;;  %v2668_v8 = vmul.f32 %v6016_v4, %v6016_v4 }
 0xab6   : > { %2683 = vadd.xlane.f32.xlu1 %v2668_v8 }
 0xb01   : > { %v2670_v38 = vpop.xlane.xlu0 %2669 }
 0xb02   : > { %v2685_v58 = vmul.f32 0.0078125, %v2670_v38 }
 0xb03   : > { %v2672_v31 = vpop.xlane.xlu1 %2671 }
 0xb04   : > { %v2693_v28 = vadd.f32 1e-12, %v2685_v58  ;;  %v2686_v40 = vmul.f32 0.0078125, %v2672_v31 }
 0xb05   : > { %v2674_v44 = vpop.xlane.xlu0 %2673 }
 0xb06   : > { %4485 = vrsqrt.f32 %v2693_v28  ;;  %v2694_v46 = vadd.f32 1e-12, %v2686_v40  ;;  %v2687_v34 = vmul.f32 0.0078125, %v2674_v44  ;;  %v4406_v28 = vld [vmem:[%s5528_s27] sm:$0xff]   ;;  %v4407_v40 = vld [vmem:[%s5528_s27 + $0x48] sm:$0xff]  }
 0xb07   : > { %v4408_v44 = vld [vmem:[%s5528_s27 + $0x8] sm:$0xff]  }
 0xb08   : > { %4487 = vrsqrt.f32 %v2694_v46  ;;  %v2695_v45 = vadd.f32 1e-12, %v2687_v34  ;;  %v4410_v46 = vld [vmem:[%s5528_s27 + $0x10] sm:$0xff]   ;;  %v4411_v34 = vld [vmem:[%s5528_s27 + $0x58] sm:$0xff]  }
 0xb09   : > { %v2676_v50 = vpop.xlane.xlu1 %2675 }
 0xb0a   : > { %4489 = vrsqrt.f32 %v2695_v45  ;;  %v2688_v39 = vmul.f32 0.0078125, %v2676_v50  ;;  %v4412_v45 = vld [vmem:[%s5528_s27 + $0x18] sm:$0xff]   ;;  %v4413_v50 = vld [vmem:[%s5528_s27 + $0x60] sm:$0xff]  }
 0xb0c   : > { %v2696_v48 = vadd.f32 1e-12, %v2688_v39  ;;  %v4414_v39 = vld [vmem:[%s5528_s27 + $0x20] sm:$0xff]  }
 0xb0e   : > { %4491 = vrsqrt.f32 %v2696_v48  ;;  %v4415_v48 = vld [vmem:[%s5528_s27 + $0x68] sm:$0xff]  }
 0xb10   : > { %v4486_v47 = vpop.eup %4485 }
 0xb11   : > { %v2709_v52 = vmul.f32 %v4486_v47, %v5974_v0  ;;  %v4416_v47 = vld [vmem:[%s5528_s27 + $0x28] sm:$0xff]  }
 0xb12   : > { %v4488_v53 = vpop.eup %4487 }
 0xb13   : > { %v2723_v55 = vmul.f32 %v3854_v51, %v2709_v52  ;;  %v2710_v56 = vmul.f32 %v4488_v53, %v5976_v59  ;;  %v4418_v52 = vld [vmem:[%s5528_s27 + $0x30] sm:$0xff]   ;;  %v4419_v53 = vld [vmem:[%s5528_s27 + $0x78] sm:$0xff]  }
 0xb14   : > { %v4490_v61 = vpop.eup %4489 }
 0xb15   : > { %v2724_v6 = vmul.f32 %v3854_v51, %v2710_v56  ;;  %v6034_v54 = vadd.f32 %v3855_v3, %v2723_v55  ;;  %v2711_v57 = vmul.f32 %v4490_v61, %v5980_v11  ;;  %v4420_v55 = vld [vmem:[%s5528_s27 + $0x38] sm:$0xff]   ;;  %v2765_v56 = vld [vmem:[%s5561_s13] sm:$0x3] }
 0xb16   : > { %v6086_v61 = vrot.slane %v2765_v56, %v1075_v10 }
 0xb17   : > { %v6036_v35 = vadd.f32 %v3855_v3, %v2724_v6  ;;  %v2725_v59 = vmul.f32 %v3854_v51, %v2711_v57 }
 0xb18   : > { %v4492_v23 = vpop.eup %4491 }
 0xb19   : > { %v2745_v0 = vpack.c.bf16 %v6036_v35, %v6034_v54  ;;  %v2712_v25 = vmul.f32 %v4492_v23, %v5986_v13  ;;  %v6045_v17 = vadd.f32 %v3855_v3, %v2725_v59 }
 0xb1b   : > { %2890 = vmatmul.mubr.bf16.vlgmr.msra.gmra.mrb[52].mxu1 %v2745_v0  ;;  %v2726_v15 = vmul.f32 %v3854_v51, %v2712_v25 }
 0xb1c   : > { %2899 = vmatprep.mubr.bf16.mxu1 %v4961_v37 }
 0xb1d   : > { %v6043_v49 = vadd.f32 %v3855_v3, %v2726_v15 }
 0xb1f   : > { %v2746_v18 = vpack.c.bf16 %v6043_v49, %v6045_v17 }
 0xb23   : > { %2900 = vmatmul.mubr.bf16.gmra.mrb[56].mxu1 %v2746_v18 }
 0xb24   : > { %2909 = vmatprep.mubr.bf16.mxu1 %v4961_v37 }
 0xb3d   : > { %v2678_v11 = vpop.xlane.xlu0 %2677 }
 0xb3e   : > { %v2689_v21 = vmul.f32 0.0078125, %v2678_v11 }
 0xb3f   : > { %v2680_v36 = vpop.xlane.xlu1 %2679 }
 0xb40   : > { %v2697_v1 = vadd.f32 1e-12, %v2689_v21  ;;  %v2690_v13 = vmul.f32 0.0078125, %v2680_v36 }
 0xb41   : > { %v2682_v12 = vpop.xlane.xlu0 %2681 }
 0xb42   : > { %4493 = vrsqrt.f32 %v2697_v1  ;;  %v2698_v29 = vadd.f32 1e-12, %v2690_v13  ;;  %v2691_v30 = vmul.f32 0.0078125, %v2682_v12 }
 0xb43   : > { %v2684_v22 = vpop.xlane.xlu1 %2683 }
 0xb44   : > { %4495 = vrsqrt.f32 %v2698_v29  ;;  %v2699_v20 = vadd.f32 1e-12, %v2691_v30  ;;  %v2692_v24 = vmul.f32 0.0078125, %v2684_v22 }
 0xb46   : > { %4497 = vrsqrt.f32 %v2699_v20  ;;  %v2700_v27 = vadd.f32 1e-12, %v2692_v24 }
 0xb48   : > { %4499 = vrsqrt.f32 %v2700_v27 }
 0xb4c   : > { %v4494_v33 = vpop.eup %4493 }
 0xb4d   : > { %v2713_v16 = vmul.f32 %v4494_v33, %v6003_v26 }
 0xb4e   : > { %v4496_v19 = vpop.eup %4495 }
 0xb4f   : > { %v2714_v41 = vmul.f32 %v4496_v19, %v6006_v43  ;;  %v2727_v42 = vmul.f32 %v3854_v51, %v2713_v16 }
 0xb50   : > { %v4498_v32 = vpop.eup %4497 }
 0xb51   : > { %v2728_v7 = vmul.f32 %v3854_v51, %v2714_v41  ;;  %v6052_v63 = vadd.f32 %v3855_v3, %v2727_v42  ;;  %v2715_v5 = vmul.f32 %v4498_v32, %v6011_v62 }
 0xb52   : > { %v4500_v60 = vpop.eup %4499 }
 0xb53   : > { %v6054_v2 = vadd.f32 %v3855_v3, %v2728_v7  ;;  %v2716_v8 = vmul.f32 %v4500_v60, %v6016_v4  ;;  %v2729_v38 = vmul.f32 %v3854_v51, %v2715_v5  ;;  %v4405_v4 = vld [vmem:[%s5528_s27 + $0x40] sm:$0xff]  }
 0xb54   : > { %3961 = vmatprep.subr.bf16.mxu0 %v4405_v4 }
 0xb55   : > { %v2747_v26 = vpack.c.bf16 %v6054_v2, %v6052_v63  ;;  %v2730_v43 = vmul.f32 %v3854_v51, %v2716_v8  ;;  %v6063_v31 = vadd.f32 %v3855_v3, %v2729_v38  ;;  %3962 = vmatpush3.bf16.msra.mxu0 %v4406_v28  ;;  %v4417_v51 = vld [vmem:[%s5528_s27 + $0x70] sm:$0xff]  }
 0xb56   : > { %3963 = vmatprep.subr.bf16.mxu0 %v4407_v40 }
 0xb57   : > { %2910 = vmatmul.mubr.bf16.gmra.mrb[60].mxu1 %v2747_v26  ;;  %v6061_v58 = vadd.f32 %v3855_v3, %v2730_v43  ;;  %v6090_v3 = vrot.slane %v2765_v56, %v1079_v14 }
 0xb58   : > { %2919 = vmatprep.mubr.bf16.mxu1 %v4961_v37  ;;  %v4409_v37 = vld [vmem:[%s5528_s27 + $0x50] sm:$0xff]  }
 0xb59   : > { %v2748_v62 = vpack.c.bf16 %v6061_v58, %v6063_v31  ;;  %3964 = vmatpush3.bf16.msra.mxu0 %v4408_v44 }
 0xb5a   : > { %3965 = vmatprep.subr.bf16.mxu0 %v4409_v37 }
 0xb5d   : > { %3966 = vmatpush3.bf16.msra.mxu0 %v4410_v46 }
 0xb5e   : > { %3967 = vmatprep.subr.bf16.mxu0 %v4411_v34 }
 0xb5f   : > { %2920 = vmatmul.mubr.bf16.gmra.mrb[64].mxu1 %v2748_v62 }
 0xb61   : > { %3968 = vmatpush3.bf16.msra.mxu0 %v4412_v45 }
 0xb62   : > { %3969 = vmatprep.subr.bf16.mxu0 %v4413_v50 }
 0xb65   : > { %3970 = vmatpush3.bf16.msra.mxu0 %v4414_v39 }
 0xb66   : > { %3971 = vmatprep.subr.bf16.mxu0 %v4415_v48 }
 0xb69   : > { %3972 = vmatpush3.bf16.msra.mxu0 %v4416_v47 }
 0xb6a   : > { %3973 = vmatprep.subr.bf16.mxu0 %v4417_v51 }
 0xb6d   : > { %3974 = vmatpush3.bf16.msra.mxu0 %v4418_v52 }
 0xb6e   : > { %3975 = vmatprep.subr.bf16.mxu0 %v4419_v53 }
 0xb71   : > { %3976 = vmatpush3.bf16.msra.mxu0 %v4420_v55 }
 0xbee   : > { %v2891_v6 = vpop.f32.mrb[52].mxu1 }
 0xbef   : > { %v6093_v57 = vadd.f32 %v2891_v6, %v6086_v61  ;;  %v2893_v23 = vpop.f32.mrb[53].mxu1 }
 0xbf0   : > { %v6096_v0 = vadd.f32 %v2893_v23, %v6090_v3  ;;  %v2895_v25 = vpop.f32.mrb[54].mxu1 }
 0xbf1   : > { %v2930_v59 = vmul.f32 %v6093_v57, %v6093_v57  ;;  %v6101_v15 = vadd.f32 %v2895_v25, %v6086_v61  ;;  %v2897_v10 = vpop.f32.mrb[55].mxu1 }
 0xbf2   : > { %v2931_v9 = vmul.f32 %v6096_v0, %v6096_v0  ;;  %v6106_v14 = vadd.f32 %v2897_v10, %v6090_v3 }
 0xbf3   : > { %v2946_v18 = vmul.f32 %v2930_v59, %v6093_v57  ;;  %v2932_v11 = vmul.f32 %v6101_v15, %v6101_v15 }
 0xbf4   : > { %v2947_v21 = vmul.f32 %v2931_v9, %v6096_v0  ;;  %v2933_v36 = vmul.f32 %v6106_v14, %v6106_v14 }
 0xbf5   : > { %v2962_v1 = vmul.f32 0.044715, %v2946_v18  ;;  %v2948_v13 = vmul.f32 %v2932_v11, %v6101_v15 }
 0xbf6   : > { %v2963_v12 = vmul.f32 0.044715, %v2947_v21  ;;  %v2949_v29 = vmul.f32 %v2933_v36, %v6106_v14  ;;  %v2901_v30 = vpop.f32.mrb[56].mxu1 }
 0xbf7   : > { %v2978_v22 = vadd.f32 %v2962_v1, %v6093_v57  ;;  %v2964_v20 = vmul.f32 0.044715, %v2948_v13  ;;  %v6118_v24 = vadd.f32 %v2901_v30, %v6086_v61  ;;  %v2903_v27 = vpop.f32.mrb[57].mxu1 }
 0xbf8   : > { %v2979_v33 = vadd.f32 %v2963_v12, %v6096_v0  ;;  %v2965_v16 = vmul.f32 0.044715, %v2949_v29  ;;  %v6122_v19 = vadd.f32 %v2903_v27, %v6090_v3  ;;  %v2905_v41 = vpop.f32.mrb[58].mxu1 }
 0xbf9   : > { %v2994_v42 = vmul.f32 0.7978846, %v2978_v22  ;;  %v2980_v32 = vadd.f32 %v2964_v20, %v6101_v15  ;;  %v2934_v7 = vmul.f32 %v6118_v24, %v6118_v24  ;;  %v6128_v60 = vadd.f32 %v2905_v41, %v6086_v61  ;;  %v2907_v5 = vpop.f32.mrb[59].mxu1 }
 0xbfa   : > { %v2995_v8 = vmul.f32 0.7978846, %v2979_v33  ;;  %v2981_v26 = vadd.f32 %v2965_v16, %v6106_v14  ;;  %v2935_v43 = vmul.f32 %v6122_v19, %v6122_v19  ;;  %v6134_v38 = vadd.f32 %v2907_v5, %v6090_v3 }
 0xbfb   : > { %4501 = vtanh.f32 %v2994_v42  ;;  %v2996_v62 = vmul.f32 0.7978846, %v2980_v32  ;;  %v2950_v4 = vmul.f32 %v2934_v7, %v6118_v24  ;;  %v2936_v28 = vmul.f32 %v6128_v60, %v6128_v60 }
 0xbfc   : > { %4503 = vtanh.f32 %v2995_v8  ;;  %v2997_v40 = vmul.f32 0.7978846, %v2981_v26  ;;  %v2951_v44 = vmul.f32 %v2935_v43, %v6122_v19  ;;  %v2937_v37 = vmul.f32 %v6134_v38, %v6134_v38 }
 0xbfd   : > { %4505 = vtanh.f32 %v2996_v62  ;;  %v2966_v46 = vmul.f32 0.044715, %v2950_v4  ;;  %v2952_v34 = vmul.f32 %v2936_v28, %v6128_v60 }
 0xbfe   : > { %4507 = vtanh.f32 %v2997_v40  ;;  %v2967_v45 = vmul.f32 0.044715, %v2951_v44  ;;  %v2953_v50 = vmul.f32 %v2937_v37, %v6134_v38 }
 0xbff   : > { %v2982_v39 = vadd.f32 %v2966_v46, %v6118_v24  ;;  %v2968_v48 = vmul.f32 0.044715, %v2952_v34 }
 0xc00   : > { %v2983_v47 = vadd.f32 %v2967_v45, %v6122_v19  ;;  %v2969_v51 = vmul.f32 0.044715, %v2953_v50 }
 0xc01   : > { %v2998_v52 = vmul.f32 0.7978846, %v2982_v39  ;;  %v2984_v53 = vadd.f32 %v2968_v48, %v6128_v60 }
 0xc02   : > { %v2999_v55 = vmul.f32 0.7978846, %v2983_v47  ;;  %v2985_v56 = vadd.f32 %v2969_v51, %v6134_v38 }
 0xc03   : > { %4509 = vtanh.f32 %v2998_v52  ;;  %v3000_v6 = vmul.f32 0.7978846, %v2984_v53 }
 0xc04   : > { %4511 = vtanh.f32 %v2999_v55  ;;  %v3001_v23 = vmul.f32 0.7978846, %v2985_v56 }
 0xc05   : > { %v4502_v25 = vpop.eup %4501  ;;  %4513 = vtanh.f32 %v3000_v6 }
 0xc06   : > { %v4504_v59 = vpop.eup %4503  ;;  %v3026_v10 = vadd.f32 1.0, %v4502_v25  ;;  %4515 = vtanh.f32 %v3001_v23 }
 0xc07   : > { %v4506_v9 = vpop.eup %4505  ;;  %v3027_v18 = vadd.f32 1.0, %v4504_v59 }
 0xc08   : > { %v4508_v11 = vpop.eup %4507  ;;  %v3042_v21 = vmul.f32 0.5, %v3026_v10  ;;  %v3028_v36 = vadd.f32 1.0, %v4506_v9 }
 0xc09   : > { %v3029_v1 = vadd.f32 1.0, %v4508_v11  ;;  %v3043_v13 = vmul.f32 0.5, %v3027_v18 }
 0xc0a   : > { %v3044_v12 = vmul.f32 0.5, %v3028_v36  ;;  %v3058_v30 = vmul.f32 %v3042_v21, %v6093_v57 }
 0xc0b   : > { %v3045_v29 = vmul.f32 0.5, %v3029_v1  ;;  %v3059_v27 = vmul.f32 %v3043_v13, %v6096_v0 }
 0xc0c   : > { %v3060_v22 = vmul.f32 %v3044_v12, %v6101_v15 }
 0xc0d   : > { %v4510_v20 = vpop.eup %4509  ;;  %v3061_v33 = vmul.f32 %v3045_v29, %v6106_v14 }
 0xc0e   : > { %v4512_v16 = vpop.eup %4511  ;;  %v3074_v41 = vpack.c.bf16 %v3060_v22, %v3058_v30  ;;  %v3030_v42 = vadd.f32 1.0, %v4510_v20 }
 0xc0f   : > { %v4514_v32 = vpop.eup %4513  ;;  %v3075_v7 = vpack.c.bf16 %v3061_v33, %v3059_v27  ;;  %v3031_v5 = vadd.f32 1.0, %v4512_v16 }
 0xc10   : > { %v4516_v8 = vpop.eup %4515  ;;  %v3032_v26 = vadd.f32 1.0, %v4514_v32  ;;  %v3046_v43 = vmul.f32 0.5, %v3030_v42 }
 0xc11   : > { %3249 = vmatprep.mubr.bf16.mxu0 %v3075_v7  ;;  %v3033_v62 = vadd.f32 1.0, %v4516_v8  ;;  %v3047_v4 = vmul.f32 0.5, %v3031_v5 }
 0xc12   : > { %3250 = vmatmul.mubr.bf16.vlgmr.msra.gmra.mrb[52].mxu0 %v3074_v41  ;;  %v3048_v57 = vmul.f32 0.5, %v3032_v26  ;;  %v3062_v28 = vmul.f32 %v3046_v43, %v6118_v24 }
 0xc13   : > { %v3049_v15 = vmul.f32 0.5, %v3033_v62  ;;  %v3063_v14 = vmul.f32 %v3047_v4, %v6122_v19 }
 0xc14   : > { %v3064_v0 = vmul.f32 %v3048_v57, %v6128_v60 }
 0xc15   : > { %v3065_v40 = vmul.f32 %v3049_v15, %v6134_v38 }
 0xc16   : > { %v3076_v44 = vpack.c.bf16 %v3064_v0, %v3062_v28 }
 0xc17   : > { %v3077_v37 = vpack.c.bf16 %v3065_v40, %v3063_v14 }
 0xc19   : > { %3257 = vmatprep.mubr.bf16.mxu0 %v3077_v37 }
 0xc1a   : > { %3258 = vmatmul.mubr.bf16.gmra.mrb[56].mxu0 %v3076_v44 }
 0xc2a   : > { %v2911_v46 = vpop.f32.mrb[60].mxu1 }
 0xc2b   : > { %v6157_v34 = vadd.f32 %v2911_v46, %v6086_v61  ;;  %v2913_v45 = vpop.f32.mrb[61].mxu1 }
 0xc2c   : > { %v6160_v50 = vadd.f32 %v2913_v45, %v6090_v3  ;;  %v2915_v39 = vpop.f32.mrb[62].mxu1 }
 0xc2d   : > { %v2938_v24 = vmul.f32 %v6157_v34, %v6157_v34  ;;  %v6165_v19 = vadd.f32 %v2915_v39, %v6086_v61  ;;  %v2917_v60 = vpop.f32.mrb[63].mxu1 }
 0xc2e   : > { %v2939_v38 = vmul.f32 %v6160_v50, %v6160_v50  ;;  %v6170_v48 = vadd.f32 %v2917_v60, %v6090_v3 }
 0xc2f   : > { %v2954_v47 = vmul.f32 %v2938_v24, %v6157_v34  ;;  %v2940_v51 = vmul.f32 %v6165_v19, %v6165_v19 }
 0xc30   : > { %v2955_v52 = vmul.f32 %v2939_v38, %v6160_v50  ;;  %v2941_v53 = vmul.f32 %v6170_v48, %v6170_v48 }
 0xc31   : > { %v2970_v55 = vmul.f32 0.044715, %v2954_v47  ;;  %v2956_v56 = vmul.f32 %v2940_v51, %v6165_v19 }
 0xc32   : > { %v2971_v6 = vmul.f32 0.044715, %v2955_v52  ;;  %v2957_v23 = vmul.f32 %v2941_v53, %v6170_v48  ;;  %v2921_v25 = vpop.f32.mrb[64].mxu1 }
 0xc33   : > { %v2986_v59 = vadd.f32 %v2970_v55, %v6157_v34  ;;  %v2972_v10 = vmul.f32 0.044715, %v2956_v56  ;;  %v6182_v9 = vadd.f32 %v2921_v25, %v6086_v61  ;;  %v2923_v18 = vpop.f32.mrb[65].mxu1 }
 0xc34   : > { %v2987_v11 = vadd.f32 %v2971_v6, %v6160_v50  ;;  %v2973_v21 = vmul.f32 0.044715, %v2957_v23  ;;  %v6186_v36 = vadd.f32 %v2923_v18, %v6090_v3  ;;  %v2925_v1 = vpop.f32.mrb[66].mxu1 }
 0xc35   : > { %v3002_v13 = vmul.f32 0.7978846, %v2986_v59  ;;  %v2988_v12 = vadd.f32 %v2972_v10, %v6165_v19  ;;  %v2942_v29 = vmul.f32 %v6182_v9, %v6182_v9  ;;  %v6192_v30 = vadd.f32 %v2925_v1, %v6086_v61  ;;  %v2927_v22 = vpop.f32.mrb[67].mxu1 }
 0xc36   : > { %v3003_v20 = vmul.f32 0.7978846, %v2987_v11  ;;  %v2989_v27 = vadd.f32 %v2973_v21, %v6170_v48  ;;  %v2943_v33 = vmul.f32 %v6186_v36, %v6186_v36  ;;  %v6198_v16 = vadd.f32 %v2927_v22, %v6090_v3 }
 0xc37   : > { %4517 = vtanh.f32 %v3002_v13  ;;  %v3004_v41 = vmul.f32 0.7978846, %v2988_v12  ;;  %v2958_v42 = vmul.f32 %v2942_v29, %v6182_v9  ;;  %v2944_v32 = vmul.f32 %v6192_v30, %v6192_v30 }
 0xc38   : > { %4519 = vtanh.f32 %v3003_v20  ;;  %v3005_v61 = vmul.f32 0.7978846, %v2989_v27  ;;  %v2959_v7 = vmul.f32 %v2943_v33, %v6186_v36  ;;  %v2945_v5 = vmul.f32 %v6198_v16, %v6198_v16 }
 0xc39   : > { %4521 = vtanh.f32 %v3004_v41  ;;  %v2974_v8 = vmul.f32 0.044715, %v2958_v42  ;;  %v2960_v26 = vmul.f32 %v2944_v32, %v6192_v30 }
 0xc3a   : > { %4523 = vtanh.f32 %v3005_v61  ;;  %v2975_v3 = vmul.f32 0.044715, %v2959_v7  ;;  %v2961_v43 = vmul.f32 %v2945_v5, %v6198_v16  ;;  %v3872_v5 = vld [vmem:[%s876_s25] ss:$0 sm:$0xff] }
 0xc3b   : > { %v2990_v62 = vadd.f32 %v2974_v8, %v6182_v9  ;;  %v2976_v4 = vmul.f32 0.044715, %v2960_v26 }
 0xc3c   : > { %v2991_v57 = vadd.f32 %v2975_v3, %v6186_v36  ;;  %v2977_v15 = vmul.f32 0.044715, %v2961_v43 }
 0xc3d   : > { %v3006_v28 = vmul.f32 0.7978846, %v2990_v62  ;;  %v2992_v0 = vadd.f32 %v2976_v4, %v6192_v30 }
 0xc3e   : > { %v3007_v14 = vmul.f32 0.7978846, %v2991_v57  ;;  %v2993_v40 = vadd.f32 %v2977_v15, %v6198_v16 }
 0xc3f   : > { %4525 = vtanh.f32 %v3006_v28  ;;  %v3008_v44 = vmul.f32 0.7978846, %v2992_v0 }
 0xc40   : > { %4527 = vtanh.f32 %v3007_v14  ;;  %v3009_v37 = vmul.f32 0.7978846, %v2993_v40 }
 0xc41   : > { %v4518_v46 = vpop.eup %4517  ;;  %4529 = vtanh.f32 %v3008_v44 }
 0xc42   : > { %v4520_v45 = vpop.eup %4519  ;;  %4531 = vtanh.f32 %v3009_v37  ;;  %v3034_v39 = vadd.f32 1.0, %v4518_v46 }
 0xc43   : > { %v4522_v24 = vpop.eup %4521  ;;  %v3035_v60 = vadd.f32 1.0, %v4520_v45 }
 0xc44   : > { %v4524_v38 = vpop.eup %4523  ;;  %v3036_v47 = vadd.f32 1.0, %v4522_v24  ;;  %v3050_v51 = vmul.f32 0.5, %v3034_v39 }
 0xc45   : > { %v3037_v52 = vadd.f32 1.0, %v4524_v38  ;;  %v3051_v53 = vmul.f32 0.5, %v3035_v60 }
 0xc46   : > { %v3052_v55 = vmul.f32 0.5, %v3036_v47  ;;  %v3066_v6 = vmul.f32 %v3050_v51, %v6157_v34 }
 0xc47   : > { %v3053_v56 = vmul.f32 0.5, %v3037_v52  ;;  %v3067_v59 = vmul.f32 %v3051_v53, %v6160_v50 }
 0xc48   : > { %v3068_v23 = vmul.f32 %v3052_v55, %v6165_v19 }
 0xc49   : > { %v4526_v25 = vpop.eup %4525  ;;  %v3069_v10 = vmul.f32 %v3053_v56, %v6170_v48 }
 0xc4a   : > { %v4528_v18 = vpop.eup %4527  ;;  %v3078_v11 = vpack.c.bf16 %v3068_v23, %v3066_v6  ;;  %v3038_v21 = vadd.f32 1.0, %v4526_v25 }
 0xc4b   : > { %v4530_v1 = vpop.eup %4529  ;;  %v3079_v13 = vpack.c.bf16 %v3069_v10, %v3067_v59  ;;  %v3039_v12 = vadd.f32 1.0, %v4528_v18 }
 0xc4c   : > { %v4532_v29 = vpop.eup %4531  ;;  %v3040_v22 = vadd.f32 1.0, %v4530_v1  ;;  %v3054_v20 = vmul.f32 0.5, %v3038_v21 }
 0xc4d   : > { %3265 = vmatprep.mubr.bf16.mxu0 %v3079_v13  ;;  %v3041_v27 = vadd.f32 1.0, %v4532_v29  ;;  %v3055_v34 = vmul.f32 0.5, %v3039_v12 }
 0xc4e   : > { %3266 = vmatmul.mubr.bf16.gmra.mrb[60].mxu0 %v3078_v11  ;;  %v3056_v19 = vmul.f32 0.5, %v3040_v22  ;;  %v3070_v50 = vmul.f32 %v3054_v20, %v6182_v9 }
 0xc4f   : > { %v3057_v33 = vmul.f32 0.5, %v3041_v27  ;;  %v3071_v41 = vmul.f32 %v3055_v34, %v6186_v36 }
 0xc50   : > { %v3072_v48 = vmul.f32 %v3056_v19, %v6192_v30 }
 0xc51   : > { %v3073_v42 = vmul.f32 %v3057_v33, %v6198_v16 }
 0xc52   : > { %v3080_v32 = vpack.c.bf16 %v3072_v48, %v3070_v50 }
 0xc53   : > { %v3081_v61 = vpack.c.bf16 %v3073_v42, %v3071_v41 }
 0xc55   : > { %3273 = vmatprep.mubr.bf16.mxu0 %v3081_v61 }
 0xc56   : > { %3274 = vmatmul.mubr.bf16.gmra.mrb[64].mxu0 %v3080_v32 }
 0xce5   : > { %v3977_v7 = vpop.f32.mrb[52].mxu0 }
 0xce6   : > { %v3978_v8 = vpop.f32.mrb[53].mxu0 }
 0xce7   : > { %v3979_v26 = vadd.f32 %v3978_v8, %v3977_v7  ;;  %v3980_v3 = vpop.f32.mrb[54].mxu0 }
 0xce8   : > { %v3981_v9 = vpop.f32.mrb[55].mxu0 }
 0xce9   : > { %v3252_v43 = vadd.f32 %v3979_v26, %v3872_v5  ;;  %v3982_v30 = vadd.f32 %v3981_v9, %v3980_v3 }
 0xceb   : > { %v3255_v62 = vadd.f32 %v3982_v30, %v3872_v5  ;;  %v3282_v36 = vadd.f32 %v3252_v43, %v6034_v54 }
 0xced   : > { %3292 = vadd.xlane.f32.xlu0 %v3282_v36  ;;  %v3983_v16 = vpop.f32.mrb[56].mxu0  ;;  %v3283_v4 = vadd.f32 %v3255_v62, %v6036_v35 }
 0xcee   : > { %v3984_v57 = vpop.f32.mrb[57].mxu0 }
 0xcef   : > { %v3985_v15 = vadd.f32 %v3984_v57, %v3983_v16  ;;  %3294 = vadd.xlane.f32.xlu1 %v3283_v4  ;;  %v3986_v28 = vpop.f32.mrb[58].mxu0 }
 0xcf0   : > { %v3987_v0 = vpop.f32.mrb[59].mxu0 }
 0xcf1   : > { %v3260_v14 = vadd.f32 %v3985_v15, %v3872_v5  ;;  %v3988_v40 = vadd.f32 %v3987_v0, %v3986_v28 }
 0xcf3   : > { %v3263_v44 = vadd.f32 %v3988_v40, %v3872_v5  ;;  %v3284_v37 = vadd.f32 %v3260_v14, %v6045_v17 }
 0xcf5   : > { %3296 = vadd.xlane.f32.xlu0 %v3284_v37  ;;  %v3285_v46 = vadd.f32 %v3263_v44, %v6043_v49 }
 0xcf7   : > { %3298 = vadd.xlane.f32.xlu1 %v3285_v46 }
 0xd21   : > { %v3989_v45 = vpop.f32.mrb[60].mxu0 }
 0xd22   : > { %v3990_v54 = vpop.f32.mrb[61].mxu0 }
 0xd23   : > { %v3991_v39 = vadd.f32 %v3990_v54, %v3989_v45  ;;  %v3992_v24 = vpop.f32.mrb[62].mxu0  ;;  %v3889_v54 = vld [vmem:[%s879_s24] ss:$0 sm:$0xff] }
 0xd24   : > { %v3993_v60 = vpop.f32.mrb[63].mxu0 }
 0xd25   : > { %v3268_v35 = vadd.f32 %v3991_v39, %v3872_v5  ;;  %v3994_v38 = vadd.f32 %v3993_v60, %v3992_v24  ;;  %v3890_v60 = vld [vmem:[%s882_s10] ss:$0 sm:$0xff] }
 0xd27   : > { %v3271_v47 = vadd.f32 %v3994_v38, %v3872_v5  ;;  %v3286_v51 = vadd.f32 %v3268_v35, %v6052_v63 }
 0xd29   : > { %3300 = vadd.xlane.f32.xlu0 %v3286_v51  ;;  %v3995_v52 = vpop.f32.mrb[64].mxu0  ;;  %v3287_v53 = vadd.f32 %v3271_v47, %v6054_v2 }
 0xd2a   : > { %v3996_v55 = vpop.f32.mrb[65].mxu0 }
 0xd2b   : > { %v3997_v17 = vadd.f32 %v3996_v55, %v3995_v52  ;;  %3302 = vadd.xlane.f32.xlu1 %v3287_v53  ;;  %v3998_v56 = vpop.f32.mrb[66].mxu0 }
 0xd2c   : > { %v3999_v49 = vpop.f32.mrb[67].mxu0 }
 0xd2d   : > { %v3276_v6 = vadd.f32 %v3997_v17, %v3872_v5  ;;  %v4000_v23 = vadd.f32 %v3999_v49, %v3998_v56 }
 0xd2f   : > { %v3279_v25 = vadd.f32 %v4000_v23, %v3872_v5  ;;  %v3288_v59 = vadd.f32 %v3276_v6, %v6063_v31 }
 0xd31   : > { %3304 = vadd.xlane.f32.xlu0 %v3288_v59  ;;  %v3289_v10 = vadd.f32 %v3279_v25, %v6061_v58 }
 0xd33   : > { %3306 = vadd.xlane.f32.xlu1 %v3289_v10 }
 0xd7a   : > { %v3293_v18 = vpop.xlane.xlu0 %3292 }
 0xd7b   : > { %v3308_v63 = vmul.f32 0.0078125, %v3293_v18 }
 0xd7c   : > { %v3295_v11 = vpop.xlane.xlu1 %3294 }
 0xd7d   : > { %v3316_v21 = vsub.f32 %v3282_v36, %v3308_v63  ;;  %v3309_v1 = vmul.f32 0.0078125, %v3295_v11 }
 0xd7f   : > { %v3317_v2 = vsub.f32 %v3283_v4, %v3309_v1  ;;  %v3324_v13 = vmul.f32 %v3316_v21, %v3316_v21 }
 0xd81   : > { %3332 = vadd.xlane.f32.xlu0 %v3324_v13  ;;  %v3325_v12 = vmul.f32 %v3317_v2, %v3317_v2 }
 0xd82   : > { %v3297_v29 = vpop.xlane.xlu0 %3296 }
 0xd83   : > { %v3310_v22 = vmul.f32 0.0078125, %v3297_v29  ;;  %3334 = vadd.xlane.f32.xlu1 %v3325_v12 }
 0xd84   : > { %v3299_v20 = vpop.xlane.xlu1 %3298 }
 0xd85   : > { %v3318_v27 = vsub.f32 %v3284_v37, %v3310_v22  ;;  %v3311_v34 = vmul.f32 0.0078125, %v3299_v20 }
 0xd87   : > { %v3319_v31 = vsub.f32 %v3285_v46, %v3311_v34  ;;  %v3326_v19 = vmul.f32 %v3318_v27, %v3318_v27 }
 0xd89   : > { %3336 = vadd.xlane.f32.xlu0 %v3326_v19  ;;  %v3327_v58 = vmul.f32 %v3319_v31, %v3319_v31 }
 0xd8b   : > { %3338 = vadd.xlane.f32.xlu1 %v3327_v58 }
 0xdb6   : > { %v3301_v33 = vpop.xlane.xlu0 %3300 }
 0xdb7   : > { %v3312_v50 = vmul.f32 0.0078125, %v3301_v33 }
 0xdb8   : > { %v3303_v48 = vpop.xlane.xlu1 %3302 }
 0xdb9   : > { %v6233_v41 = vsub.f32 %v3286_v51, %v3312_v50  ;;  %v3313_v42 = vmul.f32 0.0078125, %v3303_v48 }
 0xdbb   : > { %v6235_v32 = vsub.f32 %v3287_v53, %v3313_v42  ;;  %v3328_v61 = vmul.f32 %v6233_v41, %v6233_v41 }
 0xdbd   : > { %3340 = vadd.xlane.f32.xlu0 %v3328_v61  ;;  %v3329_v7 = vmul.f32 %v6235_v32, %v6235_v32 }
 0xdbe   : > { %v3305_v5 = vpop.xlane.xlu0 %3304 }
 0xdbf   : > { %v3314_v8 = vmul.f32 0.0078125, %v3305_v5  ;;  %3342 = vadd.xlane.f32.xlu1 %v3329_v7 }
 0xdc0   : > { %v3307_v26 = vpop.xlane.xlu1 %3306 }
 0xdc1   : > { %v6241_v3 = vsub.f32 %v3288_v59, %v3314_v8  ;;  %v3315_v9 = vmul.f32 0.0078125, %v3307_v26 }
 0xdc3   : > { %v6243_v43 = vsub.f32 %v3289_v10, %v3315_v9  ;;  %v3330_v30 = vmul.f32 %v6241_v3, %v6241_v3 }
 0xdc5   : > { %3344 = vadd.xlane.f32.xlu0 %v3330_v30  ;;  %v3331_v62 = vmul.f32 %v6243_v43, %v6243_v43 }
 0xdc7   : > { %3346 = vadd.xlane.f32.xlu1 %v3331_v62 }
 0xe0e   : > { %v3333_v36 = vpop.xlane.xlu0 %3332 }
 0xe0f   : > { %v3348_v16 = vmul.f32 0.0078125, %v3333_v36 }
 0xe10   : > { %v3335_v4 = vpop.xlane.xlu1 %3334 }
 0xe11   : > { %v3356_v57 = vadd.f32 1e-12, %v3348_v16  ;;  %v3349_v15 = vmul.f32 0.0078125, %v3335_v4 }
 0xe13   : > { %4533 = vrsqrt.f32 %v3356_v57  ;;  %v3357_v28 = vadd.f32 1e-12, %v3349_v15 }
 0xe15   : > { %4535 = vrsqrt.f32 %v3357_v28 }
 0xe16   : > { %v3337_v0 = vpop.xlane.xlu0 %3336 }
 0xe17   : > { %v3350_v14 = vmul.f32 0.0078125, %v3337_v0 }
 0xe18   : > { %v3339_v40 = vpop.xlane.xlu1 %3338 }
 0xe19   : > { %v3358_v44 = vadd.f32 1e-12, %v3350_v14  ;;  %v3351_v37 = vmul.f32 0.0078125, %v3339_v40 }
 0xe1b   : > { %4537 = vrsqrt.f32 %v3358_v44  ;;  %v3359_v46 = vadd.f32 1e-12, %v3351_v37 }
 0xe1d   : > { %v4534_v45 = vpop.eup %4533  ;;  %4539 = vrsqrt.f32 %v3359_v46 }
 0xe1e   : > { %v3372_v39 = vmul.f32 %v4534_v45, %v3316_v21 }
 0xe1f   : > { %v4536_v24 = vpop.eup %4535 }
 0xe20   : > { %v3386_v35 = vmul.f32 %v3889_v54, %v3372_v39  ;;  %v3373_v38 = vmul.f32 %v4536_v24, %v3317_v2 }
 0xe22   : > { %v3400_v47 = vadd.f32 %v3890_v60, %v3386_v35  ;;  %v3387_v51 = vmul.f32 %v3889_v54, %v3373_v38 }
 0xe24   : > { %3408 = vst [vmem:[#allocation2] sm:$0xff] %v3400_v47  ;;  %v3401_v52 = vadd.f32 %v3890_v60, %v3387_v51 }
 0xe25   : > { %v4538_v53 = vpop.eup %4537 }
 0xe26   : > { %3409 = vst [vmem:[#allocation2 + $0x8] sm:$0xff] %v3401_v52  ;;  %v3374_v55 = vmul.f32 %v4538_v53, %v3318_v27 }
 0xe27   : > { %v4540_v17 = vpop.eup %4539 }
 0xe28   : > { %v3388_v56 = vmul.f32 %v3889_v54, %v3374_v55  ;;  %v3375_v49 = vmul.f32 %v4540_v17, %v3319_v31 }
 0xe2a   : > { %v3402_v6 = vadd.f32 %v3890_v60, %v3388_v56  ;;  %v3389_v23 = vmul.f32 %v3889_v54, %v3375_v49 }
 0xe2c   : > { %3410 = vst [vmem:[#allocation2 + $0x10] sm:$0xff] %v3402_v6  ;;  %v3403_v25 = vadd.f32 %v3890_v60, %v3389_v23 }
 0xe2e   : > { %3411 = vst [vmem:[#allocation2 + $0x18] sm:$0xff] %v3403_v25 }
 0xe4a   : > { %v3341_v59 = vpop.xlane.xlu0 %3340 }
 0xe4b   : > { %v3352_v10 = vmul.f32 0.0078125, %v3341_v59 }
 0xe4c   : > { %v3343_v18 = vpop.xlane.xlu1 %3342 }
 0xe4d   : > { %v3360_v63 = vadd.f32 1e-12, %v3352_v10  ;;  %v3353_v11 = vmul.f32 0.0078125, %v3343_v18 }
 0xe4f   : > { %4541 = vrsqrt.f32 %v3360_v63  ;;  %v3361_v21 = vadd.f32 1e-12, %v3353_v11 }
 0xe51   : > { %4543 = vrsqrt.f32 %v3361_v21 }
 0xe52   : > { %v3345_v1 = vpop.xlane.xlu0 %3344 }
 0xe53   : > { %v3354_v2 = vmul.f32 0.0078125, %v3345_v1 }
 0xe54   : > { %v3347_v13 = vpop.xlane.xlu1 %3346 }
 0xe55   : > { %v3362_v12 = vadd.f32 1e-12, %v3354_v2  ;;  %v3355_v29 = vmul.f32 0.0078125, %v3347_v13 }
 0xe57   : > { %4545 = vrsqrt.f32 %v3362_v12  ;;  %v3363_v22 = vadd.f32 1e-12, %v3355_v29 }
 0xe59   : > { %v4542_v20 = vpop.eup %4541  ;;  %4547 = vrsqrt.f32 %v3363_v22 }
 0xe5a   : > { %v3376_v27 = vmul.f32 %v4542_v20, %v6233_v41 }
 0xe5b   : > { %v4544_v34 = vpop.eup %4543 }
 0xe5c   : > { %v3390_v31 = vmul.f32 %v3889_v54, %v3376_v27  ;;  %v3377_v19 = vmul.f32 %v4544_v34, %v6235_v32  ;;  %v3424_v32 = vrot.slane (!%p3891_p6), %v3402_v6, 7 }
 0xe5e   : > { %v3404_v58 = vadd.f32 %v3890_v60, %v3390_v31  ;;  %v3391_v33 = vmul.f32 %v3889_v54, %v3377_v19  ;;  %v3426_v30 = vsel (!%p3891_p6), %vm3425_vm3, %v3424_v32, %v3400_v47 }
 0xe5f   : > { %v3432_v62 = vsel (!%p3891_p6), %vm3431_vm4, %v3426_v30, 0.0 }
 0xe60   : > { %3412 = vst [vmem:[#allocation2 + $0x20] sm:$0xff] %v3404_v58  ;;  %v3405_v50 = vadd.f32 %v3890_v60, %v3391_v33  ;;  %v3433_v16 = vrot.slane (!%p3891_p6), %v3432_v62, 4 }
 0xe61   : > { %v4546_v48 = vpop.eup %4545 }
 0xe62   : > { %3413 = vst [vmem:[#allocation2 + $0x28] sm:$0xff] %v3405_v50  ;;  %v3378_v42 = vmul.f32 %v4546_v48, %v6241_v3  ;;  %v3434_v4 = vadd.f32 (!%p3891_p6), %v3433_v16, %v3432_v62 }
 0xe63   : > { %v4548_v61 = vpop.eup %4547 }
 0xe64   : > { %v3392_v7 = vmul.f32 %v3889_v54, %v3378_v42  ;;  %v3379_v5 = vmul.f32 %v4548_v61, %v6243_v43  ;;  %3419 = sbr.rel (%p3891_p6) target bundleno = 3710 (0xe7e), region = 124  ;;  %v3435_v15 = vrot.slane (!%p3891_p6), %v3434_v4, 2 }
 0xe66   : > { %v3406_v8 = vadd.f32 %v3890_v60, %v3392_v7  ;;  %v3393_v26 = vmul.f32 %v3889_v54, %v3379_v5  ;;  %v3436_v0 = vadd.f32 (!%p3891_p6), %v3435_v15, %v3434_v4 }
 0xe68   : > { %3414 = vst [vmem:[#allocation2 + $0x30] sm:$0xff] %v3406_v8  ;;  %v3407_v41 = vadd.f32 %v3890_v60, %v3393_v26  ;;  %v3427_v9 = vrot.slane (!%p3891_p6), %v3406_v8, 7  ;;  %v3437_v40 = vrot.slane (!%p3891_p6), %v3436_v0, 1 }
 0xe6a   : > { %3415 = vst [vmem:[#allocation2 + $0x38] sm:$0xff] %v3407_v41  ;;  %v3428_v3 = vsel (!%p3891_p6), %vm3425_vm3, %v3427_v9, %v3404_v58  ;;  %v3438_v37 = vadd.f32 (!%p3891_p6), %v3437_v40, %v3436_v0 }
 0xe6b   : > { %v3439_v36 = vsel %vm3431_vm4, %v3428_v3, 0.0 }
 0xe6c   : > { %v3440_v43 = vrot.slane %v3439_v36, 4  ;;  %v3447_v45 = vmul.f32 0.5, %v3438_v37 }
 0xe6e   : > { %v3441_v57 = vadd.f32 %v3440_v43, %v3439_v36 }
 0xe70   : > { %v3442_v28 = vrot.slane %v3441_v57, 2 }
 0xe72   : > { %v3443_v14 = vadd.f32 %v3442_v28, %v3441_v57 }
 0xe74   : > { %v3444_v44 = vrot.slane %v3443_v14, 1 }
 0xe76   : > { %v3445_v46 = vadd.f32 %v3444_v44, %v3443_v14 }
 0xe78   : > { %v3448_v54 = vmul.f32 0.5, %v3445_v46 }
 0xe7a   : > { %v3451_v39 = vrot.slane %v3448_v54, 7 }
 0xe7c   : > { %v3452_v24 = vsel %vm3425_vm3, %v3451_v39, %v3447_v45 }
 0xe7d   : > { %3454 = vst [vmem:[%s5575_s12] sm:$0x3] %v3452_v24 }
 0xe7e PF: > { %s6487_s22 = sld [smem:[#allocation31_spill]]  ;;  %s6488_s25 = sld [smem:[#allocation43_spill]] }
 0xe7f   : > { %s6489_s1 = sld [smem:[#allocation39_spill]]  ;;  %s6490_s17 = sld [smem:[#allocation60_spill]] }
 0xe80   : > { %s3469_s3 = sshll.u32 %s5575_s12, 4  ;;  %s4965_s29 = smov [#allocation15]   ;;  %s3470_s3 = int_to_ptr.vmem [resolvable:$true] %s3469_s3 }
 0xe81   : > { %s4793_s26 = scalar_lea.vmem %s3470_s3, 32  ;;  %s4797_s30 = sshll.u32 %s4965_s29, 4  ;;  %s4798_s30 = int_to_ptr.vmem [resolvable:$false] %s4797_s30 }
 0xe82   : > { %p4794_p4 = scmp.ne.s32.totalorder %s3470_s3, %s4793_s26  ;;  %s4799_s0 = scalar_lea.vmem %s4798_s30, 64 }
 0xe83   : > { %p4800_p11 = scmp.lt.s32.totalorder %s3470_s3, %s4798_s30  ;;  %p4801_p7 = scmp.lt.s32.totalorder %s4799_s0, %s4793_s26 }
 0xe84   : > { %s3893_s4 = sshll.u32 %s6487_s22, 5  ;;  %s3456_s23 = scalar_lea.sflag [#allocation5], %s6488_s25 }
 0xe85   : > { %s6272_s10 = scalar_lea.hbm %s6490_s17, %s3893_s4  ;;  %p6491_p0 = scmp.ne.s32.totalorder %s6489_s1, 0 }
 0xe86   : > { %p4802_p3 = por %p4801_p7, %p4800_p11 }
 0xe87   : > { %p4795_p8 = pnand %p4794_p4, %p6491_p0 }
 0xe89   : > { %p4796_p10 = pneg %p4795_p8 }
 0xe8b   : > { %p4803_p9 = pnand %p4802_p3, %p4796_p10 }
 0xe8d   : > { %4806 = shalt.err (!%p4803_p9)
}
 0xe8e   : > { %s4807_s12 = scalar_lea.hbm %s6272_s10, 32  ;;  %s4811_s20 = scalar_lea.hbm %s6490_s17, 64 }
 0xe8f   : > { %p4808_p5 = scmp.ne.s32.totalorder %s6272_s10, %s4807_s12  ;;  %p4812_p1 = scmp.lt.u32.totalorder %s6272_s10, %s6490_s17 }
 0xe90   : > { %p4813_p13 = scmp.lt.u32.totalorder %s4811_s20, %s4807_s12  ;;  %p4815_p4 = scmp.lt.u32.totalorder %s4807_s12, %s6272_s10 }
 0xe91   : > { %p4809_p12 = pnand %p4808_p5, %p6491_p0 }
 0xe92   : > { %p4814_p6 = por %p4813_p13, %p4812_p1 }
 0xe93   : > { %p4810_p2 = pneg %p4809_p12 }
 0xe94   : > { %p4816_p8 = por %p4815_p4, %p4814_p6 }
 0xe96   : > { %p4817_p10 = pnand %p4816_p8, %p4810_p2 }
 0xe98   : > { %4820 = shalt.err (!%p4817_p10)
}
 0xe99   : > { %4185 = dma.vmem_to_hbm [thread:$0]  (%p6491_p0), %s3470_s3, 32, %s6272_s10, %s3456_s23  }
 0xe9a PF: > { %s6492_s7 = sld [smem:[#allocation34_spill]]  ;;  %s6493_s13 = sld [smem:[#allocation27_spill]] }
 0xe9b   : > { %s6494_s27 = sld [smem:[#allocation37_spill]] }
 0xea0   : > { %p4222_p11 = scmp.ge.s32.totalorder %s6492_s7, 2  ;;  %s3481_s14 = sand.u32 1, %s6493_s13  }
 0xea1   : > { %p6495_p7 = scmp.ne.s32.totalorder %s6494_s27, 0  ;;  %s3482_s15 = scalar_lea.sflag [#allocation5], %s3481_s14 }
 0xea3   : > { %p4214_p3 = pnand %p4222_p11, %p6495_p7 }
 0xea5   : > { %4898 = dma.done.wait (!%p4214_p3), %s3482_s15, 32  }
 0xea6   : > { %4900 = vsyncadd (!%p4214_p3), %s3482_s15, 4294967264  ;;  %s36_s0 = sadd.s32 1, %s6492_s7   ;;  %s6496_s21 = sld [smem:[#allocation25_spill]] }
 0xea7   : > { %p33_p9 = scmp.ge.s32.totalorder %s36_s0, 6   ;;  %s6497_s22 = sld [smem:[#allocation26_spill]] }
 0xea8   : > { %s6498_s23 = sld [smem:[#allocation41_spill]]  ;;  %s6499_s24 = sld [smem:[#allocation28_spill]] }
 0xea9   : > { %s6500_s25 = sld [smem:[#allocation29_spill]]  ;;  %s6501_s26 = sld [smem:[#allocation42_spill]] }
 0xeaa   : > { %s6502_s27 = sld [smem:[#allocation32_spill]]  ;;  %s6503_s28 = sld [smem:[#allocation33_spill]] }
 0xeab   : > { %s6504_s29 = sld [smem:[#allocation38_spill]]  ;;  %s6505_s30 = sld [smem:[#allocation40_spill]] }
 0xeac   :  { %35 = sbr.rel (!%p33_p9) target bundleno = 30 (0x1e), region = 227 }
 0xeb3   :  { %3487 = vsyncpa [#allocation4], 1 }
 0xeb4   :  { %3489 = vsyncpa [#allocation4 + $0x1], 1 }
 0xeb5   :  { %3490 = vsyncpa [#allocation7], 1 }
 0xeb6   :  { %3492 = vsyncpa [#allocation7 + $0x1], 1 }
 0xeb7   :  { %3493 = vsyncpa [#allocation10], 1 }
 0xeb8   :  { %3494 = vsyncpa [#allocation5], 1 }
 0xeb9   :  { %3496 = vsyncpa [#allocation5 + $0x1], 1 }

</bundles_post_ra>
